<compile_context>
chip_gen: v6e
topology: v6e:2x2x1
jax: 0.10.0
libtpu: 0.0.40
codegen_flags: <defaults>
</compile_context>

<pallas_src>
import functools
import numpy as np

import jax
import jax.numpy as jnp
from jax import lax
from jax.experimental import pallas as pl
from jax.experimental.pallas import tpu as pltpu

_BF16 = jnp.bfloat16


# --------------------------------------------------------------------------
# In-kernel helpers
# --------------------------------------------------------------------------
def _layernorm(y, gamma, beta, eps=1e-6):
    mean = jnp.mean(y, axis=-1, keepdims=True)
    var = jnp.mean((y - mean) ** 2, axis=-1, keepdims=True)
    return (y - mean) * lax.rsqrt(var + eps) * gamma + beta


def _attention_sublayer(xq, xkv, wqkv, wo, gamma, beta, *, n_head, d_k, d_v, fused_qkv):
    """Multi-head attention + residual + LayerNorm on a (Bt, L, D) batch tile.

    Projections / output matmul are folded over Bt*L rows (fills the MXU M dim); the
    small per-head score/softmax/context einsums run per batch row with heads batched.
    wqkv = Wq|Wk|Wv concatenated, already bf16 (host cast); wo already bf16.
    """
    Bt, Lq, D = xq.shape
    Lk = xkv.shape[1]
    hk = n_head * d_k
    hv = n_head * d_v

    xq2 = xq.reshape(Bt * Lq, D).astype(_BF16)
    if fused_qkv:                       # self-attention: one fused QKV projection
        qkv = jnp.dot(xq2, wqkv, preferred_element_type=jnp.float32)
        q, k, v = qkv[:, :hk], qkv[:, hk:2 * hk], qkv[:, 2 * hk:]
    else:                               # cross-attention: Q from decoder, KV from encoder
        xkv2 = xkv.reshape(Bt * Lk, D).astype(_BF16)
        q = jnp.dot(xq2, wqkv[:, :hk], preferred_element_type=jnp.float32)
        kv = jnp.dot(xkv2, wqkv[:, hk:], preferred_element_type=jnp.float32)
        k, v = kv[:, :hk], kv[:, hk:]

    # fold 1/sqrt(d_k) into Q: O(Bt*Lq*H*d_k) instead of O(Bt*H*Lq*Lk) scaling
    q = q * (1.0 / (d_k ** 0.5))

    # TODO(synk): flash-tile over Lk for long sequences (scores grow O(Lq*Lk)).
    ctx_rows = []
    for b in range(Bt):                 # static & small; heads batched inside
        qb = q[b * Lq:(b + 1) * Lq].reshape(Lq, n_head, d_k).transpose(1, 0, 2)
        kb = k[b * Lk:(b + 1) * Lk].reshape(Lk, n_head, d_k).transpose(1, 0, 2)
        vb = v[b * Lk:(b + 1) * Lk].reshape(Lk, n_head, d_v).transpose(1, 0, 2)
        s = jnp.einsum("hqd,hkd->hqk", qb.astype(_BF16), kb.astype(_BF16),
                       preferred_element_type=jnp.float32)          # (H, Lq, Lk)
        m = jnp.max(s, axis=-1, keepdims=True)
        p = jnp.exp(s - m)
        denom = jnp.sum(p, axis=-1, keepdims=True)
        ctx = jnp.einsum("hqk,hkd->hqd", p.astype(_BF16), vb.astype(_BF16),
                         preferred_element_type=jnp.float32)         # (H, Lq, d_v)
        ctx = ctx * pl.reciprocal(denom, approx=True)                # deferred softmax norm
        ctx_rows.append(ctx.transpose(1, 0, 2).reshape(Lq, hv))      # concat heads
    o = jnp.concatenate(ctx_rows, axis=0) if Bt > 1 else ctx_rows[0]  # (Bt*Lq, H*dv)

    out = jnp.dot(o.astype(_BF16), wo, preferred_element_type=jnp.float32)
    return _layernorm(out.reshape(Bt, Lq, D) + xq, gamma, beta)


def _ffn_sublayer(x, w1, b1, w2, b2, gamma, beta):
    Bt, L, D = x.shape
    x2 = x.reshape(Bt * L, D)
    h = jnp.dot(x2.astype(_BF16), w1, preferred_element_type=jnp.float32) + b1
    h = jnp.maximum(h, 0.0)
    o = jnp.dot(h.astype(_BF16), w2, preferred_element_type=jnp.float32) + b2
    return _layernorm(o.reshape(Bt, L, D) + x, gamma, beta)


# --------------------------------------------------------------------------
# Kernel: one grid step = one decoder layer on one batch tile
# grid = (batch_tiles [parallel], n_layers [arbitrary, streamed weights])
# --------------------------------------------------------------------------
def decoder_kernel(emb_ref, pos_ref, enc_ref, ln0_g_ref, ln0_b_ref,
                   slf_wqkv_ref, slf_wo_ref, slf_g_ref, slf_b_ref,
                   enc_wqkv_ref, enc_wo_ref, enc_g_ref, enc_b_ref,
                   ffn_w1_ref, ffn_b1_ref, ffn_w2_ref, ffn_b2_ref,
                   ffn_g_ref, ffn_b_ref,
                   out_ref, x_scratch, *, n_head, d_k, d_v, scale):
    l = pl.program_id(1)

    @pl.when(l == 0)                    # embedding-scale + positional enc + LayerNorm
    def _():
        x0 = emb_ref[...]
        if scale != 1.0:
            x0 = x0 * scale
        x_scratch[...] = _layernorm(x0 + pos_ref[...], ln0_g_ref[...], ln0_b_ref[...])

    x = x_scratch[...]                                   # (Bt, L_trg, D) carried activation

    x = _attention_sublayer(x, x, slf_wqkv_ref[0], slf_wo_ref[0],
                            slf_g_ref[0], slf_b_ref[0],
                            n_head=n_head, d_k=d_k, d_v=d_v, fused_qkv=True)
    x = _attention_sublayer(x, enc_ref[...], enc_wqkv_ref[0], enc_wo_ref[0],
                            enc_g_ref[0], enc_b_ref[0],
                            n_head=n_head, d_k=d_k, d_v=d_v, fused_qkv=False)
    x = _ffn_sublayer(x, ffn_w1_ref[0], ffn_b1_ref[0], ffn_w2_ref[0],
                      ffn_b2_ref[0], ffn_g_ref[0], ffn_b_ref[0])

    x_scratch[...] = x

    @pl.when(l == pl.num_programs(1) - 1)
    def _():
        out_ref[...] = x.astype(out_ref.dtype)


# --------------------------------------------------------------------------
# Parameter construction (deterministic, matches nn.Module shapes)
# --------------------------------------------------------------------------
def sinusoid_table(n_position, d_hid):
    pe = np.array(
        [[pos / np.power(10000, 2 * (j // 2) / d_hid) for j in range(d_hid)]
         if pos != 0 else np.zeros(d_hid) for pos in range(n_position)],
        dtype=np.float64)
    pe[:, 0::2] = np.sin(pe[:, 0::2])
    pe[:, 1::2] = np.cos(pe[:, 1::2])
    return jnp.asarray(pe[None], dtype=jnp.float32)        # (1, n_position, d_hid)


def init_decoder_params(key, n_tgt_vocab, d_word_vec, n_layers, n_head, d_k, d_v,
                        d_model, d_inner, pad_idx, n_position=200):
    def nrm(k, shape, std=0.05):
        return std * jax.random.normal(k, shape, dtype=jnp.float32)

    n_per_layer = 10
    keys = jax.random.split(key, 1 + n_per_layer * n_layers)
    emb = nrm(keys[0], (n_tgt_vocab, d_word_vec))
    emb = emb.at[pad_idx].set(0.0)                          # nn.Embedding padding_idx row = 0

    ones = jnp.ones((1, d_model), jnp.float32)
    zeros = jnp.zeros((1, d_model), jnp.float32)
    params = {"emb": emb, "pos_table": sinusoid_table(n_position, d_word_vec),
              "ln0_g": ones, "ln0_b": zeros, "layers": []}
    for l in range(n_layers):
        k = keys[1 + n_per_layer * l: 1 + n_per_layer * (l + 1)]
        layer = {
            "slf": dict(wq=nrm(k[0], (d_model, n_head * d_k)),
                        wk=nrm(k[1], (d_model, n_head * d_k)),
                        wv=nrm(k[2], (d_model, n_head * d_v)),
                        wo=nrm(k[3], (n_head * d_v, d_model)),
                        g=ones, b=zeros),
            "enc": dict(wq=nrm(k[4], (d_model, n_head * d_k)),
                        wk=nrm(k[5], (d_model, n_head * d_k)),
                        wv=nrm(k[6], (d_model, n_head * d_v)),
                        wo=nrm(k[7], (n_head * d_v, d_model)),
                        g=ones, b=zeros),
            "ffn": dict(w1=nrm(k[8], (d_model, d_inner)),
                        b1=jnp.zeros((1, d_inner), jnp.float32),
                        w2=nrm(k[9], (d_inner, d_model)),
                        b2=zeros, g=ones, b=zeros),
        }
        params["layers"].append(layer)
    return params


# --------------------------------------------------------------------------
# Decoder forward: one pallas_call for the whole stack, layer-streamed weights
# --------------------------------------------------------------------------
def decoder_forward(params, trg_seq, enc_output, *, n_head, d_k, d_v,
                    d_model, scale_emb=False, batch_tile=None):
    B, L = trg_seq.shape
    L_src = enc_output.shape[1]
    D = d_model
    n_layers = len(params["layers"])

    Bt = batch_tile if batch_tile is not None else (2 if B % 2 == 0 else 1)
    assert B % Bt == 0, "batch must be divisible by the batch tile"
    nb = B // Bt

    # Embedding gather (host glue); dropout is identity in eval mode.
    # TODO(synk): at production d_model, gather in-kernel (scalar-prefetch trg_seq).
    emb = params["emb"][trg_seq]                            # (B, L, D) f32
    pos = params["pos_table"][:, :L, :]                     # (1, L, D) f32
    enc_bf = enc_output.astype(_BF16)                       # KV-only -> host bf16 cast
    scale = float(np.sqrt(d_model)) if scale_emb else 1.0

    # Stack per-layer weights along a leading layer axis; matmul weights -> bf16 on host.
    def stack(getter, dtype=None):
        w = jnp.stack([getter(layer) for layer in params["layers"]], axis=0)
        return w.astype(dtype) if dtype is not None else w

    slf_wqkv = stack(lambda l: jnp.concatenate(
        [l["slf"]["wq"], l["slf"]["wk"], l["slf"]["wv"]], axis=1), _BF16)
    slf_wo = stack(lambda l: l["slf"]["wo"], _BF16)
    slf_g = stack(lambda l: l["slf"]["g"])
    slf_b = stack(lambda l: l["slf"]["b"])
    enc_wqkv = stack(lambda l: jnp.concatenate(
        [l["enc"]["wq"], l["enc"]["wk"], l["enc"]["wv"]], axis=1), _BF16)
    enc_wo = stack(lambda l: l["enc"]["wo"], _BF16)
    enc_g = stack(lambda l: l["enc"]["g"])
    enc_b = stack(lambda l: l["enc"]["b"])
    ffn_w1 = stack(lambda l: l["ffn"]["w1"], _BF16)
    ffn_b1 = stack(lambda l: l["ffn"]["b1"])
    ffn_w2 = stack(lambda l: l["ffn"]["w2"], _BF16)
    ffn_b2 = stack(lambda l: l["ffn"]["b2"])
    ffn_g = stack(lambda l: l["ffn"]["g"])
    ffn_b = stack(lambda l: l["ffn"]["b"])

    batch_map = lambda b, l: (b, 0, 0)                      # per-batch-tile blocks
    layer_map = lambda b, l: (l, 0, 0)                      # streamed per-layer weights

    def const_entry(arr):                                   # broadcast across the whole grid
        zeros = (0,) * arr.ndim
        return (arr, arr.shape, lambda b, l, _z=zeros: _z)

    def layer_entry(arr):
        return (arr, (1,) + arr.shape[1:], layer_map)

    operands = [
        (emb, (Bt, L, D), batch_map),
        const_entry(pos),
        (enc_bf, (Bt, L_src, D), batch_map),
        const_entry(params["ln0_g"]), const_entry(params["ln0_b"]),
        layer_entry(slf_wqkv), layer_entry(slf_wo), layer_entry(slf_g), layer_entry(slf_b),
        layer_entry(enc_wqkv), layer_entry(enc_wo), layer_entry(enc_g), layer_entry(enc_b),
        layer_entry(ffn_w1), layer_entry(ffn_b1), layer_entry(ffn_w2), layer_entry(ffn_b2),
        layer_entry(ffn_g), layer_entry(ffn_b),
    ]
    args = [a for a, _, _ in operands]
    in_specs = [pl.BlockSpec(blk, imap) for _, blk, imap in operands]

    # Explicit VMEM budget: double-buffered blocks + output + carried scratch + headroom.
    vmem_bytes = sum(2 * int(np.prod(blk)) * np.dtype(a.dtype).itemsize
                     for a, blk, _ in operands)
    vmem_bytes += 2 * Bt * L * D * 4                        # output block (double-buffered)
    vmem_bytes += Bt * L * D * 4                            # carried-x scratch
    vmem_limit = int(min(max(vmem_bytes + (8 << 20), 32 << 20), 64 << 20))

    kernel = functools.partial(decoder_kernel, n_head=n_head, d_k=d_k, d_v=d_v, scale=scale)

    out = pl.pallas_call(
        kernel,
        out_shape=jax.ShapeDtypeStruct((B, L, D), jnp.float32),
        grid=(nb, n_layers),
        in_specs=in_specs,
        out_specs=pl.BlockSpec((Bt, L, D), batch_map),
        scratch_shapes=[pltpu.VMEM((Bt, L, D), jnp.float32)],
        compiler_params=pltpu.CompilerParams(
            dimension_semantics=("parallel", "arbitrary"),
            vmem_limit_bytes=vmem_limit),
    )(*args)
    return (out,)                                           # matches PyTorch `return (dec_output,)`


# --------------------------------------------------------------------------
# Pure-JAX f32 reference (for correctness check)
# --------------------------------------------------------------------------
def _ln_ref(y, g, b, eps=1e-6):
    m = y.mean(-1, keepdims=True)
    v = ((y - m) ** 2).mean(-1, keepdims=True)
    return (y - m) / jnp.sqrt(v + eps) * g + b


def _mha_ref(xq, xkv, w, n_head, d_k, d_v):
    B, Lq, D = xq.shape
    Lk = xkv.shape[1]
    q = (xq @ w["wq"]).reshape(B, Lq, n_head, d_k).transpose(0, 2, 1, 3)
    k = (xkv @ w["wk"]).reshape(B, Lk, n_head, d_k).transpose(0, 2, 1, 3)
    v = (xkv @ w["wv"]).reshape(B, Lk, n_head, d_v).transpose(0, 2, 1, 3)
    s = jnp.einsum("bhqd,bhkd->bhqk", q, k) / (d_k ** 0.5)
    p = jax.nn.softmax(s, axis=-1)
    o = jnp.einsum("bhqk,bhkd->bhqd", p, v).transpose(0, 2, 1, 3).reshape(B, Lq, -1)
    return _ln_ref(o @ w["wo"] + xq, w["g"], w["b"])


def decoder_ref(params, trg_seq, enc_output, *, n_head, d_k, d_v, d_model,
                scale_emb=False):
    emb = params["emb"][trg_seq]
    pos = params["pos_table"][:, :trg_seq.shape[1], :]
    scale = float(np.sqrt(d_model)) if scale_emb else 1.0
    x = _ln_ref(emb * scale + pos, params["ln0_g"], params["ln0_b"])
    for layer in params["layers"]:
        x = _mha_ref(x, x, layer["slf"], n_head, d_k, d_v)
        x = _mha_ref(x, enc_output, layer["enc"], n_head, d_k, d_v)
        f = layer["ffn"]
        h = jnp.maximum(x @ f["w1"] + f["b1"], 0.0)
        x = _ln_ref(h @ f["w2"] + f["b2"] + x, f["g"], f["b"])
    return x


# --------------------------------------------------------------------------
if __name__ == "__main__":
    # Small deterministic config
    n_tgt_vocab, d_word_vec, d_model = 100, 32, 32
    n_layers, n_head, d_k, d_v, d_inner = 2, 4, 8, 8, 64
    pad_idx, n_position = 0, 200
    B, L_trg, L_src = 4, 8, 12          # B=4, Bt=2 -> 2 "parallel" grid steps (2 v7x TCs)

    key = jax.random.PRNGKey(0)
    k_par, k_seq, k_enc = jax.random.split(key, 3)

    params = init_decoder_params(k_par, n_tgt_vocab, d_word_vec, n_layers,
                                 n_head, d_k, d_v, d_model, d_inner,
                                 pad_idx, n_position)
    trg_seq = jax.random.randint(k_seq, (B, L_trg), 1, n_tgt_vocab, dtype=jnp.int32)
    enc_output = jax.random.normal(k_enc, (B, L_src, d_model), dtype=jnp.float32)

    (dec_out,) = decoder_forward(params, trg_seq, enc_output,
                                 n_head=n_head, d_k=d_k, d_v=d_v,
                                 d_model=d_model, scale_emb=False, batch_tile=2)
    dec_out = jax.block_until_ready(dec_out)

    ref = decoder_ref(params, trg_seq, enc_output,
                      n_head=n_head, d_k=d_k, d_v=d_v,
                      d_model=d_model, scale_emb=False)
    # Kernel does bf16 MXU matmuls with f32 accumulation; reference is pure f32,
    # so compare with a mixed-precision tolerance.
    np.testing.assert_allclose(np.asarray(dec_out), np.asarray(ref),
                               rtol=3e-2, atol=3e-2)

    assert dec_out.shape == (B, L_trg, d_model)
    print("KERNEL_OK")
</pallas_src>

<mosaic_0001>
module attributes {stable_mosaic.version = 11 : i64} {
  func.func @decoder_kernel(%arg0: i32, %arg1: i32, %arg2: memref<2x8x32xf32, #tpu.memory_space<vmem>>, %arg3: memref<1x8x32xf32, #tpu.memory_space<vmem>>, %arg4: memref<2x12x32xbf16, #tpu.memory_space<vmem>>, %arg5: memref<1x32xf32, #tpu.memory_space<vmem>>, %arg6: memref<1x32xf32, #tpu.memory_space<vmem>>, %arg7: memref<1x32x96xbf16, #tpu.memory_space<vmem>>, %arg8: memref<1x32x32xbf16, #tpu.memory_space<vmem>>, %arg9: memref<1x1x32xf32, #tpu.memory_space<vmem>>, %arg10: memref<1x1x32xf32, #tpu.memory_space<vmem>>, %arg11: memref<1x32x96xbf16, #tpu.memory_space<vmem>>, %arg12: memref<1x32x32xbf16, #tpu.memory_space<vmem>>, %arg13: memref<1x1x32xf32, #tpu.memory_space<vmem>>, %arg14: memref<1x1x32xf32, #tpu.memory_space<vmem>>, %arg15: memref<1x32x64xbf16, #tpu.memory_space<vmem>>, %arg16: memref<1x1x64xf32, #tpu.memory_space<vmem>>, %arg17: memref<1x64x32xbf16, #tpu.memory_space<vmem>>, %arg18: memref<1x1x32xf32, #tpu.memory_space<vmem>>, %arg19: memref<1x1x32xf32, #tpu.memory_space<vmem>>, %arg20: memref<1x1x32xf32, #tpu.memory_space<vmem>>, %arg21: memref<2x8x32xf32, #tpu.memory_space<vmem>>, %arg22: memref<2x8x32xf32, #tpu.memory_space<vmem>>) attributes {dimension_semantics = [#tpu.dimension_semantics<parallel>, #tpu.dimension_semantics<arbitrary>], iteration_bounds = array<i64: 2, 2>, scalar_prefetch = 0 : i64, scratch_operands = 1 : i64, tpu.core_type = #tpu.core_type<tc>, window_params = [{transform_indices = @transform_0, window_bounds = array<i64: 2, 8, 32>}, {pipeline_mode = #tpu.pipeline_mode<synchronous>, transform_indices = @transform_1, window_bounds = array<i64: 1, 8, 32>}, {transform_indices = @transform_2, window_bounds = array<i64: 2, 12, 32>}, {pipeline_mode = #tpu.pipeline_mode<synchronous>, transform_indices = @transform_3, window_bounds = array<i64: 1, 32>}, {pipeline_mode = #tpu.pipeline_mode<synchronous>, transform_indices = @transform_4, window_bounds = array<i64: 1, 32>}, {transform_indices = @transform_5, window_bounds = array<i64: 1, 32, 96>}, {transform_indices = @transform_6, window_bounds = array<i64: 1, 32, 32>}, {transform_indices = @transform_7, window_bounds = array<i64: 1, 1, 32>}, {transform_indices = @transform_8, window_bounds = array<i64: 1, 1, 32>}, {transform_indices = @transform_9, window_bounds = array<i64: 1, 32, 96>}, {transform_indices = @transform_10, window_bounds = array<i64: 1, 32, 32>}, {transform_indices = @transform_11, window_bounds = array<i64: 1, 1, 32>}, {transform_indices = @transform_12, window_bounds = array<i64: 1, 1, 32>}, {transform_indices = @transform_13, window_bounds = array<i64: 1, 32, 64>}, {transform_indices = @transform_14, window_bounds = array<i64: 1, 1, 64>}, {transform_indices = @transform_15, window_bounds = array<i64: 1, 64, 32>}, {transform_indices = @transform_16, window_bounds = array<i64: 1, 1, 32>}, {transform_indices = @transform_17, window_bounds = array<i64: 1, 1, 32>}, {transform_indices = @transform_18, window_bounds = array<i64: 1, 1, 32>}, {transform_indices = @transform_19, window_bounds = array<i64: 2, 8, 32>}]} {
    %c0_i32 = arith.constant 0 : i32
    %0 = arith.cmpi eq, %arg1, %c0_i32 : i32
    %1 = arith.extui %0 : i1 to i32
    %c0_i32_0 = arith.constant 0 : i32
    %2 = arith.cmpi ne, %1, %c0_i32_0 : i32
    scf.if %2 {
      %c0_92 = arith.constant 0 : index
      %c0_93 = arith.constant 0 : index
      %c0_94 = arith.constant 0 : index
      %259 = vector.load %arg2[%c0_92, %c0_93, %c0_94] : memref<2x8x32xf32, #tpu.memory_space<vmem>>, vector<2x8x32xf32>
      %c0_95 = arith.constant 0 : index
      %c0_96 = arith.constant 0 : index
      %c0_97 = arith.constant 0 : index
      %260 = vector.load %arg3[%c0_95, %c0_96, %c0_97] : memref<1x8x32xf32, #tpu.memory_space<vmem>>, vector<1x8x32xf32>
      %261 = vector.broadcast %260 : vector<1x8x32xf32> to vector<2x8x32xf32>
      %262 = arith.addf %259, %261 : vector<2x8x32xf32>
      %c0_98 = arith.constant 0 : index
      %c0_99 = arith.constant 0 : index
      %263 = vector.load %arg5[%c0_98, %c0_99] : memref<1x32xf32, #tpu.memory_space<vmem>>, vector<1x32xf32>
      %c0_100 = arith.constant 0 : index
      %c0_101 = arith.constant 0 : index
      %264 = vector.load %arg6[%c0_100, %c0_101] : memref<1x32xf32, #tpu.memory_space<vmem>>, vector<1x32xf32>
      %cst_102 = arith.constant dense<0.000000e+00> : vector<2x8xf32>
      %265 = vector.multi_reduction <add>, %262, %cst_102 [2] : vector<2x8x32xf32> to vector<2x8xf32>
      %266 = vector.shape_cast %265 : vector<2x8xf32> to vector<2x8x1xf32>
      %cst_103 = arith.constant 3.200000e+01 : f32
      %267 = vector.broadcast %cst_103 : f32 to vector<2x8x1xf32>
      %268 = arith.divf %266, %267 : vector<2x8x1xf32>
      %269 = vector.broadcast %268 : vector<2x8x1xf32> to vector<2x8x32xf32>
      %270 = arith.subf %262, %269 : vector<2x8x32xf32>
      %271 = arith.mulf %270, %270 : vector<2x8x32xf32>
      %cst_104 = arith.constant dense<0.000000e+00> : vector<2x8xf32>
      %272 = vector.multi_reduction <add>, %271, %cst_104 [2] : vector<2x8x32xf32> to vector<2x8xf32>
      %273 = vector.shape_cast %272 : vector<2x8xf32> to vector<2x8x1xf32>
      %cst_105 = arith.constant 3.200000e+01 : f32
      %274 = vector.broadcast %cst_105 : f32 to vector<2x8x1xf32>
      %275 = arith.divf %273, %274 : vector<2x8x1xf32>
      %276 = vector.broadcast %268 : vector<2x8x1xf32> to vector<2x8x32xf32>
      %277 = arith.subf %262, %276 : vector<2x8x32xf32>
      %cst_106 = arith.constant 9.99999997E-7 : f32
      %278 = vector.broadcast %cst_106 : f32 to vector<2x8x1xf32>
      %279 = arith.addf %275, %278 : vector<2x8x1xf32>
      %280 = math.rsqrt %279 : vector<2x8x1xf32>
      %281 = vector.broadcast %280 : vector<2x8x1xf32> to vector<2x8x32xf32>
      %282 = arith.mulf %277, %281 : vector<2x8x32xf32>
      %283 = vector.shape_cast %263 : vector<1x32xf32> to vector<1x1x32xf32>
      %284 = vector.broadcast %283 : vector<1x1x32xf32> to vector<2x8x32xf32>
      %285 = arith.mulf %282, %284 : vector<2x8x32xf32>
      %286 = vector.shape_cast %264 : vector<1x32xf32> to vector<1x1x32xf32>
      %287 = vector.broadcast %286 : vector<1x1x32xf32> to vector<2x8x32xf32>
      %288 = arith.addf %285, %287 : vector<2x8x32xf32>
      %c0_107 = arith.constant 0 : index
      %c0_108 = arith.constant 0 : index
      %c0_109 = arith.constant 0 : index
      %289 = vector.load %arg22[%c0_107, %c0_108, %c0_109] : memref<2x8x32xf32, #tpu.memory_space<vmem>>, vector<2x8x32xf32>
      tpu.vector_store %arg22[%c0_107, %c0_108, %c0_109], %288 {strides = array<i32>} : memref<2x8x32xf32, #tpu.memory_space<vmem>>, vector<2x8x32xf32>,
    } else {
    }
    %c0 = arith.constant 0 : index
    %c0_1 = arith.constant 0 : index
    %c0_2 = arith.constant 0 : index
    %3 = vector.load %arg22[%c0, %c0_1, %c0_2] : memref<2x8x32xf32, #tpu.memory_space<vmem>>, vector<2x8x32xf32>
    %c0_3 = arith.constant 0 : index
    %c0_4 = arith.constant 0 : index
    %c0_5 = arith.constant 0 : index
    %4 = vector.load %arg7[%c0_3, %c0_4, %c0_5] : memref<1x32x96xbf16, #tpu.memory_space<vmem>>, vector<1x32x96xbf16>
    %5 = vector.shape_cast %4 : vector<1x32x96xbf16> to vector<32x96xbf16>
    %c0_6 = arith.constant 0 : index
    %c0_7 = arith.constant 0 : index
    %c0_8 = arith.constant 0 : index
    %6 = vector.load %arg8[%c0_6, %c0_7, %c0_8] : memref<1x32x32xbf16, #tpu.memory_space<vmem>>, vector<1x32x32xbf16>
    %7 = vector.shape_cast %6 : vector<1x32x32xbf16> to vector<32x32xbf16>
    %c0_9 = arith.constant 0 : index
    %c0_10 = arith.constant 0 : index
    %c0_11 = arith.constant 0 : index
    %8 = vector.load %arg9[%c0_9, %c0_10, %c0_11] : memref<1x1x32xf32, #tpu.memory_space<vmem>>, vector<1x1x32xf32>
    %9 = vector.shape_cast %8 : vector<1x1x32xf32> to vector<1x32xf32>
    %c0_12 = arith.constant 0 : index
    %c0_13 = arith.constant 0 : index
    %c0_14 = arith.constant 0 : index
    %10 = vector.load %arg10[%c0_12, %c0_13, %c0_14] : memref<1x1x32xf32, #tpu.memory_space<vmem>>, vector<1x1x32xf32>
    %11 = vector.shape_cast %10 : vector<1x1x32xf32> to vector<1x32xf32>
    %12 = vector.shape_cast %3 : vector<2x8x32xf32> to vector<16x32xf32>
    %13 = arith.truncf %12 : vector<16x32xf32> to vector<16x32xbf16>
    %cst = arith.constant dense<0.000000e+00> : vector<16x96xf32>
    %14 = tpu.matmul %13, %5, %cst {dimension_numbers = #tpu.dot_dimension_numbers<[1], [0], [0], [1], [0, 0, 1, 1], [], []>} : vector<16x32xbf16>, vector<32x96xbf16>, vector<16x96xf32> -> vector<16x96xf32>
    %15 = vector.extract_strided_slice %14 {offsets = [0, 0], sizes = [16, 32], strides = [1, 1]} : vector<16x96xf32> to vector<16x32xf32>
    %16 = vector.extract_strided_slice %14 {offsets = [0, 32], sizes = [16, 32], strides = [1, 1]} : vector<16x96xf32> to vector<16x32xf32>
    %17 = vector.extract_strided_slice %14 {offsets = [0, 64], sizes = [16, 32], strides = [1, 1]} : vector<16x96xf32> to vector<16x32xf32>
    %cst_15 = arith.constant 0.353553385 : f32
    %18 = vector.broadcast %cst_15 : f32 to vector<16x32xf32>
    %19 = arith.mulf %15, %18 : vector<16x32xf32>
    %20 = vector.extract_strided_slice %19 {offsets = [0, 0], sizes = [8, 32], strides = [1, 1]} : vector<16x32xf32> to vector<8x32xf32>
    %21 = vector.shape_cast %20 : vector<8x32xf32> to vector<8x4x8xf32>
    %22 = tpu.transpose %21, [1, 0, 2] : vector<8x4x8xf32> -> vector<4x8x8xf32>
    %23 = vector.extract_strided_slice %16 {offsets = [0, 0], sizes = [8, 32], strides = [1, 1]} : vector<16x32xf32> to vector<8x32xf32>
    %24 = vector.shape_cast %23 : vector<8x32xf32> to vector<8x4x8xf32>
    %25 = tpu.transpose %24, [1, 0, 2] : vector<8x4x8xf32> -> vector<4x8x8xf32>
    %26 = vector.extract_strided_slice %17 {offsets = [0, 0], sizes = [8, 32], strides = [1, 1]} : vector<16x32xf32> to vector<8x32xf32>
    %27 = vector.shape_cast %26 : vector<8x32xf32> to vector<8x4x8xf32>
    %28 = tpu.transpose %27, [1, 0, 2] : vector<8x4x8xf32> -> vector<4x8x8xf32>
    %29 = arith.truncf %22 : vector<4x8x8xf32> to vector<4x8x8xbf16>
    %30 = arith.truncf %25 : vector<4x8x8xf32> to vector<4x8x8xbf16>
    "tpu.trace_start"() <{level = 10 : i32, message = "hqd,hkd->hqk"}> : () -> ()
    %cst_16 = arith.constant dense<0.000000e+00> : vector<4x8x8xf32>
    %31 = tpu.matmul %29, %30, %cst_16 {dimension_numbers = #tpu.dot_dimension_numbers<[2], [2], [1], [1], [0, 0, 0, 1, 1, 1], [0], [0]>} : vector<4x8x8xbf16>, vector<4x8x8xbf16>, vector<4x8x8xf32> -> vector<4x8x8xf32>
    "tpu.trace_stop"() : () -> ()
    %cst_17 = arith.constant dense<0xFF800000> : vector<4x8xf32>
    %32 = vector.multi_reduction <maximumf>, %31, %cst_17 [2] : vector<4x8x8xf32> to vector<4x8xf32>
    %33 = vector.shape_cast %32 : vector<4x8xf32> to vector<4x8x1xf32>
    %34 = vector.broadcast %33 : vector<4x8x1xf32> to vector<4x8x8xf32>
    %35 = arith.subf %31, %34 : vector<4x8x8xf32>
    %36 = math.exp %35 : vector<4x8x8xf32>
    %cst_18 = arith.constant dense<0.000000e+00> : vector<4x8xf32>
    %37 = vector.multi_reduction <add>, %36, %cst_18 [2] : vector<4x8x8xf32> to vector<4x8xf32>
    %38 = vector.shape_cast %37 : vector<4x8xf32> to vector<4x8x1xf32>
    %39 = arith.truncf %36 : vector<4x8x8xf32> to vector<4x8x8xbf16>
    %40 = arith.truncf %28 : vector<4x8x8xf32> to vector<4x8x8xbf16>
    "tpu.trace_start"() <{level = 10 : i32, message = "hqk,hkd->hqd"}> : () -> ()
    %cst_19 = arith.constant dense<0.000000e+00> : vector<4x8x8xf32>
    %41 = tpu.matmul %39, %40, %cst_19 {dimension_numbers = #tpu.dot_dimension_numbers<[2], [1], [1], [2], [0, 0, 0, 1, 1, 2], [0], [0]>} : vector<4x8x8xbf16>, vector<4x8x8xbf16>, vector<4x8x8xf32> -> vector<4x8x8xf32>
    "tpu.trace_stop"() : () -> ()
    %42 = tpu.reciprocal %38 {approx = true} : vector<4x8x1xf32> -> vector<4x8x1xf32>
    %43 = vector.broadcast %42 : vector<4x8x1xf32> to vector<4x8x8xf32>
    %44 = arith.mulf %41, %43 : vector<4x8x8xf32>
    %45 = tpu.transpose %44, [1, 0, 2] : vector<4x8x8xf32> -> vector<8x4x8xf32>
    %46 = vector.shape_cast %45 : vector<8x4x8xf32> to vector<8x32xf32>
    %47 = vector.extract_strided_slice %19 {offsets = [8, 0], sizes = [8, 32], strides = [1, 1]} : vector<16x32xf32> to vector<8x32xf32>
    %48 = vector.shape_cast %47 : vector<8x32xf32> to vector<8x4x8xf32>
    %49 = tpu.transpose %48, [1, 0, 2] : vector<8x4x8xf32> -> vector<4x8x8xf32>
    %50 = vector.extract_strided_slice %16 {offsets = [8, 0], sizes = [8, 32], strides = [1, 1]} : vector<16x32xf32> to vector<8x32xf32>
    %51 = vector.shape_cast %50 : vector<8x32xf32> to vector<8x4x8xf32>
    %52 = tpu.transpose %51, [1, 0, 2] : vector<8x4x8xf32> -> vector<4x8x8xf32>
    %53 = vector.extract_strided_slice %17 {offsets = [8, 0], sizes = [8, 32], strides = [1, 1]} : vector<16x32xf32> to vector<8x32xf32>
    %54 = vector.shape_cast %53 : vector<8x32xf32> to vector<8x4x8xf32>
    %55 = tpu.transpose %54, [1, 0, 2] : vector<8x4x8xf32> -> vector<4x8x8xf32>
    %56 = arith.truncf %49 : vector<4x8x8xf32> to vector<4x8x8xbf16>
    %57 = arith.truncf %52 : vector<4x8x8xf32> to vector<4x8x8xbf16>
    "tpu.trace_start"() <{level = 10 : i32, message = "hqd,hkd->hqk"}> : () -> ()
    %cst_20 = arith.constant dense<0.000000e+00> : vector<4x8x8xf32>
    %58 = tpu.matmul %56, %57, %cst_20 {dimension_numbers = #tpu.dot_dimension_numbers<[2], [2], [1], [1], [0, 0, 0, 1, 1, 1], [0], [0]>} : vector<4x8x8xbf16>, vector<4x8x8xbf16>, vector<4x8x8xf32> -> vector<4x8x8xf32>
    "tpu.trace_stop"() : () -> ()
    %cst_21 = arith.constant dense<0xFF800000> : vector<4x8xf32>
    %59 = vector.multi_reduction <maximumf>, %58, %cst_21 [2] : vector<4x8x8xf32> to vector<4x8xf32>
    %60 = vector.shape_cast %59 : vector<4x8xf32> to vector<4x8x1xf32>
    %61 = vector.broadcast %60 : vector<4x8x1xf32> to vector<4x8x8xf32>
    %62 = arith.subf %58, %61 : vector<4x8x8xf32>
    %63 = math.exp %62 : vector<4x8x8xf32>
    %cst_22 = arith.constant dense<0.000000e+00> : vector<4x8xf32>
    %64 = vector.multi_reduction <add>, %63, %cst_22 [2] : vector<4x8x8xf32> to vector<4x8xf32>
    %65 = vector.shape_cast %64 : vector<4x8xf32> to vector<4x8x1xf32>
    %66 = arith.truncf %63 : vector<4x8x8xf32> to vector<4x8x8xbf16>
    %67 = arith.truncf %55 : vector<4x8x8xf32> to vector<4x8x8xbf16>
    "tpu.trace_start"() <{level = 10 : i32, message = "hqk,hkd->hqd"}> : () -> ()
    %cst_23 = arith.constant dense<0.000000e+00> : vector<4x8x8xf32>
    %68 = tpu.matmul %66, %67, %cst_23 {dimension_numbers = #tpu.dot_dimension_numbers<[2], [1], [1], [2], [0, 0, 0, 1, 1, 2], [0], [0]>} : vector<4x8x8xbf16>, vector<4x8x8xbf16>, vector<4x8x8xf32> -> vector<4x8x8xf32>
    "tpu.trace_stop"() : () -> ()
    %69 = tpu.reciprocal %65 {approx = true} : vector<4x8x1xf32> -> vector<4x8x1xf32>
    %70 = vector.broadcast %69 : vector<4x8x1xf32> to vector<4x8x8xf32>
    %71 = arith.mulf %68, %70 : vector<4x8x8xf32>
    %72 = tpu.transpose %71, [1, 0, 2] : vector<4x8x8xf32> -> vector<8x4x8xf32>
    %73 = vector.shape_cast %72 : vector<8x4x8xf32> to vector<8x32xf32>
    %74 = tpu.concatenate %46, %73 in 0 : vector<8x32xf32>, vector<8x32xf32> -> vector<16x32xf32>
    %75 = arith.truncf %74 : vector<16x32xf32> to vector<16x32xbf16>
    %cst_24 = arith.constant dense<0.000000e+00> : vector<16x32xf32>
    %76 = tpu.matmul %75, %7, %cst_24 {dimension_numbers = #tpu.dot_dimension_numbers<[1], [0], [0], [1], [0, 0, 1, 1], [], []>} : vector<16x32xbf16>, vector<32x32xbf16>, vector<16x32xf32> -> vector<16x32xf32>
    %77 = vector.shape_cast %76 : vector<16x32xf32> to vector<2x8x32xf32>
    %78 = arith.addf %77, %3 : vector<2x8x32xf32>
    %cst_25 = arith.constant dense<0.000000e+00> : vector<2x8xf32>
    %79 = vector.multi_reduction <add>, %78, %cst_25 [2] : vector<2x8x32xf32> to vector<2x8xf32>
    %80 = vector.shape_cast %79 : vector<2x8xf32> to vector<2x8x1xf32>
    %cst_26 = arith.constant 3.200000e+01 : f32
    %81 = vector.broadcast %cst_26 : f32 to vector<2x8x1xf32>
    %82 = arith.divf %80, %81 : vector<2x8x1xf32>
    %83 = vector.broadcast %82 : vector<2x8x1xf32> to vector<2x8x32xf32>
    %84 = arith.subf %78, %83 : vector<2x8x32xf32>
    %85 = arith.mulf %84, %84 : vector<2x8x32xf32>
    %cst_27 = arith.constant dense<0.000000e+00> : vector<2x8xf32>
    %86 = vector.multi_reduction <add>, %85, %cst_27 [2] : vector<2x8x32xf32> to vector<2x8xf32>
    %87 = vector.shape_cast %86 : vector<2x8xf32> to vector<2x8x1xf32>
    %cst_28 = arith.constant 3.200000e+01 : f32
    %88 = vector.broadcast %cst_28 : f32 to vector<2x8x1xf32>
    %89 = arith.divf %87, %88 : vector<2x8x1xf32>
    %90 = vector.broadcast %82 : vector<2x8x1xf32> to vector<2x8x32xf32>
    %91 = arith.subf %78, %90 : vector<2x8x32xf32>
    %cst_29 = arith.constant 9.99999997E-7 : f32
    %92 = vector.broadcast %cst_29 : f32 to vector<2x8x1xf32>
    %93 = arith.addf %89, %92 : vector<2x8x1xf32>
    %94 = math.rsqrt %93 : vector<2x8x1xf32>
    %95 = vector.broadcast %94 : vector<2x8x1xf32> to vector<2x8x32xf32>
    %96 = arith.mulf %91, %95 : vector<2x8x32xf32>
    %97 = vector.shape_cast %9 : vector<1x32xf32> to vector<1x1x32xf32>
    %98 = vector.broadcast %97 : vector<1x1x32xf32> to vector<2x8x32xf32>
    %99 = arith.mulf %96, %98 : vector<2x8x32xf32>
    %100 = vector.shape_cast %11 : vector<1x32xf32> to vector<1x1x32xf32>
    %101 = vector.broadcast %100 : vector<1x1x32xf32> to vector<2x8x32xf32>
    %102 = arith.addf %99, %101 : vector<2x8x32xf32>
    %c0_30 = arith.constant 0 : index
    %c0_31 = arith.constant 0 : index
    %c0_32 = arith.constant 0 : index
    %103 = vector.load %arg4[%c0_30, %c0_31, %c0_32] : memref<2x12x32xbf16, #tpu.memory_space<vmem>>, vector<2x12x32xbf16>
    %c0_33 = arith.constant 0 : index
    %c0_34 = arith.constant 0 : index
    %c0_35 = arith.constant 0 : index
    %104 = vector.load %arg11[%c0_33, %c0_34, %c0_35] : memref<1x32x96xbf16, #tpu.memory_space<vmem>>, vector<1x32x96xbf16>
    %105 = vector.shape_cast %104 : vector<1x32x96xbf16> to vector<32x96xbf16>
    %c0_36 = arith.constant 0 : index
    %c0_37 = arith.constant 0 : index
    %c0_38 = arith.constant 0 : index
    %106 = vector.load %arg12[%c0_36, %c0_37, %c0_38] : memref<1x32x32xbf16, #tpu.memory_space<vmem>>, vector<1x32x32xbf16>
    %107 = vector.shape_cast %106 : vector<1x32x32xbf16> to vector<32x32xbf16>
    %c0_39 = arith.constant 0 : index
    %c0_40 = arith.constant 0 : index
    %c0_41 = arith.constant 0 : index
    %108 = vector.load %arg13[%c0_39, %c0_40, %c0_41] : memref<1x1x32xf32, #tpu.memory_space<vmem>>, vector<1x1x32xf32>
    %109 = vector.shape_cast %108 : vector<1x1x32xf32> to vector<1x32xf32>
    %c0_42 = arith.constant 0 : index
    %c0_43 = arith.constant 0 : index
    %c0_44 = arith.constant 0 : index
    %110 = vector.load %arg14[%c0_42, %c0_43, %c0_44] : memref<1x1x32xf32, #tpu.memory_space<vmem>>, vector<1x1x32xf32>
    %111 = vector.shape_cast %110 : vector<1x1x32xf32> to vector<1x32xf32>
    %112 = vector.shape_cast %102 : vector<2x8x32xf32> to vector<16x32xf32>
    %113 = arith.truncf %112 : vector<16x32xf32> to vector<16x32xbf16>
    %114 = vector.shape_cast %103 : vector<2x12x32xbf16> to vector<24x32xbf16>
    %115 = vector.extract_strided_slice %105 {offsets = [0, 0], sizes = [32, 32], strides = [1, 1]} : vector<32x96xbf16> to vector<32x32xbf16>
    %cst_45 = arith.constant dense<0.000000e+00> : vector<16x32xf32>
    %116 = tpu.matmul %113, %115, %cst_45 {dimension_numbers = #tpu.dot_dimension_numbers<[1], [0], [0], [1], [0, 0, 1, 1], [], []>} : vector<16x32xbf16>, vector<32x32xbf16>, vector<16x32xf32> -> vector<16x32xf32>
    %117 = vector.extract_strided_slice %105 {offsets = [0, 32], sizes = [32, 64], strides = [1, 1]} : vector<32x96xbf16> to vector<32x64xbf16>
    %cst_46 = arith.constant dense<0.000000e+00> : vector<24x64xf32>
    %118 = tpu.matmul %114, %117, %cst_46 {dimension_numbers = #tpu.dot_dimension_numbers<[1], [0], [0], [1], [0, 0, 1, 1], [], []>} : vector<24x32xbf16>, vector<32x64xbf16>, vector<24x64xf32> -> vector<24x64xf32>
    %119 = vector.extract_strided_slice %118 {offsets = [0, 0], sizes = [24, 32], strides = [1, 1]} : vector<24x64xf32> to vector<24x32xf32>
    %120 = vector.extract_strided_slice %118 {offsets = [0, 32], sizes = [24, 32], strides = [1, 1]} : vector<24x64xf32> to vector<24x32xf32>
    %cst_47 = arith.constant 0.353553385 : f32
    %121 = vector.broadcast %cst_47 : f32 to vector<16x32xf32>
    %122 = arith.mulf %116, %121 : vector<16x32xf32>
    %123 = vector.extract_strided_slice %122 {offsets = [0, 0], sizes = [8, 32], strides = [1, 1]} : vector<16x32xf32> to vector<8x32xf32>
    %124 = vector.shape_cast %123 : vector<8x32xf32> to vector<8x4x8xf32>
    %125 = tpu.transpose %124, [1, 0, 2] : vector<8x4x8xf32> -> vector<4x8x8xf32>
    %126 = vector.extract_strided_slice %119 {offsets = [0, 0], sizes = [12, 32], strides = [1, 1]} : vector<24x32xf32> to vector<12x32xf32>
    %127 = vector.shape_cast %126 : vector<12x32xf32> to vector<12x4x8xf32>
    %128 = tpu.transpose %127, [1, 0, 2] : vector<12x4x8xf32> -> vector<4x12x8xf32>
    %129 = vector.extract_strided_slice %120 {offsets = [0, 0], sizes = [12, 32], strides = [1, 1]} : vector<24x32xf32> to vector<12x32xf32>
    %130 = vector.shape_cast %129 : vector<12x32xf32> to vector<12x4x8xf32>
    %131 = tpu.transpose %130, [1, 0, 2] : vector<12x4x8xf32> -> vector<4x12x8xf32>
    %132 = arith.truncf %125 : vector<4x8x8xf32> to vector<4x8x8xbf16>
    %133 = arith.truncf %128 : vector<4x12x8xf32> to vector<4x12x8xbf16>
    "tpu.trace_start"() <{level = 10 : i32, message = "hqd,hkd->hqk"}> : () -> ()
    %cst_48 = arith.constant dense<0.000000e+00> : vector<4x8x12xf32>
    %134 = tpu.matmul %132, %133, %cst_48 {dimension_numbers = #tpu.dot_dimension_numbers<[2], [2], [1], [1], [0, 0, 0, 1, 1, 1], [0], [0]>} : vector<4x8x8xbf16>, vector<4x12x8xbf16>, vector<4x8x12xf32> -> vector<4x8x12xf32>
    "tpu.trace_stop"() : () -> ()
    %cst_49 = arith.constant dense<0xFF800000> : vector<4x8xf32>
    %135 = vector.multi_reduction <maximumf>, %134, %cst_49 [2] : vector<4x8x12xf32> to vector<4x8xf32>
    %136 = vector.shape_cast %135 : vector<4x8xf32> to vector<4x8x1xf32>
    %137 = vector.broadcast %136 : vector<4x8x1xf32> to vector<4x8x12xf32>
    %138 = arith.subf %134, %137 : vector<4x8x12xf32>
    %139 = math.exp %138 : vector<4x8x12xf32>
    %cst_50 = arith.constant dense<0.000000e+00> : vector<4x8xf32>
    %140 = vector.multi_reduction <add>, %139, %cst_50 [2] : vector<4x8x12xf32> to vector<4x8xf32>
    %141 = vector.shape_cast %140 : vector<4x8xf32> to vector<4x8x1xf32>
    %142 = arith.truncf %139 : vector<4x8x12xf32> to vector<4x8x12xbf16>
    %143 = arith.truncf %131 : vector<4x12x8xf32> to vector<4x12x8xbf16>
    "tpu.trace_start"() <{level = 10 : i32, message = "hqk,hkd->hqd"}> : () -> ()
    %cst_51 = arith.constant dense<0.000000e+00> : vector<4x8x8xf32>
    %144 = tpu.matmul %142, %143, %cst_51 {dimension_numbers = #tpu.dot_dimension_numbers<[2], [1], [1], [2], [0, 0, 0, 1, 1, 2], [0], [0]>} : vector<4x8x12xbf16>, vector<4x12x8xbf16>, vector<4x8x8xf32> -> vector<4x8x8xf32>
    "tpu.trace_stop"() : () -> ()
    %145 = tpu.reciprocal %141 {approx = true} : vector<4x8x1xf32> -> vector<4x8x1xf32>
    %146 = vector.broadcast %145 : vector<4x8x1xf32> to vector<4x8x8xf32>
    %147 = arith.mulf %144, %146 : vector<4x8x8xf32>
    %148 = tpu.transpose %147, [1, 0, 2] : vector<4x8x8xf32> -> vector<8x4x8xf32>
    %149 = vector.shape_cast %148 : vector<8x4x8xf32> to vector<8x32xf32>
    %150 = vector.extract_strided_slice %122 {offsets = [8, 0], sizes = [8, 32], strides = [1, 1]} : vector<16x32xf32> to vector<8x32xf32>
    %151 = vector.shape_cast %150 : vector<8x32xf32> to vector<8x4x8xf32>
    %152 = tpu.transpose %151, [1, 0, 2] : vector<8x4x8xf32> -> vector<4x8x8xf32>
    %153 = vector.extract_strided_slice %119 {offsets = [12, 0], sizes = [12, 32], strides = [1, 1]} : vector<24x32xf32> to vector<12x32xf32>
    %154 = vector.shape_cast %153 : vector<12x32xf32> to vector<12x4x8xf32>
    %155 = tpu.transpose %154, [1, 0, 2] : vector<12x4x8xf32> -> vector<4x12x8xf32>
    %156 = vector.extract_strided_slice %120 {offsets = [12, 0], sizes = [12, 32], strides = [1, 1]} : vector<24x32xf32> to vector<12x32xf32>
    %157 = vector.shape_cast %156 : vector<12x32xf32> to vector<12x4x8xf32>
    %158 = tpu.transpose %157, [1, 0, 2] : vector<12x4x8xf32> -> vector<4x12x8xf32>
    %159 = arith.truncf %152 : vector<4x8x8xf32> to vector<4x8x8xbf16>
    %160 = arith.truncf %155 : vector<4x12x8xf32> to vector<4x12x8xbf16>
    "tpu.trace_start"() <{level = 10 : i32, message = "hqd,hkd->hqk"}> : () -> ()
    %cst_52 = arith.constant dense<0.000000e+00> : vector<4x8x12xf32>
    %161 = tpu.matmul %159, %160, %cst_52 {dimension_numbers = #tpu.dot_dimension_numbers<[2], [2], [1], [1], [0, 0, 0, 1, 1, 1], [0], [0]>} : vector<4x8x8xbf16>, vector<4x12x8xbf16>, vector<4x8x12xf32> -> vector<4x8x12xf32>
    "tpu.trace_stop"() : () -> ()
    %cst_53 = arith.constant dense<0xFF800000> : vector<4x8xf32>
    %162 = vector.multi_reduction <maximumf>, %161, %cst_53 [2] : vector<4x8x12xf32> to vector<4x8xf32>
    %163 = vector.shape_cast %162 : vector<4x8xf32> to vector<4x8x1xf32>
    %164 = vector.broadcast %163 : vector<4x8x1xf32> to vector<4x8x12xf32>
    %165 = arith.subf %161, %164 : vector<4x8x12xf32>
    %166 = math.exp %165 : vector<4x8x12xf32>
    %cst_54 = arith.constant dense<0.000000e+00> : vector<4x8xf32>
    %167 = vector.multi_reduction <add>, %166, %cst_54 [2] : vector<4x8x12xf32> to vector<4x8xf32>
    %168 = vector.shape_cast %167 : vector<4x8xf32> to vector<4x8x1xf32>
    %169 = arith.truncf %166 : vector<4x8x12xf32> to vector<4x8x12xbf16>
    %170 = arith.truncf %158 : vector<4x12x8xf32> to vector<4x12x8xbf16>
    "tpu.trace_start"() <{level = 10 : i32, message = "hqk,hkd->hqd"}> : () -> ()
    %cst_55 = arith.constant dense<0.000000e+00> : vector<4x8x8xf32>
    %171 = tpu.matmul %169, %170, %cst_55 {dimension_numbers = #tpu.dot_dimension_numbers<[2], [1], [1], [2], [0, 0, 0, 1, 1, 2], [0], [0]>} : vector<4x8x12xbf16>, vector<4x12x8xbf16>, vector<4x8x8xf32> -> vector<4x8x8xf32>
    "tpu.trace_stop"() : () -> ()
    %172 = tpu.reciprocal %168 {approx = true} : vector<4x8x1xf32> -> vector<4x8x1xf32>
    %173 = vector.broadcast %172 : vector<4x8x1xf32> to vector<4x8x8xf32>
    %174 = arith.mulf %171, %173 : vector<4x8x8xf32>
    %175 = tpu.transpose %174, [1, 0, 2] : vector<4x8x8xf32> -> vector<8x4x8xf32>
    %176 = vector.shape_cast %175 : vector<8x4x8xf32> to vector<8x32xf32>
    %177 = tpu.concatenate %149, %176 in 0 : vector<8x32xf32>, vector<8x32xf32> -> vector<16x32xf32>
    %178 = arith.truncf %177 : vector<16x32xf32> to vector<16x32xbf16>
    %cst_56 = arith.constant dense<0.000000e+00> : vector<16x32xf32>
    %179 = tpu.matmul %178, %107, %cst_56 {dimension_numbers = #tpu.dot_dimension_numbers<[1], [0], [0], [1], [0, 0, 1, 1], [], []>} : vector<16x32xbf16>, vector<32x32xbf16>, vector<16x32xf32> -> vector<16x32xf32>
    %180 = vector.shape_cast %179 : vector<16x32xf32> to vector<2x8x32xf32>
    %181 = arith.addf %180, %102 : vector<2x8x32xf32>
    %cst_57 = arith.constant dense<0.000000e+00> : vector<2x8xf32>
    %182 = vector.multi_reduction <add>, %181, %cst_57 [2] : vector<2x8x32xf32> to vector<2x8xf32>
    %183 = vector.shape_cast %182 : vector<2x8xf32> to vector<2x8x1xf32>
    %cst_58 = arith.constant 3.200000e+01 : f32
    %184 = vector.broadcast %cst_58 : f32 to vector<2x8x1xf32>
    %185 = arith.divf %183, %184 : vector<2x8x1xf32>
    %186 = vector.broadcast %185 : vector<2x8x1xf32> to vector<2x8x32xf32>
    %187 = arith.subf %181, %186 : vector<2x8x32xf32>
    %188 = arith.mulf %187, %187 : vector<2x8x32xf32>
    %cst_59 = arith.constant dense<0.000000e+00> : vector<2x8xf32>
    %189 = vector.multi_reduction <add>, %188, %cst_59 [2] : vector<2x8x32xf32> to vector<2x8xf32>
    %190 = vector.shape_cast %189 : vector<2x8xf32> to vector<2x8x1xf32>
    %cst_60 = arith.constant 3.200000e+01 : f32
    %191 = vector.broadcast %cst_60 : f32 to vector<2x8x1xf32>
    %192 = arith.divf %190, %191 : vector<2x8x1xf32>
    %193 = vector.broadcast %185 : vector<2x8x1xf32> to vector<2x8x32xf32>
    %194 = arith.subf %181, %193 : vector<2x8x32xf32>
    %cst_61 = arith.constant 9.99999997E-7 : f32
    %195 = vector.broadcast %cst_61 : f32 to vector<2x8x1xf32>
    %196 = arith.addf %192, %195 : vector<2x8x1xf32>
    %197 = math.rsqrt %196 : vector<2x8x1xf32>
    %198 = vector.broadcast %197 : vector<2x8x1xf32> to vector<2x8x32xf32>
    %199 = arith.mulf %194, %198 : vector<2x8x32xf32>
    %200 = vector.shape_cast %109 : vector<1x32xf32> to vector<1x1x32xf32>
    %201 = vector.broadcast %200 : vector<1x1x32xf32> to vector<2x8x32xf32>
    %202 = arith.mulf %199, %201 : vector<2x8x32xf32>
    %203 = vector.shape_cast %111 : vector<1x32xf32> to vector<1x1x32xf32>
    %204 = vector.broadcast %203 : vector<1x1x32xf32> to vector<2x8x32xf32>
    %205 = arith.addf %202, %204 : vector<2x8x32xf32>
    %c0_62 = arith.constant 0 : index
    %c0_63 = arith.constant 0 : index
    %c0_64 = arith.constant 0 : index
    %206 = vector.load %arg15[%c0_62, %c0_63, %c0_64] : memref<1x32x64xbf16, #tpu.memory_space<vmem>>, vector<1x32x64xbf16>
    %207 = vector.shape_cast %206 : vector<1x32x64xbf16> to vector<32x64xbf16>
    %c0_65 = arith.constant 0 : index
    %c0_66 = arith.constant 0 : index
    %c0_67 = arith.constant 0 : index
    %208 = vector.load %arg16[%c0_65, %c0_66, %c0_67] : memref<1x1x64xf32, #tpu.memory_space<vmem>>, vector<1x1x64xf32>
    %209 = vector.shape_cast %208 : vector<1x1x64xf32> to vector<1x64xf32>
    %c0_68 = arith.constant 0 : index
    %c0_69 = arith.constant 0 : index
    %c0_70 = arith.constant 0 : index
    %210 = vector.load %arg17[%c0_68, %c0_69, %c0_70] : memref<1x64x32xbf16, #tpu.memory_space<vmem>>, vector<1x64x32xbf16>
    %211 = vector.shape_cast %210 : vector<1x64x32xbf16> to vector<64x32xbf16>
    %c0_71 = arith.constant 0 : index
    %c0_72 = arith.constant 0 : index
    %c0_73 = arith.constant 0 : index
    %212 = vector.load %arg18[%c0_71, %c0_72, %c0_73] : memref<1x1x32xf32, #tpu.memory_space<vmem>>, vector<1x1x32xf32>
    %213 = vector.shape_cast %212 : vector<1x1x32xf32> to vector<1x32xf32>
    %c0_74 = arith.constant 0 : index
    %c0_75 = arith.constant 0 : index
    %c0_76 = arith.constant 0 : index
    %214 = vector.load %arg19[%c0_74, %c0_75, %c0_76] : memref<1x1x32xf32, #tpu.memory_space<vmem>>, vector<1x1x32xf32>
    %215 = vector.shape_cast %214 : vector<1x1x32xf32> to vector<1x32xf32>
    %c0_77 = arith.constant 0 : index
    %c0_78 = arith.constant 0 : index
    %c0_79 = arith.constant 0 : index
    %216 = vector.load %arg20[%c0_77, %c0_78, %c0_79] : memref<1x1x32xf32, #tpu.memory_space<vmem>>, vector<1x1x32xf32>
    %217 = vector.shape_cast %216 : vector<1x1x32xf32> to vector<1x32xf32>
    %218 = vector.shape_cast %205 : vector<2x8x32xf32> to vector<16x32xf32>
    %219 = arith.truncf %218 : vector<16x32xf32> to vector<16x32xbf16>
    %cst_80 = arith.constant dense<0.000000e+00> : vector<16x64xf32>
    %220 = tpu.matmul %219, %207, %cst_80 {dimension_numbers = #tpu.dot_dimension_numbers<[1], [0], [0], [1], [0, 0, 1, 1], [], []>} : vector<16x32xbf16>, vector<32x64xbf16>, vector<16x64xf32> -> vector<16x64xf32>
    %221 = vector.broadcast %209 : vector<1x64xf32> to vector<16x64xf32>
    %222 = arith.addf %220, %221 : vector<16x64xf32>
    %cst_81 = arith.constant 0.000000e+00 : f32
    %223 = vector.broadcast %cst_81 : f32 to vector<16x64xf32>
    %224 = arith.maximumf %222, %223 : vector<16x64xf32>
    %225 = arith.truncf %224 : vector<16x64xf32> to vector<16x64xbf16>
    %cst_82 = arith.constant dense<0.000000e+00> : vector<16x32xf32>
    %226 = tpu.matmul %225, %211, %cst_82 {dimension_numbers = #tpu.dot_dimension_numbers<[1], [0], [0], [1], [0, 0, 1, 1], [], []>} : vector<16x64xbf16>, vector<64x32xbf16>, vector<16x32xf32> -> vector<16x32xf32>
    %227 = vector.broadcast %213 : vector<1x32xf32> to vector<16x32xf32>
    %228 = arith.addf %226, %227 : vector<16x32xf32>
    %229 = vector.shape_cast %228 : vector<16x32xf32> to vector<2x8x32xf32>
    %230 = arith.addf %229, %205 : vector<2x8x32xf32>
    %cst_83 = arith.constant dense<0.000000e+00> : vector<2x8xf32>
    %231 = vector.multi_reduction <add>, %230, %cst_83 [2] : vector<2x8x32xf32> to vector<2x8xf32>
    %232 = vector.shape_cast %231 : vector<2x8xf32> to vector<2x8x1xf32>
    %cst_84 = arith.constant 3.200000e+01 : f32
    %233 = vector.broadcast %cst_84 : f32 to vector<2x8x1xf32>
    %234 = arith.divf %232, %233 : vector<2x8x1xf32>
    %235 = vector.broadcast %234 : vector<2x8x1xf32> to vector<2x8x32xf32>
    %236 = arith.subf %230, %235 : vector<2x8x32xf32>
    %237 = arith.mulf %236, %236 : vector<2x8x32xf32>
    %cst_85 = arith.constant dense<0.000000e+00> : vector<2x8xf32>
    %238 = vector.multi_reduction <add>, %237, %cst_85 [2] : vector<2x8x32xf32> to vector<2x8xf32>
    %239 = vector.shape_cast %238 : vector<2x8xf32> to vector<2x8x1xf32>
    %cst_86 = arith.constant 3.200000e+01 : f32
    %240 = vector.broadcast %cst_86 : f32 to vector<2x8x1xf32>
    %241 = arith.divf %239, %240 : vector<2x8x1xf32>
    %242 = vector.broadcast %234 : vector<2x8x1xf32> to vector<2x8x32xf32>
    %243 = arith.subf %230, %242 : vector<2x8x32xf32>
    %cst_87 = arith.constant 9.99999997E-7 : f32
    %244 = vector.broadcast %cst_87 : f32 to vector<2x8x1xf32>
    %245 = arith.addf %241, %244 : vector<2x8x1xf32>
    %246 = math.rsqrt %245 : vector<2x8x1xf32>
    %247 = vector.broadcast %246 : vector<2x8x1xf32> to vector<2x8x32xf32>
    %248 = arith.mulf %243, %247 : vector<2x8x32xf32>
    %249 = vector.shape_cast %215 : vector<1x32xf32> to vector<1x1x32xf32>
    %250 = vector.broadcast %249 : vector<1x1x32xf32> to vector<2x8x32xf32>
    %251 = arith.mulf %248, %250 : vector<2x8x32xf32>
    %252 = vector.shape_cast %217 : vector<1x32xf32> to vector<1x1x32xf32>
    %253 = vector.broadcast %252 : vector<1x1x32xf32> to vector<2x8x32xf32>
    %254 = arith.addf %251, %253 : vector<2x8x32xf32>
    %c0_88 = arith.constant 0 : index
    %c0_89 = arith.constant 0 : index
    %c0_90 = arith.constant 0 : index
    %255 = vector.load %arg22[%c0_88, %c0_89, %c0_90] : memref<2x8x32xf32, #tpu.memory_space<vmem>>, vector<2x8x32xf32>
    tpu.vector_store %arg22[%c0_88, %c0_89, %c0_90], %254 {strides = array<i32>} : memref<2x8x32xf32, #tpu.memory_space<vmem>>, vector<2x8x32xf32>,
    %c1_i32 = arith.constant 1 : i32
    %256 = arith.cmpi eq, %arg1, %c1_i32 : i32
    %257 = arith.extui %256 : i1 to i32
    %c0_i32_91 = arith.constant 0 : i32
    %258 = arith.cmpi ne, %257, %c0_i32_91 : i32
    scf.if %258 {
      %c0_92 = arith.constant 0 : index
      %c0_93 = arith.constant 0 : index
      %c0_94 = arith.constant 0 : index
      %259 = vector.load %arg21[%c0_92, %c0_93, %c0_94] : memref<2x8x32xf32, #tpu.memory_space<vmem>>, vector<2x8x32xf32>
      tpu.vector_store %arg21[%c0_92, %c0_93, %c0_94], %254 {strides = array<i32>} : memref<2x8x32xf32, #tpu.memory_space<vmem>>, vector<2x8x32xf32>,
    } else {
    }
    return
  }
  func.func @transform_0(%arg0: i32, %arg1: i32) -> (i32, i32, i32) {
    %c0_i32 = arith.constant 0 : i32
    %c0_i32_0 = arith.constant 0 : i32
    %c0_i32_1 = arith.constant 0 : i32
    return %arg0, %c0_i32, %c0_i32_0 : i32, i32, i32
  }
  func.func @transform_1(%arg0: i32, %arg1: i32) -> (i32, i32, i32) {
    %c0_i32 = arith.constant 0 : i32
    %c0_i32_0 = arith.constant 0 : i32
    %c0_i32_1 = arith.constant 0 : i32
    %c0_i32_2 = arith.constant 0 : i32
    return %c0_i32, %c0_i32_0, %c0_i32_1 : i32, i32, i32
  }
  func.func @transform_2(%arg0: i32, %arg1: i32) -> (i32, i32, i32) {
    %c0_i32 = arith.constant 0 : i32
    %c0_i32_0 = arith.constant 0 : i32
    %c0_i32_1 = arith.constant 0 : i32
    return %arg0, %c0_i32, %c0_i32_0 : i32, i32, i32
  }
  func.func @transform_3(%arg0: i32, %arg1: i32) -> (i32, i32) {
    %c0_i32 = arith.constant 0 : i32
    %c0_i32_0 = arith.constant 0 : i32
    %c0_i32_1 = arith.constant 0 : i32
    return %c0_i32, %c0_i32_0 : i32, i32
  }
  func.func @transform_4(%arg0: i32, %arg1: i32) -> (i32, i32) {
    %c0_i32 = arith.constant 0 : i32
    %c0_i32_0 = arith.constant 0 : i32
    %c0_i32_1 = arith.constant 0 : i32
    return %c0_i32, %c0_i32_0 : i32, i32
  }
  func.func @transform_5(%arg0: i32, %arg1: i32) -> (i32, i32, i32) {
    %c0_i32 = arith.constant 0 : i32
    %c0_i32_0 = arith.constant 0 : i32
    %c0_i32_1 = arith.constant 0 : i32
    return %arg1, %c0_i32, %c0_i32_0 : i32, i32, i32
  }
  func.func @transform_6(%arg0: i32, %arg1: i32) -> (i32, i32, i32) {
    %c0_i32 = arith.constant 0 : i32
    %c0_i32_0 = arith.constant 0 : i32
    %c0_i32_1 = arith.constant 0 : i32
    return %arg1, %c0_i32, %c0_i32_0 : i32, i32, i32
  }
  func.func @transform_7(%arg0: i32, %arg1: i32) -> (i32, i32, i32) {
    %c0_i32 = arith.constant 0 : i32
    %c0_i32_0 = arith.constant 0 : i32
    %c0_i32_1 = arith.constant 0 : i32
    return %arg1, %c0_i32, %c0_i32_0 : i32, i32, i32
  }
  func.func @transform_8(%arg0: i32, %arg1: i32) -> (i32, i32, i32) {
    %c0_i32 = arith.constant 0 : i32
    %c0_i32_0 = arith.constant 0 : i32
    %c0_i32_1 = arith.constant 0 : i32
    return %arg1, %c0_i32, %c0_i32_0 : i32, i32, i32
  }
  func.func @transform_9(%arg0: i32, %arg1: i32) -> (i32, i32, i32) {
    %c0_i32 = arith.constant 0 : i32
    %c0_i32_0 = arith.constant 0 : i32
    %c0_i32_1 = arith.constant 0 : i32
    return %arg1, %c0_i32, %c0_i32_0 : i32, i32, i32
  }
  func.func @transform_10(%arg0: i32, %arg1: i32) -> (i32, i32, i32) {
    %c0_i32 = arith.constant 0 : i32
    %c0_i32_0 = arith.constant 0 : i32
    %c0_i32_1 = arith.constant 0 : i32
    return %arg1, %c0_i32, %c0_i32_0 : i32, i32, i32
  }
  func.func @transform_11(%arg0: i32, %arg1: i32) -> (i32, i32, i32) {
    %c0_i32 = arith.constant 0 : i32
    %c0_i32_0 = arith.constant 0 : i32
    %c0_i32_1 = arith.constant 0 : i32
    return %arg1, %c0_i32, %c0_i32_0 : i32, i32, i32
  }
  func.func @transform_12(%arg0: i32, %arg1: i32) -> (i32, i32, i32) {
    %c0_i32 = arith.constant 0 : i32
    %c0_i32_0 = arith.constant 0 : i32
    %c0_i32_1 = arith.constant 0 : i32
    return %arg1, %c0_i32, %c0_i32_0 : i32, i32, i32
  }
  func.func @transform_13(%arg0: i32, %arg1: i32) -> (i32, i32, i32) {
    %c0_i32 = arith.constant 0 : i32
    %c0_i32_0 = arith.constant 0 : i32
    %c0_i32_1 = arith.constant 0 : i32
    return %arg1, %c0_i32, %c0_i32_0 : i32, i32, i32
  }
  func.func @transform_14(%arg0: i32, %arg1: i32) -> (i32, i32, i32) {
    %c0_i32 = arith.constant 0 : i32
    %c0_i32_0 = arith.constant 0 : i32
    %c0_i32_1 = arith.constant 0 : i32
    return %arg1, %c0_i32, %c0_i32_0 : i32, i32, i32
  }
  func.func @transform_15(%arg0: i32, %arg1: i32) -> (i32, i32, i32) {
    %c0_i32 = arith.constant 0 : i32
    %c0_i32_0 = arith.constant 0 : i32
    %c0_i32_1 = arith.constant 0 : i32
    return %arg1, %c0_i32, %c0_i32_0 : i32, i32, i32
  }
  func.func @transform_16(%arg0: i32, %arg1: i32) -> (i32, i32, i32) {
    %c0_i32 = arith.constant 0 : i32
    %c0_i32_0 = arith.constant 0 : i32
    %c0_i32_1 = arith.constant 0 : i32
    return %arg1, %c0_i32, %c0_i32_0 : i32, i32, i32
  }
  func.func @transform_17(%arg0: i32, %arg1: i32) -> (i32, i32, i32) {
    %c0_i32 = arith.constant 0 : i32
    %c0_i32_0 = arith.constant 0 : i32
    %c0_i32_1 = arith.constant 0 : i32
    return %arg1, %c0_i32, %c0_i32_0 : i32, i32, i32
  }
  func.func @transform_18(%arg0: i32, %arg1: i32) -> (i32, i32, i32) {
    %c0_i32 = arith.constant 0 : i32
    %c0_i32_0 = arith.constant 0 : i32
    %c0_i32_1 = arith.constant 0 : i32
    return %arg1, %c0_i32, %c0_i32_0 : i32, i32, i32
  }
  func.func @transform_19(%arg0: i32, %arg1: i32) -> (i32, i32, i32) {
    %c0_i32 = arith.constant 0 : i32
    %c0_i32_0 = arith.constant 0 : i32
    %c0_i32_1 = arith.constant 0 : i32
    return %arg0, %c0_i32, %c0_i32_0 : i32, i32, i32
  }
}

</mosaic_0001>

<bundles_post_ra>
// kernel: tpu_custom_call.1
= control target key start
LH: loop header
LB: loop body
LE: loop exit
PB: predicated region body
PF: predicated region fallthrough
CT: control target
= control target key end

     0   :  { %s8814_s0 = inlined_call_operand.vmem [shape: f32[4,8,32], index: 0, kind: input, shape index: {}]   ;;  %s8815_s1 = inlined_call_operand.hbm [shape: f32[1,8,32], index: 1, kind: input, shape index: {}]   ;;  %s8816_s2 = inlined_call_operand.vmem [shape: bf16[4,12,32], index: 2, kind: input, shape index: {}]   ;;  %s8817_s3 = inlined_call_operand.hbm [shape: f32[1,32], index: 3, kind: input, shape index: {}]   ;;  %s8818_s4 = inlined_call_operand.hbm [shape: f32[1,32], index: 4, kind: input, shape index: {}]   ;;  %s8819_s5 = inlined_call_operand.vmem [shape: bf16[2,32,96], index: 5, kind: input, shape index: {}]   ;;  %s8820_s6 = inlined_call_operand.vmem [shape: bf16[2,32,32], index: 6, kind: input, shape index: {}]   ;;  %s8821_s7 = inlined_call_operand.vmem [shape: f32[2,1,32], index: 7, kind: input, shape index: {}]   ;;  %s8822_s8 = inlined_call_operand.vmem [shape: f32[2,1,32], index: 8, kind: input, shape index: {}]   ;;  %s8823_s9 = inlined_call_operand.vmem [shape: bf16[2,32,96], index: 9, kind: input, shape index: {}]   ;;  %s8824_s10 = inlined_call_operand.vmem [shape: bf16[2,32,32], index: 10, kind: input, shape index: {}]   ;;  %s8825_s11 = inlined_call_operand.vmem [shape: f32[2,1,32], index: 11, kind: input, shape index: {}]   ;;  %s8826_s12 = inlined_call_operand.vmem [shape: f32[2,1,32], index: 12, kind: input, shape index: {}]   ;;  %s8827_s13 = inlined_call_operand.hbm [shape: bf16[2,32,64], index: 13, kind: input, shape index: {}]   ;;  %s8828_s14 = inlined_call_operand.vmem [shape: f32[2,1,64], index: 14, kind: input, shape index: {}]   ;;  %s8829_s15 = inlined_call_operand.vmem [shape: bf16[2,64,32], index: 15, kind: input, shape index: {}]   ;;  %s8830_s16 = inlined_call_operand.vmem [shape: f32[2,1,32], index: 16, kind: input, shape index: {}]   ;;  %s8831_s17 = inlined_call_operand.vmem [shape: f32[2,1,32], index: 17, kind: input, shape index: {}]   ;;  %s8832_s18 = inlined_call_operand.vmem [shape: f32[2,1,32], index: 18, kind: input, shape index: {}]   ;;  %s8833_s19 = inlined_call_operand.hbm [shape: f32[4,8,32], index: 19, kind: output, shape index: {}]  }
   0x1   :  { %8855 = sst [smem:[#allocation32_spill]] %s8814_s0 }
   0x2   :  { %8856 = sst [smem:[#allocation33_spill]] %s8815_s1 }
   0x3   :  { %8857 = sst [smem:[#allocation34_spill]] %s8816_s2 }
   0x4   :  { %8858 = sst [smem:[#allocation35_spill]] %s8817_s3 }
   0x5   :  { %8859 = sst [smem:[#allocation36_spill]] %s8818_s4 }
   0x6   :  { %8860 = sst [smem:[#allocation37_spill]] %s8819_s5 }
   0x7   :  { %8861 = sst [smem:[#allocation38_spill]] %s8820_s6 }
   0x8   :  { %8862 = sst [smem:[#allocation39_spill]] %s8822_s8 }
   0x9   :  { %8863 = sst [smem:[#allocation40_spill]] %s8823_s9 }
   0xa   :  { %8864 = sst [smem:[#allocation41_spill]] %s8824_s10 }
   0xb   :  { %8865 = sst [smem:[#allocation42_spill]] %s8825_s11 }
   0xc   :  { %8866 = sst [smem:[#allocation43_spill]] %s8826_s12 }
   0xd   :  { %8867 = sst [smem:[#allocation44_spill]] %s8827_s13 }
   0xe   :  { %8868 = sst [smem:[#allocation45_spill]] %s8828_s14 }
   0xf   :  { %8869 = sst [smem:[#allocation46_spill]] %s8829_s15 }
  0x10   :  { %8870 = sst [smem:[#allocation47_spill]] %s8830_s16 }
  0x11   :  { %8871 = sst [smem:[#allocation48_spill]] %s8831_s17 }
  0x12   :  { %8872 = sst [smem:[#allocation49_spill]] %s8832_s18 }
  0x13   :  { %8873 = sst [smem:[#allocation50_spill]] %s8833_s19 }
  0x14   :  { %24 = vsyncpa [#allocation4], 0 }
  0x15   :  { %25 = vsyncpa [#allocation7], 0 }
  0x16   :  { %26 = vsyncpa [#allocation10], 0 }
  0x17   :  { %28 = vsyncpa [#allocation10 + $0x1], 0 }
  0x18   :  { %29 = vsyncpa [#allocation5], 0 }
  0x19   :  { %31 = vsyncpa [#allocation5 + $0x1], 0  ;;  %s7493_s0 = smov 0   ;;  %s7495_s30 = smov 0  }
  0x1a   :  { %s7497_s20 = smov 0   ;;  %s7499_s21 = smov 0  }
  0x1b   :  { %s7501_s1 = smov 0   ;;  %s7503_s22 = smov 0  }
  0x1c   :  { %s7505_s2 = smov 0   ;;  %s7507_s23 = smov 0  }
  0x1d   :  { %s7509_s24 = smov 0   ;;  %s7511_s25 = smov 0  }
  0x1e   :  { %s7513_s3 = smov 0  }
  0x1f LB: > { %8874 = sst [smem:[#allocation16_spill]] %s7331_s0  ;;  %s6373_s26 = sadd.s32 4294967295, %s7371_s3   ;;  %s7371_s3 = sphi %s7513_s3, %s37_s3   ;;  %s7367_s25 = sphi %s7511_s25, %s8951_s25   ;;  %s7363_s24 = sphi %s7509_s24, %s8950_s24   ;;  %s7359_s23 = sphi %s7507_s23, %s8949_s23   ;;  %s7355_s2 = sphi %s7505_s2, %s8948_s2   ;;  %s7351_s22 = sphi %s7503_s22, %s8947_s22   ;;  %s7347_s1 = sphi %s7501_s1, %s8946_s1   ;;  %s7343_s21 = sphi %s7499_s21, %s8945_s21   ;;  %s7339_s20 = sphi %s7497_s20, %s8944_s20   ;;  %s7335_s30 = sphi %s7495_s30, %s8943_s30   ;;  %s7331_s0 = sphi %s7493_s0, %s8942_s0  }
  0x20   : > { %8875 = sst [smem:[#allocation17_spill]] %s7335_s30  ;;  %s6374_s27 = sadd.s32 4294967294, %s7371_s3  }
  0x21   : > { %8876 = sst [smem:[#allocation18_spill]] %s7339_s20  ;;  %p392_p0 = scmp.ne.s32.totalorder %s7347_s1, %s7343_s21 }
  0x22   : > { %8877 = sst [smem:[#allocation19_spill]] %s7347_s1  ;;  %p7549_p1 = scmp.eq.s32.totalorder %s6373_s26, 0 }
  0x23   : > { %8878 = sst [smem:[#allocation20_spill]] %s7351_s22  ;;  %p545_p2 = scmp.ne.s32.totalorder %s7339_s20, %s7335_s30 }
  0x24   : > { %8879 = sst [smem:[#allocation21_spill]] %s7359_s23  ;;  %p7558_p3 = por %p7549_p1, %p392_p0 }
  0x25   : > { %8880 = sst [smem:[#allocation22_spill]] %s7363_s24  ;;  %p546_p4 = scmp.eq.s32.totalorder %s6373_s26, 3 }
  0x26   : > { %8881 = sst [smem:[#allocation23_spill]] %s7367_s25  ;;  %p551_p5 = scmp.ne.s32.totalorder %s7335_s30, %s7331_s0 }
  0x27   : > { %8882 = sst [smem:[#allocation24_spill]] %s7371_s3  ;;  %p552_p6 = scmp.eq.s32.totalorder %s6374_s27, 3 }
  0x28   : > { %s8884_s19 = scalar_select %p7558_p3, 1, 0 }
  0x29   : > { %p7564_p7 = por %p546_p4, %p545_p2  ;;  %p6375_p8 = scmp.ge.s32.totalorder %s7371_s3, 1 }
  0x2a   : > { %p7569_p9 = por %p552_p6, %p551_p5  ;;  %p559_p10 = scmp.lt.s32.totalorder %s7371_s3, 5 }
  0x2b   : > { %s8885_s18 = scalar_select %p7564_p7, 1, 0 }
  0x2c   : > { %s8887_s21 = scalar_select %p7569_p9, 1, 0 }
  0x2d   : > { %8886 = sst [smem:[#allocation25_spill]] %s8885_s18  ;;  %p7574_p11 = pnand %p6375_p8, %p559_p10 }
  0x2e   : > { %8888 = sst [smem:[#allocation26_spill]] %s8887_s21  ;;  %s7373_s17 = smov [#allocation6]  }
  0x2f   : > { %s583_s15 = sshll.u32 %s7373_s17, 4  ;;  %p6879_p12 = pneg %p7574_p11  ;;  %s584_s15 = int_to_ptr.vmem [resolvable:$true] %s583_s15 }
  0x30   : > { %s7374_s27 = smov [#allocation3]   ;;  %s7148_s0 = scalar_lea.vmem %s584_s15, 16 }
  0x31   : > { %p7582_p13 = pnand %p6879_p12, %p7549_p1  ;;  %s572_s21 = sshll.u32 %s7374_s27, 4  ;;  %s573_s21 = int_to_ptr.vmem [resolvable:$true] %s572_s21 }
  0x32   : > { %p7149_p2 = scmp.ne.s32.totalorder %s584_s15, %s7148_s0  ;;  %s7155_s17 = scalar_lea.vmem %s584_s15, 32 }
  0x33   : > { %p7139_p0 = pneg %p7582_p13  ;;  %p7156_p6 = scmp.lt.s32.totalorder %s584_s15, %s584_s15 }
  0x34   : > { %p7157_p8 = scmp.lt.s32.totalorder %s7155_s17, %s7148_s0 }
  0x35   : > { %p7151_p4 = pnand %p7149_p2, %p7139_p0 }
  0x36   : > { %p7158_p10 = por %p7157_p8, %p7156_p6 }
  0x37   : > { %p7152_p5 = pneg %p7151_p4 }
  0x39   : > { %p7159_p12 = pnand %p7158_p10, %p7152_p5 }
  0x3b   : > { %7162 = shalt.err (!%p7159_p12)
}
  0x3c   : > { %s8891_s14 = sld [smem:[#allocation35_spill]]  ;;  %s7375_s27 = smov [#allocation8]  }
  0x3d   : > { %s594_s12 = sshll.u32 %s7375_s27, 4  ;;  %s7174_s11 = scalar_lea.vmem %s573_s21, 128  ;;  %s595_s12 = int_to_ptr.vmem [resolvable:$true] %s594_s12 }
  0x3e   : > { %p7175_p9 = scmp.ne.s32.totalorder %s573_s21, %s7174_s11  ;;  %p7182_p7 = scmp.lt.s32.totalorder %s573_s21, %s573_s21 }
  0x3f   : > { %p7183_p6 = scmp.lt.s32.totalorder %s7174_s11, %s7174_s11 }
  0x40   : > { %p7177_p2 = pnand %p7175_p9, %p7139_p0 }
  0x41   : > { %p7184_p5 = por %p7183_p6, %p7182_p7 }
  0x42   : > { %6885 = dma.hbm_to_vmem [thread:$0]  (!%p7582_p13), %s8891_s14, 16, %s584_s15, [#allocation7]  }
  0x43   : > { %p7178_p4 = pneg %p7177_p2 }
  0x45   : > { %p7185_p8 = pnand %p7184_p5, %p7178_p4 }
  0x47   : > { %7188 = shalt.err (!%p7185_p8)
}
  0x48   : > { %s8892_s18 = sld [smem:[#allocation33_spill]]  ;;  %s7200_s14 = scalar_lea.vmem %s595_s12, 16 }
  0x49   : > { %p7201_p10 = scmp.ne.s32.totalorder %s595_s12, %s7200_s14  ;;  %s7207_s15 = scalar_lea.vmem %s595_s12, 32 }
  0x4a   : > { %p7208_p2 = scmp.lt.s32.totalorder %s595_s12, %s595_s12  ;;  %p7209_p3 = scmp.lt.s32.totalorder %s7207_s15, %s7200_s14 }
  0x4b   : > { %p7203_p12 = pnand %p7201_p10, %p7139_p0 }
  0x4c   : > { %p7210_p7 = por %p7209_p3, %p7208_p2 }
  0x4d   : > { %p7204_p9 = pneg %p7203_p12 }
  0x4e   : > { %6882 = dma.hbm_to_vmem [thread:$0]  (!%p7582_p13), %s8892_s18, 128, %s573_s21, [#allocation4]  }
  0x4f   : > { %p7211_p4 = pnand %p7210_p7, %p7204_p9 }
  0x51   : > { %7214 = shalt.err (!%p7211_p4)
}
  0x52   : > { %s8893_s4 = sld [smem:[#allocation36_spill]]  ;;  %s46_s21 = sadd.s32 1, %s7363_s24 }
  0x53   : > { %p47_p3 = scmp.ge.s32.totalorder %s46_s21, 2  ;;  %s49_s27 = sadd.s32 1, %s7367_s25 }
  0x54   : > { %s379_s26 = sadd.s32 1, %s7351_s22  ;;  %p386_p0 = scmp.ne.s32.totalorder %s7351_s22, %s7347_s1 }
  0x55   : > { %s8953_s21 = smov (%p47_p3, %s46_s21), 0  ;;  %s8955_s27 = smov (!%p47_p3, %s49_s27), %s7367_s25 }
  0x56   : > { %8894 = sst [smem:[#allocation27_spill]] %s8953_s21  ;;  %s376_s0 = ssub.s32 %s7363_s24, %s8953_s21 }
  0x57   : > { %p387_p6 = scmp.eq.s32.totalorder %s7371_s3, 0  ;;  %p51_p5 = scmp.ge.s32.totalorder %s8955_s27, 2 }
  0x58   : > { %6888 = dma.hbm_to_vmem [thread:$0]  (!%p7582_p13), %s8893_s4, 16, %s595_s12, [#allocation7]  }
  0x59   : > { %p377_p8 = scmp.eq.s32.totalorder %s376_s0, 0  ;;  %p7623_p10 = por %p387_p6, %p386_p0 }
  0x5a   : > { %p6900_p13 = scmp.lt.s32.totalorder %s7371_s3, 4  ;;  %s8957_s27 = smov (%p51_p5, %s8955_s27), 0 }
  0x5b   : > { %8896 = sst [smem:[#allocation28_spill]] %s8957_s27  ;;  %s532_s18 = ssub.s32 %s7367_s25, %s8957_s27 }
  0x5c   : > { %s7631_s16 = scalar_select %p377_p8, %s7351_s22, %s379_s26  }
  0x5d   : > { %s680_s14 = sand.u32 1, %s7351_s22   ;;  %p533_p12 = scmp.eq.s32.totalorder %s532_s18, 0 }
  0x5e   : > { %8897 = sst [smem:[#allocation29_spill]] %s7631_s16  ;;  %s6380_s15 = sshll.u32 %s680_s14, 4 }
  0x5f   : > { %s6515_s11 = sshll.u32 %s7363_s24, 8  ;;  %s8898_s17 = sadd.s32 1, %s7339_s20 }
  0x60   : > { %s7640_s4 = scalar_select %p533_p12, %s7339_s20, %s8898_s17  }
  0x61   : > { %s8900_s13 = sld [smem:[#allocation44_spill]]  ;;  %s684_s9 = scalar_lea.vmem [#allocation9], %s6380_s15 }
  0x62   : > { %8899 = sst [smem:[#allocation30_spill]] %s7640_s4  ;;  %s691_s8 = sshll.u32 %s684_s9, 4  ;;  %s692_s8 = int_to_ptr.vmem [resolvable:$true] %s691_s8 }
  0x63   : > { %p7647_p9 = pnand %p6900_p13, %p7623_p10  ;;  %s681_s26 = scalar_lea.sflag [#allocation10], %s680_s14 }
  0x64   : > { %s7228_s18 = scalar_lea.vmem %s692_s8, 256  ;;  %s7376_s17 = smov [#allocation9]  }
  0x65   : > { %p7217_p2 = pneg %p7647_p9  ;;  %p7229_p7 = scmp.ne.s32.totalorder %s692_s8, %s7228_s18 }
  0x66   : > { %s7233_s27 = sshll.u32 %s7376_s17, 4  ;;  %s7234_s27 = int_to_ptr.vmem [resolvable:$false] %s7233_s27 }
  0x67   : > { %s690_s10 = scalar_lea.hbm %s8900_s13, %s6515_s11  ;;  %p7231_p4 = pnand %p7229_p7, %p7217_p2 }
  0x68   : > { %s7235_s21 = scalar_lea.vmem %s7234_s27, 512  ;;  %p7236_p0 = scmp.lt.s32.totalorder %s692_s8, %s7234_s27 }
  0x69   : > { %p7232_p3 = pneg %p7231_p4  ;;  %p7237_p6 = scmp.lt.s32.totalorder %s7235_s21, %s7228_s18 }
  0x6b   : > { %p7238_p5 = por %p7237_p6, %p7236_p0 }
  0x6d   : > { %p7239_p8 = pnand %p7238_p5, %p7232_p3 }
  0x6f   : > { %7242 = shalt.err (!%p7239_p8)
}
  0x70   : > { %s7377_s9 = smov 64   ;;  %s7378_s12 = smov 4  }
  0x71   : > { %6892 = dma.hbm_to_vmem [thread:$0]  (!%p7647_p9), %s690_s10, 256, %s692_s8, %s681_s26, %s7377_s9, %s7377_s9, %s7378_s12  }
  0x72   : > { %735 = sbr.rel (%p7574_p11) target bundleno = 5250 (0x1482), region = 96 }
  0x77   : > { %7314 = dma.done.wait (%p7549_p1), [#allocation4], 128  }
  0x78   : > { %7316 = vsyncadd (%p7549_p1), [#allocation4], 4294967168 }
  0x79   : > { %7318 = dma.done.wait (%p7549_p1), [#allocation7], 32  }
  0x7a   : > { %7320 = vsyncadd (%p7549_p1), [#allocation7], 4294967264  ;;  %s749_s27 = sand.u32 1, %s7347_s1   ;;  %p8903_p11 = scmp.ne.s32.totalorder %s8884_s19, 0 }
  0x7b   : > { %s7666_s3 = sshll.u32 %s749_s27, 4  ;;  %s750_s8 = scalar_lea.sflag [#allocation10], %s749_s27 }
  0x7c   : > { %8902 = sst [smem:[#allocation31_spill]] %s7666_s3 }
  0x7d   : > { %7322 = dma.done.wait (%p8903_p11), %s750_s8, 256  }
  0x7e   : > { %7324 = vsyncadd (%p8903_p11), %s750_s8, 4294967040  ;;  %s8845_s28 = sand.u32 1, %s7335_s30   ;;  %s6389_s29 = sshll.u32 %s7359_s23, 1 }
  0x7f   : > { %s6388_s14 = sshll.u32 %s8845_s28, 4  ;;  %p869_p1 = scmp.lt.s32.totalorder %s6389_s29, 3 }
  0x80   : > { %p881_p10 = scmp.lt.s32.totalorder %s7355_s2, 1  ;;  %s8904_s26 = sld [smem:[#allocation32_spill]] }
  0x81   : > { %s8959_s29 = smov (!%p869_p1, %s6389_s29), 3  ;;  %s8905_s9 = sld [smem:[#allocation34_spill]] }
  0x82   : > { %s7679_s15 = scalar_select %p881_p10, %s7355_s2, 1 }
  0x83   : > { %s6390_s19 = sshll.u32 %s8959_s29, 3  ;;  %s8906_s5 = sld [smem:[#allocation37_spill]] }
  0x84   : > { %s6517_s27 = sshll.u32 %s7679_s15, 4  ;;  %s8907_s6 = sld [smem:[#allocation38_spill]] }
  0x85   : > { %s8909_s22 = sld [smem:[#allocation40_spill]]  ;;  %s6521_s16 = sshll.u32 %s7679_s15, 5 }
  0x86   : > { %s872_s18 = scalar_lea.vmem %s8904_s26, %s6390_s19  ;;  %s8910_s10 = sld [smem:[#allocation41_spill]] }
  0x87   : > { %s7687_s12 = scalar_lea.vmem %s8905_s9, %s6390_s19  ;;  %s8913_s21 = sld [smem:[#allocation45_spill]] }
  0x88   : > { %s8914_s23 = sld [smem:[#allocation47_spill]]  ;;  %s7748_s26 = scalar_lea.vmem [#allocation11], %s6388_s14 }
  0x89   : > { %s7697_s29 = scalar_lea.vmem %s8906_s5, %s6517_s27  ;;  %s8916_s25 = sld [smem:[#allocation48_spill]] }
  0x8a   : > { %s7702_s0 = scalar_lea.vmem %s8907_s6, %s6517_s27  ;;  %s8917_s11 = sld [smem:[#allocation49_spill]] }
  0x8b   : > { %s7711_s1 = scalar_lea.vmem %s8909_s22, %s6517_s27  ;;  %p6404_p13 = scmp.ne.s32.totalorder %s7355_s2, 0 }
  0x8c   : > { %s7716_s13 = scalar_lea.vmem %s8910_s10, %s6517_s27  ;;  %s8915_s27 = sld [smem:[#allocation46_spill]] }
  0x8d   : > { %s915_s19 = scalar_lea.vmem %s8913_s21, %s7679_s15 }
  0x8e   : > { %s923_s3 = scalar_lea.vmem %s8914_s23, %s7679_s15  ;;  %935 = sbr.rel (%p6404_p13) target bundleno = 463 (0x1cf), region = 116 }
  0x8f   : > { %s926_s24 = scalar_lea.vmem %s8916_s25, %s7679_s15 }
  0x90   : > { %s929_s30 = scalar_lea.vmem %s8917_s11, %s7679_s15 }
  0x92   : > { %s7738_s8 = scalar_lea.vmem %s8915_s27, %s6521_s16 }
  0x93   : > { %v936_v0 = vld [vmem:[%s872_s18] sm:$0xff]  ;;  %v938_v1 = vld [vmem:[#allocation3] sm:$0xff]  ;;  %vm943_vm0 = vcmask 261120   ;;  %v937_v2 = vld [vmem:[%s872_s18 + $0x8] sm:$0xff] }
  0x94   : > { %v939_v3 = vadd.f32 %v938_v1, %v936_v0  ;;  %v940_v4 = vadd.f32 %v938_v1, %v937_v2  ;;  %v6405_v24 = vld [vmem:[#allocation6] ss:$0 sm:$0xff]  ;;  %v6406_v26 = vld [vmem:[#allocation8] ss:$0 sm:$0xff] }
  0x96   : > { %v944_v5 = vsel %vm943_vm0, %v939_v3, 0.0  ;;  %v947_v6 = vsel %vm943_vm0, %v940_v4, 0.0 }
  0x97   : > { %945 = vadd.xlane.f32.xlu0 %v944_v5 }
  0x9b   : > { %948 = vadd.xlane.f32.xlu0 %v947_v6 }
 0x120   : > { %v946_v7 = vpop.xlane.xlu0 %945 }
 0x121   : > { %v951_v8 = vmul.f32 0.03125, %v946_v7 }
 0x123   : > { %v953_v9 = vsub.f32 %v939_v3, %v951_v8 }
 0x124   : > { %v949_v10 = vpop.xlane.xlu0 %948 }
 0x125   : > { %v952_v11 = vmul.f32 0.03125, %v949_v10  ;;  %v955_v12 = vmul.f32 %v953_v9, %v953_v9 }
 0x127   : > { %v954_v13 = vsub.f32 %v940_v4, %v952_v11  ;;  %v957_v14 = vsel %vm943_vm0, %v955_v12, 0.0 }
 0x128   : > { %958 = vadd.xlane.f32.xlu1 %v957_v14 }
 0x129   : > { %v956_v15 = vmul.f32 %v954_v13, %v954_v13 }
 0x12b   : > { %v960_v16 = vsel %vm943_vm0, %v956_v15, 0.0 }
 0x12c   : > { %961 = vadd.xlane.f32.xlu1 %v960_v16 }
 0x1b1   : > { %v959_v17 = vpop.xlane.xlu1 %958 }
 0x1b2   : > { %v963_v18 = vmul.f32 0.03125, %v959_v17 }
 0x1b4   : > { %v965_v19 = vadd.f32 1e-06, %v963_v18 }
 0x1b5   : > { %v962_v20 = vpop.xlane.xlu1 %961 }
 0x1b6   : > { %7011 = vrsqrt.f32 %v965_v19  ;;  %v964_v21 = vmul.f32 0.03125, %v962_v20 }
 0x1b8   : > { %v966_v22 = vadd.f32 1e-06, %v964_v21 }
 0x1ba   : > { %7013 = vrsqrt.f32 %v966_v22 }
 0x1c3   : > { %v7012_v23 = vpop.eup %7011 }
 0x1c4   : > { %v969_v25 = vmul.f32 %v7012_v23, %v953_v9 }
 0x1c6   : > { %v977_v27 = vmul.f32 %v6405_v24, %v969_v25 }
 0x1c7   : > { %v7014_v28 = vpop.eup %7013 }
 0x1c8   : > { %v985_v29 = vadd.f32 %v6406_v26, %v977_v27  ;;  %v970_v30 = vmul.f32 %v7014_v28, %v954_v13 }
 0x1ca   : > { %987 = vst.msk [vmem:[#allocation2] sm:$0xff] %vm943_vm0, %v985_v29  ;;  %v978_v31 = vmul.f32 %v6405_v24, %v970_v30 }
 0x1cc   : > { %v986_v32 = vadd.f32 %v6406_v26, %v978_v31 }
 0x1ce   : > { %988 = vst.msk [vmem:[#allocation2 + $0x8] sm:$0xff] %vm943_vm0, %v986_v32 }
 0x1cf PF: > { %v7045_v33 = vld [vmem:[%s7697_s29 + $0x8] sm:$0xff]   ;;  %v7379_v34 = vmov 0.0   ;;  %v7046_v35 = vld [vmem:[%s7697_s29] sm:$0xff]   ;;  %vm7380_vm1 = vmmov 0   ;;  %vm1014_vm2 = vcmask 261120   ;;  %s7381_s23 = smov 104   ;;  %v1076_v50 = vlaneseq  ;;  %s8918_s22 = scalar_lea.vmem %s8821_s7, %s7679_s15 }
 0x1d0   : > { %6611 = vmatprep.subr.bf16.mxu1 %v7379_v34  ;;  %6625 = vmatprep.subr.bf16.mxu0 %v7379_v34  ;;  %s7382_s14 = smov 120   ;;  %s7383_s18 = smov 96   ;;  %v7386_v48 = vmov 1983009808   ;;  %v7387_v51 = vmov 1934713408  }
 0x1d1   : > { %6612 = vmatpush3.bf16.msra.mxu1 %v7045_v33  ;;  %6615 = vmatprep.mubr.msk.bf16.mxu1 %vm7380_vm1, %v7379_v34  ;;  %v989_v36 = vld [vmem:[#allocation2] sm:$0xff]  ;;  %s7384_s29 = smov 112   ;;  %s7385_s17 = smov 64   ;;  %v1074_v49 = vunpack.c.l.s4 %v7386_v48  ;;  %v1106_v52 = vunpack.c.l.s4 %v7387_v51  ;;  %v1077_v54 = vshrl.u32 %v1076_v50, 7  ;;  %vm1518_vm3 = vcmask 64512  }
 0x1d2   : > { %6613 = vmatprep.subr.bf16.mxu1 %v7379_v34  ;;  %6627 = vmatprep.mubr.msk.bf16.mxu0 %vm7380_vm1, %v7379_v34  ;;  %vm1750_vm4 = vcmask 1043456   ;;  %s7389_s21 = smov 8   ;;  %s7390_s16 = smov 24   ;;  %vm2089_vm5 = vcmask 130048   ;;  %vm2091_vm6 = vcmask 195584   ;;  %vm4253_vm7 = vcmask 1045504  }
 0x1d3   : > { %v1075_v53 = vunpack.c.0.s8 %v1074_v49  ;;  %v1107_v57 = vunpack.c.0.s8 %v1106_v52  ;;  %s8919_s10 = sld [smem:[#allocation39_spill]]  ;;  %vm4205_vm8 = vcmask 97280   ;;  %vm5991_vm9 = vcmask 523264   ;;  %p6509_p12 = scmp.ne.s32.totalorder %s7355_s2, 1 }
 0x1d4   : > { %s8924_s20 = sld [smem:[#allocation42_spill]] }
 0x1d5   : > { %v990_v37 = vld [vmem:[#allocation2 + $0x8] sm:$0xff]  ;;  %6614 = vmatpush3.bf16.msra.mxu1 %v7046_v35  ;;  %v7804_v58 = vsub.s32 %v1075_v53, %v1077_v54  ;;  %v7806_v1 = vsub.s32 %v1107_v57, %v1077_v54 }
 0x1d6   : > { %v1001_v38 = vpack.c.bf16 %v990_v37, %v989_v36  ;;  %6619 = vmatprep.subr.bf16.mxu1 %v7379_v34 }
 0x1d8   : > { %6616 = vmatmul.mubr.msk.bf16.vlgmr.msra.gmra.mxu1 %vm1014_vm2, %v1001_v38 }
 0x1d9   : > { %6621 = vmatprep.mubr.msk.bf16.mxu1 %vm7380_vm1, %v7379_v34  ;;  %s8920_s27 = scalar_lea.vmem %s8919_s10, %s7679_s15 }
 0x1da   : > { %s8925_s11 = scalar_lea.vmem %s8924_s20, %s7679_s15 }
 0x298   : > { %v1052_v39 = vpop.f32.mrf.mxu1 }
 0x299   : > { %1212 = vrot.lane.b32.xlu1 %v1052_v39, %s7381_s23  ;;  %1208 = vrot.lane.b32.xlu0 %v1052_v39, %s7382_s14  ;;  %v7779_v46 = vmul.f32 0.35355338, %v1052_v39 }
 0x29a   : > { %v6617_v40 = vpop.f32.mrf.mxu1 }
 0x29c   : > { %v7772_v41 = vpop.f32.mrf.mxu1 }
 0x29d   : > { %1214 = vrot.lane.b32.xlu1 %v1052_v39, %s7383_s18  ;;  %1210 = vrot.lane.b32.xlu0 %v1052_v39, %s7384_s29  ;;  %v7794_v47 = vmul.f32 0.35355338, %v7772_v41 }
 0x29e   : > { %v6618_v42 = vpop.f32.mrf.mxu1 }
 0x30b   : > { %v1209_v43 = vpop.permute.xlu0 %1208  ;;  %v1213_v44 = vpop.permute.xlu1 %1212 }
 0x30c   : > { %1216 = vrot.lane.b32.xlu0 %v1209_v43, %s7383_s18 }
 0x30f   : > { %v1211_v45 = vpop.permute.xlu0 %1210  ;;  %v1215_v55 = vpop.permute.xlu1 %1214 }
 0x310   : > { %1220 = vrot.lane.b32.xlu0 %v1213_v44, %s7383_s18  ;;  %1218 = vrot.lane.b32.xlu1 %v1211_v45, %s7383_s18 }
 0x314   : > { %1065 = vrot.lane.b32.xlu0 %v7779_v46, %s7384_s29  ;;  %1062 = vrot.lane.b32.xlu1 %v7779_v46, %s7382_s14 }
 0x318   : > { %1068 = vrot.lane.b32.xlu1 %v7779_v46, %s7381_s23  ;;  %2240 = vrot.lane.b32.xlu0 %v7772_v41, %s7382_s14 }
 0x31c   : > { %2242 = vrot.lane.b32.xlu1 %v7772_v41, %s7384_s29  ;;  %2244 = vrot.lane.b32.xlu0 %v7772_v41, %s7381_s23 }
 0x320   : > { %1362 = vrot.lane.b32.xlu0 %v1052_v39, %s7385_s17  ;;  %2094 = vrot.lane.b32.xlu1 %v7794_v47, %s7382_s14 }
 0x324   : > { %2246 = vrot.lane.b32.xlu0 %v7772_v41, %s7383_s18  ;;  %1364 = vrot.lane.b32.xlu1 %v1209_v43, %s7385_s17 }
 0x328   : > { %1368 = vrot.lane.b32.xlu0 %v1213_v44, %s7385_s17  ;;  %1366 = vrot.lane.b32.xlu1 %v1211_v45, %s7385_s17 }
 0x37e   : > { %v1217_v56 = vpop.permute.xlu0 %1216 }
 0x382   : > { %v1219_v59 = vpop.permute.xlu1 %1218  ;;  %v1221_v60 = vpop.permute.xlu0 %1220 }
 0x383   : > { %v1226_v61 = vcombine.low %v1215_v55, %v1219_v59  ;;  %v1227_v62 = vcombine.high %v1215_v55, %v1219_v59  ;;  %v1242_v63 = vcombine.low %v1217_v56, %v1221_v60  ;;  %v1243_v0 = vcombine.high %v1217_v56, %v1221_v60 }
 0x385   : > { %v1234_v2 = vrot.slane %v1226_v61, %v7804_v58  ;;  %v1241_v3 = vrot.slane %v1227_v62, %v7804_v58  ;;  %v1250_v4 = vrot.slane %v1242_v63, %v7804_v58  ;;  %v1257_v5 = vrot.slane %v1243_v0, %v7804_v58 }
 0x386   : > { %v1066_v6 = vpop.permute.xlu0 %1065  ;;  %v1063_v7 = vpop.permute.xlu1 %1062 }
 0x387   : > { %v1258_v8 = vcombine.low %v1234_v2, %v1250_v4  ;;  %v1259_v9 = vcombine.high %v1234_v2, %v1250_v4  ;;  %v1274_v10 = vcombine.low %v1241_v3, %v1257_v5  ;;  %v1275_v11 = vcombine.high %v1241_v3, %v1257_v5 }
 0x388   : > { %v1071_v16 = vcombine.low %v7779_v46, %v1066_v6  ;;  %v1072_v17 = vcombine.high %v7779_v46, %v1066_v6 }
 0x389   : > { %v1266_v12 = vrot.slane %v1258_v8, %v7806_v1  ;;  %v1273_v13 = vrot.slane %v1259_v9, %v7806_v1  ;;  %v1282_v14 = vrot.slane %v1274_v10, %v7806_v1  ;;  %v1289_v15 = vrot.slane %v1275_v11, %v7806_v1 }
 0x38a   : > { %v1069_v18 = vpop.permute.xlu1 %1068  ;;  %v7818_v19 = vpop.permute.xlu0 %2240  ;;  %v1079_v30 = vrot.slane %v1071_v16, %v7804_v58  ;;  %v1086_v31 = vrot.slane %v1072_v17, %v7804_v58 }
 0x38b   : > { %v1294_v20 = vcombine.low %v1266_v12, %v1273_v13  ;;  %v6412_v21 = vcombine.high %v1266_v12, %v1273_v13  ;;  %v1310_v22 = vcombine.low %v1282_v14, %v1289_v15  ;;  %v6413_v23 = vcombine.high %v1282_v14, %v1289_v15  ;;  %2248 = vrot.lane.b32.xlu1 %v7818_v19, %s7383_s18 }
 0x38c   : > { %v1087_v24 = vcombine.low %v1063_v7, %v1069_v18  ;;  %v1088_v25 = vcombine.high %v1063_v7, %v1069_v18 }
 0x38d   : > { %v1301_v26 = vrot.slane %v1294_v20, %v7804_v58  ;;  %v1309_v27 = vrot.slane %v6412_v21, %v7804_v58  ;;  %v1317_v28 = vrot.slane %v1310_v22, %v7804_v58  ;;  %v1325_v29 = vrot.slane %v6413_v23, %v7804_v58 }
 0x38e   : > { %v1095_v32 = vrot.slane %v1087_v24, %v7804_v58  ;;  %v1102_v33 = vrot.slane %v1088_v25, %v7804_v58  ;;  %v7830_v35 = vpop.permute.xlu1 %2242  ;;  %v7832_v36 = vpop.permute.xlu0 %2244 }
 0x38f   : > { %2252 = vrot.lane.b32.xlu0 %v7832_v36, %s7383_s18  ;;  %2250 = vrot.lane.b32.xlu1 %v7830_v35, %s7383_s18  ;;  %v1326_v37 = vcombine.low %v1301_v26, %v1309_v27  ;;  %v1342_v38 = vcombine.low %v1317_v28, %v1325_v29  ;;  %v1327_v39 = vcombine.high %v1301_v26, %v1309_v27 }
 0x390   : > { %v1103_v40 = vcombine.low %v1079_v30, %v1095_v32  ;;  %v1104_v42 = vcombine.high %v1079_v30, %v1095_v32  ;;  %v1119_v43 = vcombine.low %v1086_v31, %v1102_v33  ;;  %v1120_v44 = vcombine.high %v1086_v31, %v1102_v33 }
 0x391   : > { %v1334_v45 = vrot.slane %v1326_v37, %v7806_v1  ;;  %v1350_v46 = vrot.slane %v1342_v38, %v7806_v1  ;;  %v1343_v48 = vcombine.high %v1317_v28, %v1325_v29  ;;  %v1341_v57 = vrot.slane %v1327_v39, %v7806_v1 }
 0x392   : > { %v1111_v49 = vrot.slane %v1103_v40, %v7806_v1  ;;  %v1118_v50 = vrot.slane %v1104_v42, %v7806_v1  ;;  %v1127_v51 = vrot.slane %v1119_v43, %v7806_v1  ;;  %v1134_v52 = vrot.slane %v1120_v44, %v7806_v1  ;;  %v1363_v53 = vpop.permute.xlu0 %1362  ;;  %v7844_v54 = vpop.permute.xlu1 %2094 }
 0x393   : > { %v1358_v55 = vcombine.low %v1334_v45, %v1350_v46  ;;  %v1359_v56 = vcombine.high %v1334_v45, %v1350_v46  ;;  %v1357_v59 = vrot.slane %v1343_v48, %v7806_v1 }
 0x394   : > { %v1139_v60 = vcombine.low %v1111_v49, %v1118_v50  ;;  %v6410_v61 = vcombine.high %v1111_v49, %v1118_v50  ;;  %v1155_v62 = vcombine.low %v1127_v51, %v1134_v52  ;;  %v6411_v63 = vcombine.high %v1127_v51, %v1134_v52 }
 0x395   : > { %v1514_v0 = vpack.c.bf16 %v1358_v55, %v1358_v55  ;;  %v1515_v2 = vpack.c.bf16 %v1359_v56, %v1359_v56  ;;  %v1360_v13 = vcombine.low %v1341_v57, %v1357_v59  ;;  %v1361_v14 = vcombine.high %v1341_v57, %v1357_v59 }
 0x396   : > { %v1146_v3 = vrot.slane %v1139_v60, %v7804_v58  ;;  %v1154_v4 = vrot.slane %v6410_v61, %v7804_v58  ;;  %v1162_v5 = vrot.slane %v1155_v62, %v7804_v58  ;;  %v1170_v6 = vrot.slane %v6411_v63, %v7804_v58  ;;  %v7852_v7 = vpop.permute.xlu0 %2246  ;;  %v1365_v8 = vpop.permute.xlu1 %1364 }
 0x397   : > { %v1523_v9 = vsel %vm1518_vm3, %v1514_v0, 0  ;;  %v1569_v10 = vsel %vm1518_vm3, %v1515_v2, 0  ;;  %v1516_v28 = vpack.c.bf16 %v1360_v13, %v1360_v13  ;;  %v1517_v29 = vpack.c.bf16 %v1361_v14, %v1361_v14 }
 0x398   : > { %v1171_v11 = vcombine.low %v1146_v3, %v1154_v4  ;;  %v1187_v12 = vcombine.low %v1162_v5, %v1170_v6  ;;  %6620 = vmatpush3.bf16.xpose.msra.mxu1 %v1523_v9  ;;  %6626 = vmatpush3.bf16.xpose.msra.mxu0 %v1569_v10  ;;  %v1172_v15 = vcombine.high %v1146_v3, %v1154_v4 }
 0x399   : > { %6631 = vmatprep.subr.bf16.mxu1 %v7379_v34  ;;  %v1188_v16 = vcombine.high %v1162_v5, %v1170_v6  ;;  %6637 = vmatprep.subr.bf16.mxu0 %v7379_v34  ;;  %v1615_v46 = vsel %vm1518_vm3, %v1516_v28, 0  ;;  %v1661_v48 = vsel %vm1518_vm3, %v1517_v29, 0 }
 0x39a   : > { %v1369_v17 = vpop.permute.xlu0 %1368  ;;  %v1367_v18 = vpop.permute.xlu1 %1366  ;;  %v1179_v20 = vrot.slane %v1171_v11, %v7806_v1  ;;  %v1195_v21 = vrot.slane %v1187_v12, %v7806_v1  ;;  %v1186_v39 = vrot.slane %v1172_v15, %v7806_v1 }
 0x39b   : > { %v1390_v22 = vcombine.low %v1365_v8, %v1369_v17  ;;  %v1391_v23 = vcombine.high %v1365_v8, %v1369_v17  ;;  %v1374_v24 = vcombine.low %v1363_v53, %v1367_v18  ;;  %v1375_v25 = vcombine.high %v1363_v53, %v1367_v18 }
 0x39c   : > { %v1203_v26 = vcombine.low %v1179_v20, %v1195_v21  ;;  %v1204_v27 = vcombine.high %v1179_v20, %v1195_v21  ;;  %v1202_v40 = vrot.slane %v1188_v16, %v7806_v1 }
 0x39d   : > { %v1398_v30 = vrot.slane %v1390_v22, %v7804_v58  ;;  %v1405_v31 = vrot.slane %v1391_v23, %v7804_v58  ;;  %v1382_v32 = vrot.slane %v1374_v24, %v7804_v58  ;;  %v1389_v33 = vrot.slane %v1375_v25, %v7804_v58 }
 0x39e   : > { %v1510_v37 = vpack.c.bf16 %v1203_v26, %v1203_v26  ;;  %v1511_v38 = vpack.c.bf16 %v1204_v27, %v1204_v27  ;;  %v1205_v53 = vcombine.low %v1186_v39, %v1202_v40  ;;  %v1206_v55 = vcombine.high %v1186_v39, %v1202_v40 }
 0x39f   : > { %v1406_v42 = vcombine.low %v1382_v32, %v1398_v30  ;;  %v1407_v43 = vcombine.high %v1382_v32, %v1398_v30  ;;  %v1422_v44 = vcombine.low %v1389_v33, %v1405_v31  ;;  %v1423_v45 = vcombine.high %v1389_v33, %v1405_v31 }
 0x3a0   : > { %6622 = vmatmul.mubr.msk.bf16.vlgmr.msra.gmra.mxu1 %vm1518_vm3, %v1510_v37  ;;  %6628 = vmatmul.mubr.msk.bf16.vlgmr.msra.gmra.mxu0 %vm1518_vm3, %v1511_v38  ;;  %v1512_v2 = vpack.c.bf16 %v1205_v53, %v1205_v53  ;;  %v1513_v3 = vpack.c.bf16 %v1206_v55, %v1206_v55 }
 0x3a1   : > { %v1414_v49 = vrot.slane %v1406_v42, %v7806_v1  ;;  %v1421_v50 = vrot.slane %v1407_v43, %v7806_v1  ;;  %v1430_v51 = vrot.slane %v1422_v44, %v7806_v1  ;;  %v1437_v52 = vrot.slane %v1423_v45, %v7806_v1  ;;  %6632 = vmatpush3.bf16.xpose.msra.mxu1 %v1615_v46 }
 0x3a2   : > { %6638 = vmatpush3.bf16.xpose.msra.mxu0 %v1661_v48  ;;  %6633 = vmatprep.mubr.msk.bf16.mxu1 %vm7380_vm1, %v7379_v34 }
 0x3a3   : > { %v1442_v56 = vcombine.low %v1414_v49, %v1421_v50  ;;  %v6414_v57 = vcombine.high %v1414_v49, %v1421_v50  ;;  %v1458_v59 = vcombine.low %v1430_v51, %v1437_v52  ;;  %v6415_v60 = vcombine.high %v1430_v51, %v1437_v52  ;;  %6639 = vmatprep.mubr.msk.bf16.mxu0 %vm7380_vm1, %v7379_v34 }
 0x3a4   : > { %6643 = vmatprep.subr.bf16.mxu1 %v7379_v34  ;;  %6649 = vmatprep.subr.bf16.mxu0 %v7379_v34 }
 0x3a5   : > { %v1449_v61 = vrot.slane %v1442_v56, %v7804_v58  ;;  %v1457_v62 = vrot.slane %v6414_v57, %v7804_v58  ;;  %v1465_v63 = vrot.slane %v1458_v59, %v7804_v58  ;;  %v1473_v0 = vrot.slane %v6415_v60, %v7804_v58 }
 0x3a7   : > { %v1474_v4 = vcombine.low %v1449_v61, %v1457_v62  ;;  %v1490_v5 = vcombine.low %v1465_v63, %v1473_v0  ;;  %v1475_v6 = vcombine.high %v1449_v61, %v1457_v62  ;;  %v1491_v8 = vcombine.high %v1465_v63, %v1473_v0 }
 0x3a8   : > { %6634 = vmatmul.mubr.msk.bf16.vlgmr.msra.gmra.mxu1 %vm1518_vm3, %v1512_v2 }
 0x3a9   : > { %6640 = vmatmul.mubr.msk.bf16.vlgmr.msra.gmra.mxu0 %vm1518_vm3, %v1513_v3  ;;  %v1482_v9 = vrot.slane %v1474_v4, %v7806_v1  ;;  %v1498_v10 = vrot.slane %v1490_v5, %v7806_v1  ;;  %6645 = vmatprep.mubr.msk.bf16.mxu1 %vm7380_vm1, %v7379_v34  ;;  %v1489_v11 = vrot.slane %v1475_v6, %v7806_v1 }
 0x3aa   : > { %6651 = vmatprep.mubr.msk.bf16.mxu0 %vm7380_vm1, %v7379_v34  ;;  %v1505_v12 = vrot.slane %v1491_v8, %v7806_v1 }
 0x3ab   : > { %v1506_v13 = vcombine.low %v1482_v9, %v1498_v10  ;;  %v1507_v14 = vcombine.high %v1482_v9, %v1498_v10 }
 0x3ac   : > { %v7894_v15 = vcombine.low %v1489_v11, %v1505_v12  ;;  %v7896_v16 = vcombine.high %v1489_v11, %v1505_v12 }
 0x3ad   : > { %v1743_v17 = vpack.c.bf16 %v1506_v13, %v1506_v13  ;;  %v1744_v18 = vpack.c.bf16 %v1507_v14, %v1507_v14 }
 0x3af   : > { %v1752_v20 = vsel %vm1750_vm4, %v1743_v17, 0  ;;  %v1798_v21 = vsel %vm1750_vm4, %v1744_v18, 0 }
 0x3b0   : > { %6644 = vmatpush3.bf16.msra.mxu1 %v1752_v20  ;;  %6650 = vmatpush3.bf16.msra.mxu0 %v1798_v21 }
 0x3b1   : > { %6655 = vmatprep.subr.bf16.mxu1 %v7379_v34  ;;  %6661 = vmatprep.subr.bf16.mxu0 %v7379_v34 }
 0x3fd   : > { %v2249_v46 = vpop.permute.xlu1 %2248 }
 0x401   : > { %v2253_v48 = vpop.permute.xlu0 %2252  ;;  %v2251_v49 = vpop.permute.xlu1 %2250 }
 0x402   : > { %v2274_v50 = vcombine.low %v2249_v46, %v2253_v48  ;;  %v2258_v51 = vcombine.low %v7852_v7, %v2251_v49  ;;  %v2275_v52 = vcombine.high %v2249_v46, %v2253_v48  ;;  %v2259_v53 = vcombine.high %v7852_v7, %v2251_v49 }
 0x404   : > { %v2282_v55 = vrot.slane %v2274_v50, %v7804_v58  ;;  %v2266_v56 = vrot.slane %v2258_v51, %v7804_v58  ;;  %v2273_v57 = vrot.slane %v2259_v53, %v7804_v58 }
 0x406   : > { %v2290_v59 = vcombine.low %v2266_v56, %v2282_v55  ;;  %v2291_v60 = vcombine.high %v2266_v56, %v2282_v55 }
 0x408   : > { %v2298_v62 = vrot.slane %v2290_v59, %v7806_v1  ;;  %v2305_v63 = vrot.slane %v2291_v60, %v7806_v1 }
 0x40a   : > { %v2326_v9 = vcombine.low %v2298_v62, %v2305_v63  ;;  %v6428_v10 = vcombine.high %v2298_v62, %v2305_v63 }
 0x40c   : > { %v2333_v13 = vrot.slane %v2326_v9, %v7804_v58  ;;  %v2341_v14 = vrot.slane %v6428_v10, %v7804_v58 }
 0x40e   : > { %v2359_v59 = vcombine.high %v2333_v13, %v2341_v14 }
 0x460   : > { %v1559_v22 = vpop.f32.mrf.mxu1  ;;  %v1605_v23 = vpop.f32.mrf.mxu0 }
 0x461   : > { %v1706_v24 = vsel %vm1518_vm3, %v1605_v23, -inf  ;;  %v1703_v25 = vsel %vm1518_vm3, %v1559_v22, -inf }
 0x462   : > { %v6629_v26 = vpop.f32.mrf.mxu0  ;;  %1707 = vmax.xlane.f32.xlu0 %v1706_v24  ;;  %1704 = vmax.xlane.f32.xlu1 %v1703_v25  ;;  %v6623_v27 = vpop.f32.mrf.mxu1 }
 0x463   : > { %v2358_v27 = vcombine.low %v2333_v13, %v2341_v14 }
 0x464   : > { %v1562_v28 = vpop.f32.mrf.mxu1  ;;  %v1608_v29 = vpop.f32.mrf.mxu0 }
 0x466   : > { %v6624_v30 = vpop.f32.mrf.mxu1  ;;  %v6630_v31 = vpop.f32.mrf.mxu0 }
 0x468   : > { %v1651_v32 = vpop.f32.mrf.mxu1 }
 0x469   : > { %v1697_v33 = vpop.f32.mrf.mxu0  ;;  %v1709_v37 = vsel %vm1518_vm3, %v1651_v32, -inf }
 0x46a   : > { %v1712_v38 = vsel %vm1518_vm3, %v1697_v33, -inf  ;;  %1710 = vmax.xlane.f32.xlu1 %v1709_v37  ;;  %v6635_v39 = vpop.f32.mrf.mxu1 }
 0x46b   : > { %v6641_v40 = vpop.f32.mrf.mxu0  ;;  %1713 = vmax.xlane.f32.xlu0 %v1712_v38  ;;  %v1746_v39 = vpack.c.bf16 %v7896_v16, %v7896_v16  ;;  %v1745_v16 = vpack.c.bf16 %v7894_v15, %v7894_v15 }
 0x46c   : > { %v1654_v42 = vpop.f32.mrf.mxu1 }
 0x46d   : > { %v1700_v43 = vpop.f32.mrf.mxu0  ;;  %v1890_v51 = vsel %vm1750_vm4, %v1746_v39, 0  ;;  %v1844_v63 = vsel %vm1750_vm4, %v1745_v16, 0 }
 0x46e   : > { %v6636_v44 = vpop.f32.mrf.mxu1 }
 0x46f   : > { %v6642_v45 = vpop.f32.mrf.mxu0 }
 0x47b   : > { %2100 = vrot.lane.b32.xlu1 %v7794_v47, %s7381_s23 }
 0x47f   : > { %2396 = vrot.lane.b32.xlu1 %v7818_v19, %s7385_s17  ;;  %v2289_v19 = vrot.slane %v2275_v52, %v7804_v58 }
 0x481   : > { %2097 = vrot.lane.b32.xlu0 %v7794_v47, %s7384_s29  ;;  %v2307_v61 = vcombine.high %v2273_v57, %v2289_v19 }
 0x483   : > { %v2321_v3 = vrot.slane %v2307_v61, %v7806_v1 }
 0x485   : > { %2394 = vrot.lane.b32.xlu0 %v7772_v41, %s7385_s17  ;;  %v2306_v41 = vcombine.low %v2273_v57, %v2289_v19 }
 0x487   : > { %v2314_v7 = vrot.slane %v2306_v41, %v7806_v1 }
 0x489   : > { %v2342_v11 = vcombine.low %v2314_v7, %v2321_v3  ;;  %v6429_v12 = vcombine.high %v2314_v7, %v2321_v3 }
 0x48b   : > { %v7927_v18 = vrot.slane %v2342_v11, %v7804_v58  ;;  %v7930_v20 = vrot.slane %v6429_v12, %v7804_v58 }
 0x48d   : > { %v2374_v31 = vcombine.low %v7927_v18, %v7930_v20  ;;  %v2375_v15 = vcombine.high %v7927_v18, %v7930_v20 }
 0x48f   : > { %v2382_v43 = vrot.slane %v2374_v31, %v7806_v1  ;;  %v2389_v11 = vrot.slane %v2375_v15, %v7806_v1 }
 0x4eb   : > { %v1708_v0 = vpop.xlane.xlu0 %1707  ;;  %v1705_v2 = vpop.xlane.xlu1 %1704 }
 0x4ec   : > { %v1716_v4 = vsub.f32 %v1605_v23, %v1708_v0  ;;  %v1715_v5 = vsub.f32 %v1559_v22, %v1705_v2 }
 0x4ee   : > { %v1721_v6 = vmul.f32 1.442695, %v1716_v4  ;;  %v1719_v8 = vmul.f32 1.442695, %v1715_v5  ;;  %v2373_v5 = vrot.slane %v2359_v59, %v7806_v1 }
 0x4f0   : > { %7059 = vpow2.f32 %v1721_v6 }
 0x4f1   : > { %7061 = vpow2.f32 %v1719_v8 }
 0x4f3   : > { %v1711_v17 = vpop.xlane.xlu1 %1710 }
 0x4f4   : > { %v1714_v21 = vpop.xlane.xlu0 %1713  ;;  %v1717_v22 = vsub.f32 %v1651_v32, %v1711_v17 }
 0x4f5   : > { %v1718_v23 = vsub.f32 %v1697_v33, %v1714_v21 }
 0x4f6   : > { %v1723_v24 = vmul.f32 1.442695, %v1717_v22  ;;  %v2393_v22 = vcombine.high %v2373_v5, %v2389_v11 }
 0x4f7   : > { %v1725_v25 = vmul.f32 1.442695, %v1718_v23  ;;  %v2101_v26 = vpop.permute.xlu1 %2100 }
 0x4f8   : > { %7063 = vpow2.f32 %v1723_v24  ;;  %v2098_v28 = vpop.permute.xlu0 %2097  ;;  %v2119_v29 = vcombine.low %v7844_v54, %v2101_v26  ;;  %v2120_v30 = vcombine.high %v7844_v54, %v2101_v26  ;;  %v2366_v54 = vrot.slane %v2358_v27, %v7806_v1 }
 0x4f9   : > { %7065 = vpow2.f32 %v1725_v25  ;;  %v2103_v37 = vcombine.low %v7794_v47, %v2098_v28  ;;  %v2104_v38 = vcombine.high %v7794_v47, %v2098_v28  ;;  %v2392_v24 = vcombine.low %v2373_v5, %v2389_v11 }
 0x4fa   : > { %v2127_v32 = vrot.slane %v2119_v29, %v7804_v58  ;;  %v2134_v33 = vrot.slane %v2120_v30, %v7804_v58  ;;  %v2391_v57 = vcombine.high %v2366_v54, %v2382_v43  ;;  %v2390_v0 = vcombine.low %v2366_v54, %v2382_v43 }
 0x4fb   : > { %v2111_v40 = vrot.slane %v2103_v37, %v7804_v58  ;;  %v2118_v42 = vrot.slane %v2104_v38, %v7804_v58  ;;  %v2549_v29 = vpack.c.bf16 %v2393_v22, %v2393_v22  ;;  %v2548_v30 = vpack.c.bf16 %v2392_v24, %v2392_v24  ;;  %v2397_v24 = vpop.permute.xlu1 %2396 }
 0x4fc   : > { %v2547_v10 = vpack.c.bf16 %v2391_v57, %v2391_v57  ;;  %v2546_v14 = vpack.c.bf16 %v2390_v0, %v2390_v0 }
 0x4fd   : > { %v7946_v44 = vpop.eup %7059  ;;  %v2135_v45 = vcombine.low %v2111_v40, %v2127_v32  ;;  %v2136_v46 = vcombine.high %v2111_v40, %v2127_v32  ;;  %v2151_v47 = vcombine.low %v2118_v42, %v2134_v33  ;;  %v2152_v48 = vcombine.high %v2118_v42, %v2134_v33 }
 0x4fe   : > { %v7948_v49 = vpop.eup %7061  ;;  %v1740_v50 = vpack.c.bf16 %v7946_v44, %v7946_v44  ;;  %v2600_v21 = vsel %vm1518_vm3, %v2547_v10, 0  ;;  %v2554_v23 = vsel %vm1518_vm3, %v2546_v14, 0  ;;  %v2692_v33 = vsel %vm1518_vm3, %v2549_v29, 0 }
 0x4ff   : > { %v2143_v52 = vrot.slane %v2135_v45, %v7806_v1  ;;  %v2150_v53 = vrot.slane %v2136_v46, %v7806_v1  ;;  %v2159_v55 = vrot.slane %v2151_v47, %v7806_v1  ;;  %v2166_v56 = vrot.slane %v2152_v48, %v7806_v1 }
 0x500   : > { %v1739_v19 = vpack.c.bf16 %v7948_v49, %v7948_v49  ;;  %6652 = vmatmul.mubr.msk.bf16.vlgmr.msra.gmra.mxu0 %vm1518_vm3, %v1740_v50  ;;  %v2646_v39 = vsel %vm1518_vm3, %v2548_v30, 0 }
 0x501   : > { %v2171_v60 = vcombine.low %v2143_v52, %v2150_v53  ;;  %v6426_v41 = vcombine.high %v2143_v52, %v2150_v53  ;;  %v2187_v61 = vcombine.low %v2159_v55, %v2166_v56  ;;  %v6427_v62 = vcombine.high %v2159_v55, %v2166_v56  ;;  %6662 = vmatpush3.bf16.msra.mxu0 %v1890_v51 }
 0x502   : > { %6646 = vmatmul.mubr.msk.bf16.vlgmr.msra.gmra.mxu1 %vm1518_vm3, %v1739_v19  ;;  %6663 = vmatprep.mubr.msk.bf16.mxu0 %vm7380_vm1, %v7379_v34 }
 0x503   : > { %v2178_v2 = vrot.slane %v2171_v60, %v7804_v58  ;;  %v2186_v7 = vrot.slane %v6426_v41, %v7804_v58  ;;  %v2194_v3 = vrot.slane %v2187_v61, %v7804_v58  ;;  %v2202_v4 = vrot.slane %v6427_v62, %v7804_v58  ;;  %6656 = vmatpush3.bf16.msra.mxu1 %v1844_v63 }
 0x504   : > { %6657 = vmatprep.mubr.msk.bf16.mxu1 %vm7380_vm1, %v7379_v34  ;;  %6667 = vmatprep.subr.bf16.mxu1 %v7379_v34 }
 0x505   : > { %v7976_v6 = vpop.eup %7063  ;;  %v2203_v8 = vcombine.low %v2178_v2, %v2186_v7  ;;  %v2219_v9 = vcombine.low %v2194_v3, %v2202_v4  ;;  %6673 = vmatprep.subr.bf16.mxu0 %v7379_v34  ;;  %v2204_v25 = vcombine.high %v2178_v2, %v2186_v7  ;;  %v2220_v26 = vcombine.high %v2194_v3, %v2202_v4 }
 0x506   : > { %v7980_v12 = vpop.eup %7065  ;;  %v1741_v13 = vpack.c.bf16 %v7976_v6, %v7976_v6  ;;  %v1733_v22 = vsel %vm1518_vm3, %v7976_v6, 0.0 }
 0x507   : > { %v1742_v17 = vpack.c.bf16 %v7980_v12, %v7980_v12  ;;  %v2211_v18 = vrot.slane %v2203_v8, %v7806_v1  ;;  %v2227_v20 = vrot.slane %v2219_v9, %v7806_v1  ;;  %v2218_v37 = vrot.slane %v2204_v25, %v7806_v1  ;;  %v2395_v25 = vpop.permute.xlu0 %2394 }
 0x508   : > { %v2234_v38 = vrot.slane %v2220_v26, %v7806_v1 }
 0x509   : > { %6664 = vmatmul.mubr.msk.bf16.vlgmr.msra.gmra.mxu0 %vm1518_vm3, %v1742_v17  ;;  %v2236_v27 = vcombine.high %v2211_v18, %v2227_v20  ;;  %v2235_v28 = vcombine.low %v2211_v18, %v2227_v20 }
 0x50a   : > { %6658 = vmatmul.mubr.msk.bf16.vlgmr.msra.gmra.mxu1 %vm1518_vm3, %v1741_v13  ;;  %6674 = vmatpush3.bf16.xpose.msra.mxu0 %v2600_v21  ;;  %v2238_v40 = vcombine.high %v2218_v37, %v2234_v38  ;;  %v2237_v42 = vcombine.low %v2218_v37, %v2234_v38 }
 0x50b   : > { %6668 = vmatpush3.bf16.xpose.msra.mxu1 %v2554_v23  ;;  %6669 = vmatprep.mubr.msk.bf16.mxu1 %vm7380_vm1, %v7379_v34  ;;  %v2543_v31 = vpack.c.bf16 %v2236_v27, %v2236_v27  ;;  %v2542_v32 = vpack.c.bf16 %v2235_v28, %v2235_v28  ;;  %v1727_v23 = vsel %vm1518_vm3, %v7948_v49, 0.0 }
 0x50c   : > { %6675 = vmatprep.mubr.msk.bf16.mxu0 %vm7380_vm1, %v7379_v34  ;;  %6679 = vmatprep.subr.bf16.mxu1 %v7379_v34  ;;  %v2545_v54 = vpack.c.bf16 %v2238_v40, %v2238_v40  ;;  %v2544_v43 = vpack.c.bf16 %v2237_v42, %v2237_v42 }
 0x50d   : > { %6685 = vmatprep.subr.bf16.mxu0 %v7379_v34 }
 0x511   : > { %6676 = vmatmul.mubr.msk.bf16.vlgmr.msra.gmra.mxu0 %vm1518_vm3, %v2543_v31 }
 0x512   : > { %6670 = vmatmul.mubr.msk.bf16.vlgmr.msra.gmra.mxu1 %vm1518_vm3, %v2542_v32  ;;  %6686 = vmatpush3.bf16.xpose.msra.mxu0 %v2692_v33 }
 0x513   : > { %6680 = vmatpush3.bf16.xpose.msra.mxu1 %v2646_v39  ;;  %6681 = vmatprep.mubr.msk.bf16.mxu1 %vm7380_vm1, %v7379_v34 }
 0x514   : > { %6687 = vmatprep.mubr.msk.bf16.mxu0 %vm7380_vm1, %v7379_v34  ;;  %6691 = vmatprep.subr.bf16.mxu1 %v7379_v34 }
 0x515   : > { %6697 = vmatprep.subr.bf16.mxu0 %v7379_v34 }
 0x519   : > { %6688 = vmatmul.mubr.msk.bf16.vlgmr.msra.gmra.mxu0 %vm1518_vm3, %v2545_v54 }
 0x51a   : > { %6682 = vmatmul.mubr.msk.bf16.vlgmr.msra.gmra.mxu1 %vm1518_vm3, %v2544_v43  ;;  %6699 = vmatprep.mubr.msk.bf16.mxu0 %vm7380_vm1, %v7379_v34 }
 0x51b   : > { %6693 = vmatprep.mubr.msk.bf16.mxu1 %vm7380_vm1, %v7379_v34 }
 0x5c0   : > { %v8016_v45 = vpop.f32.mrf.mxu0 }
 0x5c2   : > { %v8018_v46 = vpop.f32.mrf.mxu1  ;;  %v6653_v47 = vpop.f32.mrf.mxu0 }
 0x5c4   : > { %v6647_v48 = vpop.f32.mrf.mxu1  ;;  %v1837_v50 = vpop.f32.mrf.mxu0 }
 0x5c6   : > { %v1791_v16 = vpop.f32.mrf.mxu1  ;;  %v6654_v51 = vpop.f32.mrf.mxu0 }
 0x5c8   : > { %v6648_v52 = vpop.f32.mrf.mxu1 }
 0x5c9   : > { %v8020_v53 = vpop.f32.mrf.mxu0 }
 0x5ca   : > { %v8022_v55 = vpop.f32.mrf.mxu1 }
 0x5cb   : > { %v6665_v56 = vpop.f32.mrf.mxu0 }
 0x5cc   : > { %v6659_v19 = vpop.f32.mrf.mxu1 }
 0x5cd   : > { %v1929_v57 = vpop.f32.mrf.mxu0 }
 0x5ce   : > { %v1883_v59 = vpop.f32.mrf.mxu1 }
 0x5cf   : > { %v6666_v15 = vpop.f32.mrf.mxu0 }
 0x5d0   : > { %v6660_v60 = vpop.f32.mrf.mxu1 }
 0x5d1   : > { %v2636_v41 = vpop.f32.mrf.mxu0 }
 0x5d2   : > { %v2590_v61 = vpop.f32.mrf.mxu1  ;;  %v2737_v62 = vsel %vm1518_vm3, %v2636_v41, -inf }
 0x5d3   : > { %2738 = vmax.xlane.f32.xlu1 %v2737_v62  ;;  %v6677_v63 = vpop.f32.mrf.mxu0  ;;  %v2734_v0 = vsel %vm1518_vm3, %v2590_v61, -inf }
 0x5d4   : > { %2735 = vmax.xlane.f32.xlu0 %v2734_v0  ;;  %v6671_v2 = vpop.f32.mrf.mxu1 }
 0x5d5   : > { %v2639_v7 = vpop.f32.mrf.mxu0 }
 0x5d6   : > { %v2593_v3 = vpop.f32.mrf.mxu1 }
 0x5d7   : > { %v6678_v4 = vpop.f32.mrf.mxu0 }
 0x5d8   : > { %v6672_v5 = vpop.f32.mrf.mxu1 }
 0x5d9   : > { %v8026_v8 = vpop.f32.mrf.mxu0 }
 0x5da   : > { %v8028_v9 = vpop.f32.mrf.mxu1  ;;  %v2743_v20 = vsel %vm1518_vm3, %v8026_v8, -inf }
 0x5db   : > { %v6689_v10 = vpop.f32.mrf.mxu0  ;;  %v2740_v21 = vsel %vm1518_vm3, %v8028_v9, -inf }
 0x5dc   : > { %v6683_v11 = vpop.f32.mrf.mxu1 }
 0x5dd   : > { %v2731_v13 = vpop.f32.mrf.mxu0 }
 0x5de   : > { %v2685_v14 = vpop.f32.mrf.mxu1 }
 0x5df   : > { %v6690_v17 = vpop.f32.mrf.mxu0 }
 0x5e0   : > { %v6684_v18 = vpop.f32.mrf.mxu1 }
 0x5e4   : > { %2400 = vrot.lane.b32.xlu1 %v7832_v36, %s7385_s17  ;;  %v1730_v36 = vsel %vm1518_vm3, %v7946_v44, 0.0 }
 0x5ea   : > { %2398 = vrot.lane.b32.xlu0 %v7830_v35, %s7385_s17  ;;  %v1736_v35 = vsel %vm1518_vm3, %v7980_v12, 0.0 }
 0x608   : > { %2744 = vmax.xlane.f32.xlu1 %v2743_v20 }
 0x609   : > { %2741 = vmax.xlane.f32.xlu0 %v2740_v21 }
 0x60c   : > { %1734 = vadd.xlane.f32.xlu1 %v1733_v22 }
 0x60d   : > { %1728 = vadd.xlane.f32.xlu0 %v1727_v23 }
 0x611   : > { %1731 = vadd.xlane.f32.xlu0 %v1730_v36 }
 0x615   : > { %1737 = vadd.xlane.f32.xlu0 %v1736_v35 }
 0x65c   : > { %v2739_v26 = vpop.xlane.xlu1 %2738 }
 0x65d   : > { %v2747_v27 = vsub.f32 %v2636_v41, %v2739_v26  ;;  %v2736_v28 = vpop.xlane.xlu0 %2735 }
 0x65e   : > { %v2746_v29 = vsub.f32 %v2590_v61, %v2736_v28 }
 0x65f   : > { %v2752_v6 = vmul.f32 1.442695, %v2747_v27 }
 0x660   : > { %v2750_v30 = vmul.f32 1.442695, %v2746_v29  ;;  %v2401_v31 = vpop.permute.xlu1 %2400 }
 0x661   : > { %7067 = vpow2.f32 %v2752_v6  ;;  %v2422_v49 = vcombine.low %v2397_v24, %v2401_v31  ;;  %v2423_v37 = vcombine.high %v2397_v24, %v2401_v31  ;;  %v2399_v38 = vpop.permute.xlu0 %2398 }
 0x662   : > { %7069 = vpow2.f32 %v2750_v30  ;;  %v2406_v44 = vcombine.low %v2395_v25, %v2399_v38  ;;  %v2407_v32 = vcombine.high %v2395_v25, %v2399_v38 }
 0x663   : > { %v2430_v33 = vrot.slane %v2422_v49, %v7804_v58  ;;  %v2437_v12 = vrot.slane %v2423_v37, %v7804_v58 }
 0x664   : > { %v2414_v39 = vrot.slane %v2406_v44, %v7804_v58  ;;  %v2421_v40 = vrot.slane %v2407_v32, %v7804_v58 }
 0x666   : > { %v2438_v42 = vcombine.low %v2414_v39, %v2430_v33  ;;  %v2439_v54 = vcombine.high %v2414_v39, %v2430_v33  ;;  %v2454_v43 = vcombine.low %v2421_v40, %v2437_v12  ;;  %v2455_v47 = vcombine.high %v2421_v40, %v2437_v12 }
 0x668   : > { %v2446_v48 = vrot.slane %v2438_v42, %v7806_v1  ;;  %v2453_v50 = vrot.slane %v2439_v54, %v7806_v1  ;;  %v2462_v16 = vrot.slane %v2454_v43, %v7806_v1  ;;  %v2469_v51 = vrot.slane %v2455_v47, %v7806_v1 }
 0x66a   : > { %v2474_v52 = vcombine.low %v2446_v48, %v2453_v50  ;;  %v6430_v56 = vcombine.high %v2446_v48, %v2453_v50  ;;  %v2490_v19 = vcombine.low %v2462_v16, %v2469_v51  ;;  %v6431_v57 = vcombine.high %v2462_v16, %v2469_v51 }
 0x66c   : > { %v2481_v59 = vrot.slane %v2474_v52, %v7804_v58  ;;  %v2489_v15 = vrot.slane %v6430_v56, %v7804_v58  ;;  %v2497_v60 = vrot.slane %v2490_v19, %v7804_v58  ;;  %v2505_v41 = vrot.slane %v6431_v57, %v7804_v58 }
 0x66e   : > { %v7068_v61 = vpop.eup %7067  ;;  %v2506_v62 = vcombine.low %v2481_v59, %v2489_v15  ;;  %v2522_v63 = vcombine.low %v2497_v60, %v2505_v41  ;;  %v2507_v0 = vcombine.high %v2481_v59, %v2489_v15  ;;  %v2523_v2 = vcombine.high %v2497_v60, %v2505_v41 }
 0x66f   : > { %v7070_v7 = vpop.eup %7069  ;;  %v2761_v3 = vsel %vm1518_vm3, %v7068_v61, 0.0  ;;  %v2771_v26 = vpack.c.bf16 %v7068_v61, %v7068_v61 }
 0x670   : > { %v2758_v4 = vsel %vm1518_vm3, %v7070_v7, 0.0  ;;  %2762 = vadd.xlane.f32.xlu0 %v2761_v3  ;;  %v2514_v5 = vrot.slane %v2506_v62, %v7806_v1  ;;  %v2530_v10 = vrot.slane %v2522_v63, %v7806_v1  ;;  %v2521_v11 = vrot.slane %v2507_v0, %v7806_v1 }
 0x671   : > { %2759 = vadd.xlane.f32.xlu1 %v2758_v4  ;;  %v2537_v13 = vrot.slane %v2523_v2, %v7806_v1  ;;  %v2770_v25 = vpack.c.bf16 %v7070_v7, %v7070_v7 }
 0x672   : > { %v2538_v14 = vcombine.low %v2514_v5, %v2530_v10  ;;  %v2539_v17 = vcombine.high %v2514_v5, %v2530_v10 }
 0x673   : > { %v2540_v18 = vcombine.low %v2521_v11, %v2537_v13  ;;  %v2541_v20 = vcombine.high %v2521_v11, %v2537_v13 }
 0x674   : > { %v2774_v21 = vpack.c.bf16 %v2538_v14, %v2538_v14  ;;  %v2775_v22 = vpack.c.bf16 %v2539_v17, %v2539_v17 }
 0x675   : > { %v2776_v35 = vpack.c.bf16 %v2540_v18, %v2540_v18  ;;  %v2777_v24 = vpack.c.bf16 %v2541_v20, %v2541_v20 }
 0x676   : > { %v2782_v23 = vsel %vm1750_vm4, %v2774_v21, 0  ;;  %v2828_v36 = vsel %vm1750_vm4, %v2775_v22, 0 }
 0x677   : > { %6692 = vmatpush3.bf16.msra.mxu1 %v2782_v23  ;;  %6698 = vmatpush3.bf16.msra.mxu0 %v2828_v36  ;;  %v2874_v27 = vsel %vm1750_vm4, %v2776_v35, 0  ;;  %v2920_v28 = vsel %vm1750_vm4, %v2777_v24, 0 }
 0x678   : > { %6703 = vmatprep.subr.bf16.mxu1 %v7379_v34  ;;  %6709 = vmatprep.subr.bf16.mxu0 %v7379_v34 }
 0x67a   : > { %6694 = vmatmul.mubr.msk.bf16.vlgmr.msra.gmra.mxu1 %vm1518_vm3, %v2770_v25  ;;  %6700 = vmatmul.mubr.msk.bf16.vlgmr.msra.gmra.mxu0 %vm1518_vm3, %v2771_v26 }
 0x67b   : > { %6704 = vmatpush3.bf16.msra.mxu1 %v2874_v27  ;;  %6710 = vmatpush3.bf16.msra.mxu0 %v2920_v28 }
 0x67c   : > { %6705 = vmatprep.mubr.msk.bf16.mxu1 %vm7380_vm1, %v7379_v34  ;;  %6711 = vmatprep.mubr.msk.bf16.mxu0 %vm7380_vm1, %v7379_v34 }
 0x67d   : > { %6715 = vmatprep.subr.bf16.mxu1 %v7379_v34  ;;  %6723 = vmatprep.subr.bf16.mxu0 %v7379_v34 }
 0x691   : > { %v2745_v29 = vpop.xlane.xlu1 %2744 }
 0x692   : > { %v2749_v6 = vsub.f32 %v8026_v8, %v2745_v29  ;;  %v2742_v30 = vpop.xlane.xlu0 %2741 }
 0x693   : > { %v2748_v31 = vsub.f32 %v8028_v9, %v2742_v30 }
 0x694   : > { %v2756_v49 = vmul.f32 1.442695, %v2749_v6 }
 0x695   : > { %v2754_v37 = vmul.f32 1.442695, %v2748_v31  ;;  %v1735_v38 = vpop.xlane.xlu1 %1734 }
 0x696   : > { %7071 = vpow2.f32 %v2756_v49  ;;  %v1729_v44 = vpop.xlane.xlu0 %1728 }
 0x697   : > { %7073 = vpow2.f32 %v2754_v37 }
 0x698   : > { %7075 = vrcp.f32 %v1735_v38 }
 0x699   : > { %7077 = vrcp.f32 %v1729_v44 }
 0x69a   : > { %v1732_v32 = vpop.xlane.xlu0 %1731 }
 0x69b   : > { %7079 = vrcp.f32 %v1732_v32 }
 0x69e   : > { %v1738_v33 = vpop.xlane.xlu0 %1737 }
 0x69f   : > { %7081 = vrcp.f32 %v1738_v33 }
 0x6a3   : > { %v7072_v12 = vpop.eup %7071 }
 0x6a4   : > { %v7074_v39 = vpop.eup %7073  ;;  %v2767_v40 = vsel %vm1518_vm3, %v7072_v12, 0.0  ;;  %v2773_v8 = vpack.c.bf16 %v7072_v12, %v7072_v12 }
 0x6a5   : > { %v7076_v42 = vpop.eup %7075  ;;  %2768 = vadd.xlane.f32.xlu0 %v2767_v40  ;;  %v2764_v9 = vsel %vm1518_vm3, %v7074_v39, 0.0  ;;  %v2772_v54 = vpack.c.bf16 %v7074_v39, %v7074_v39 }
 0x6a6   : > { %v7078_v43 = vpop.eup %7077  ;;  %2765 = vadd.xlane.f32.xlu1 %v2764_v9  ;;  %6712 = vmatmul.mubr.msk.bf16.vlgmr.msra.gmra.mxu0 %vm1518_vm3, %v2773_v8  ;;  %v1938_v47 = vmul.f32 %v7076_v42, %v8022_v55 }
 0x6a7   : > { %6706 = vmatmul.mubr.msk.bf16.vlgmr.msra.gmra.mxu1 %vm1518_vm3, %v2772_v54  ;;  %6727 = vmatprep.mubr.msk.bf16.mxu0 %vm7380_vm1, %v7379_v34  ;;  %v1936_v48 = vmul.f32 %v7078_v43, %v8018_v46 }
 0x6a8   : > { %6719 = vmatprep.mubr.msk.bf16.mxu1 %vm7380_vm1, %v7379_v34  ;;  %v7080_v50 = vpop.eup %7079 }
 0x6a9   : > { %v1940_v51 = vcombine.low %v1936_v48, %v1938_v47  ;;  %v1941_v52 = vcombine.high %v1936_v48, %v1938_v47  ;;  %v1937_v56 = vmul.f32 %v7080_v50, %v8016_v45 }
 0x6ab   : > { %v1948_v15 = vrot.slane %v1940_v51, %v7804_v58  ;;  %v1955_v60 = vrot.slane %v1941_v52, %v7804_v58 }
 0x6ac   : > { %v7082_v16 = vpop.eup %7081 }
 0x6ad   : > { %v1939_v19 = vmul.f32 %v7082_v16, %v8020_v53 }
 0x6af   : > { %v1956_v57 = vcombine.low %v1937_v56, %v1939_v19  ;;  %v1957_v59 = vcombine.high %v1937_v56, %v1939_v19 }
 0x6b1   : > { %v1964_v41 = vrot.slane %v1956_v57, %v7804_v58  ;;  %v1971_v55 = vrot.slane %v1957_v59, %v7804_v58 }
 0x6b3   : > { %v1972_v61 = vcombine.low %v1948_v15, %v1964_v41  ;;  %v1973_v46 = vcombine.high %v1948_v15, %v1964_v41  ;;  %v1988_v62 = vcombine.low %v1955_v60, %v1971_v55  ;;  %v1989_v63 = vcombine.high %v1955_v60, %v1971_v55 }
 0x6b5   : > { %v1980_v0 = vrot.slane %v1972_v61, %v7806_v1  ;;  %v1987_v45 = vrot.slane %v1973_v46, %v7806_v1  ;;  %v1996_v53 = vrot.slane %v1988_v62, %v7806_v1  ;;  %v2003_v2 = vrot.slane %v1989_v63, %v7806_v1 }
 0x6b7   : > { %v2008_v7 = vcombine.low %v1980_v0, %v1987_v45  ;;  %v6424_v3 = vcombine.high %v1980_v0, %v1987_v45  ;;  %v2024_v4 = vcombine.low %v1996_v53, %v2003_v2  ;;  %v6425_v5 = vcombine.high %v1996_v53, %v2003_v2 }
 0x6b9   : > { %v8101_v10 = vrot.slane %v2008_v7, %v7804_v58  ;;  %v8104_v11 = vrot.slane %v6424_v3, %v7804_v58  ;;  %v8107_v13 = vrot.slane %v2024_v4, %v7804_v58  ;;  %v8110_v14 = vrot.slane %v6425_v5, %v7804_v58  ;;  %v7047_v4 = vld [vmem:[%s7702_s0 + $0x8] sm:$0xff]  }
 0x6ba   : > { %6716 = vmatpush3.bf16.msra.mxu1 %v7047_v4 }
 0x6bb   : > { %v2040_v17 = vcombine.low %v8101_v10, %v8104_v11  ;;  %v2056_v18 = vcombine.low %v8107_v13, %v8110_v14  ;;  %v2041_v0 = vcombine.high %v8101_v10, %v8104_v11  ;;  %v2057_v45 = vcombine.high %v8107_v13, %v8110_v14  ;;  %6717 = vmatprep.subr.bf16.mxu1 %v7379_v34 }
 0x6bd   : > { %v8117_v20 = vrot.slane %v2040_v17, %v7806_v1  ;;  %v8120_v21 = vrot.slane %v2056_v18, %v7806_v1  ;;  %v2071_v10 = vrot.slane %v2057_v45, %v7806_v1 }
 0x6bf   : > { %v2072_v22 = vcombine.low %v8117_v20, %v8120_v21 }
 0x6f9   : > { %v2763_v29 = vpop.xlane.xlu0 %2762 }
 0x6fa   : > { %v2760_v6 = vpop.xlane.xlu1 %2759  ;;  %7083 = vrcp.f32 %v2763_v29 }
 0x6fb   : > { %7085 = vrcp.f32 %v2760_v6 }
 0x707   : > { %v7084_v49 = vpop.eup %7083 }
 0x708   : > { %v7086_v37 = vpop.eup %7085 }
 0x72e   : > { %v2769_v30 = vpop.xlane.xlu0 %2768 }
 0x72f   : > { %v2766_v31 = vpop.xlane.xlu1 %2765  ;;  %7087 = vrcp.f32 %v2769_v30  ;;  %v2073_v30 = vcombine.high %v8117_v20, %v8120_v21  ;;  %v7135_v21 = vld [vmem:[#allocation2] sm:$0xff] }
 0x730   : > { %7089 = vrcp.f32 %v2766_v31 }
 0x73a   : > { %v2818_v23 = vpop.f32.mrf.mxu1  ;;  %v2864_v36 = vpop.f32.mrf.mxu0 }
 0x73b   : > { %v2967_v33 = vmul.f32 %v7084_v49, %v2864_v36  ;;  %v2966_v40 = vmul.f32 %v7086_v37, %v2818_v23  ;;  %v2055_v36 = vrot.slane %v2041_v0, %v7806_v1 }
 0x73c   : > { %v6695_v35 = vpop.f32.mrf.mxu1  ;;  %v6701_v24 = vpop.f32.mrf.mxu0 }
 0x73d   : > { %v7088_v38 = vpop.eup %7087  ;;  %v7048_v24 = vld [vmem:[%s7702_s0] sm:$0xff]   ;;  %v2074_v29 = vcombine.low %v2055_v36, %v2071_v10  ;;  %s7388_s0 = smov 16  }
 0x73e   : > { %v2821_v25 = vpop.f32.mrf.mxu1  ;;  %v2867_v26 = vpop.f32.mrf.mxu0  ;;  %6718 = vmatpush3.bf16.msra.mxu1 %v7048_v24 }
 0x73f   : > { %v7090_v32 = vpop.eup %7089 }
 0x740   : > { %v6696_v27 = vpop.f32.mrf.mxu1  ;;  %v6702_v28 = vpop.f32.mrf.mxu0 }
 0x766   : > { %v2956_v44 = vpop.f32.mrf.mxu0 }
 0x767   : > { %v2910_v12 = vpop.f32.mrf.mxu1  ;;  %v2969_v39 = vmul.f32 %v7088_v38, %v2956_v44 }
 0x768   : > { %v2968_v8 = vmul.f32 %v7090_v32, %v2910_v12  ;;  %v6713_v42 = vpop.f32.mrf.mxu0  ;;  %v2075_v32 = vcombine.high %v2055_v36, %v2071_v10  ;;  %v6448_v36 = vld.sshfl [vmem:[%s7687_s12 + $0x4] sm:$0x3 pattern:$0x76325410] }
 0x769   : > { %v2986_v9 = vcombine.low %v2967_v33, %v2969_v39  ;;  %v2987_v54 = vcombine.high %v2967_v33, %v2969_v39  ;;  %v6707_v43 = vpop.f32.mrf.mxu1  ;;  %v6449_v10 = vld.sshfl [vmem:[%s7687_s12 + $0x8] sm:$0x33 pattern:$0x76325410] }
 0x76a   : > { %v2970_v47 = vcombine.low %v2966_v40, %v2968_v8  ;;  %v2971_v48 = vcombine.high %v2966_v40, %v2968_v8  ;;  %v2959_v50 = vpop.f32.mrf.mxu0 }
 0x76b   : > { %v2994_v16 = vrot.slane %v2986_v9, %v7804_v58  ;;  %v3001_v51 = vrot.slane %v2987_v54, %v7804_v58  ;;  %v2913_v52 = vpop.f32.mrf.mxu1 }
 0x76c   : > { %v2978_v56 = vrot.slane %v2970_v47, %v7804_v58  ;;  %v2985_v19 = vrot.slane %v2971_v48, %v7804_v58  ;;  %v6714_v57 = vpop.f32.mrf.mxu0 }
 0x76d   : > { %v6708_v59 = vpop.f32.mrf.mxu1 }
 0x76e   : > { %v3002_v15 = vcombine.low %v2978_v56, %v2994_v16  ;;  %v3003_v60 = vcombine.high %v2978_v56, %v2994_v16  ;;  %v3018_v41 = vcombine.low %v2985_v19, %v3001_v51  ;;  %v3019_v55 = vcombine.high %v2985_v19, %v3001_v51 }
 0x770   : > { %v3010_v61 = vrot.slane %v3002_v15, %v7806_v1  ;;  %v3017_v46 = vrot.slane %v3003_v60, %v7806_v1  ;;  %v3026_v62 = vrot.slane %v3018_v41, %v7806_v1  ;;  %v3033_v63 = vrot.slane %v3019_v55, %v7806_v1  ;;  %v7136_v60 = vld [vmem:[#allocation2 + $0x8] sm:$0xff] }
 0x772   : > { %v3038_v53 = vcombine.low %v3010_v61, %v3017_v46  ;;  %v6440_v2 = vcombine.high %v3010_v61, %v3017_v46  ;;  %v3054_v7 = vcombine.low %v3026_v62, %v3033_v63  ;;  %v6441_v3 = vcombine.high %v3026_v62, %v3033_v63  ;;  %v7049_v46 = vld [vmem:[%s7711_s1 + $0x8] sm:$0xff]   ;;  %v7050_v62 = vld [vmem:[%s7711_s1] sm:$0xff]  }
 0x773   : > { %6724 = vmatpush3.bf16.msra.mxu0 %v7049_v46 }
 0x774   : > { %v3045_v5 = vrot.slane %v3038_v53, %v7804_v58  ;;  %v3053_v17 = vrot.slane %v6440_v2, %v7804_v58  ;;  %v3061_v18 = vrot.slane %v3054_v7, %v7804_v58  ;;  %v3069_v23 = vrot.slane %v6441_v3, %v7804_v58  ;;  %6725 = vmatprep.subr.bf16.mxu0 %v7379_v34 }
 0x776   : > { %v3071_v11 = vcombine.high %v3045_v5, %v3053_v17  ;;  %v3087_v13 = vcombine.high %v3061_v18, %v3069_v23  ;;  %v3070_v14 = vcombine.low %v3045_v5, %v3053_v17  ;;  %v3086_v35 = vcombine.low %v3061_v18, %v3069_v23  ;;  %v6447_v18 = vld.sshfl [vmem:[%s7687_s12] sm:$0x33 pattern:$0x76325410] }
 0x777   : > { %6726 = vmatpush3.bf16.msra.mxu0 %v7050_v62  ;;  %v3249_v23 = vcombine.high %v6447_v18, %v6447_v18 }
 0x778   : > { %v3085_v25 = vrot.slane %v3071_v11, %v7806_v1  ;;  %v3101_v26 = vrot.slane %v3087_v13, %v7806_v1  ;;  %v3078_v27 = vrot.slane %v3070_v14, %v7806_v1  ;;  %v3094_v28 = vrot.slane %v3086_v35, %v7806_v1  ;;  %6739 = vmatprep.subr.bf16.mxu0 %v7379_v34 }
 0x779   : > { %v3328_v11 = vcombine.low %v6447_v18, %v3249_v23  ;;  %v3329_v13 = vcombine.low %v6448_v36, %v6449_v10 }
 0x77a   : > { %v3104_v6 = vcombine.low %v3085_v25, %v3101_v26  ;;  %v3103_v31 = vcombine.high %v3078_v27, %v3094_v28  ;;  %v3102_v49 = vcombine.low %v3078_v27, %v3094_v28  ;;  %v3105_v44 = vcombine.high %v3085_v25, %v3101_v26  ;;  %v6450_v28 = vld.sshfl [vmem:[%s7687_s12 + $0xc] sm:$0x3 pattern:$0x76325410] }
 0x77b   : > { %v3336_v14 = vrot.slane %v3328_v11, %v7804_v58  ;;  %v3343_v35 = vrot.slane %v3329_v13, %v7804_v58  ;;  %v3264_v27 = vcombine.high %v6449_v10, %v6449_v10 }
 0x77c   : > { %v7020_v37 = vpack.i.bf16 %v3104_v6, %v2074_v29  ;;  %v7015_v38 = vpack.i.bf16 %v3103_v31, %v2073_v30  ;;  %v7025_v33 = vpack.i.bf16 %v3105_v44, %v2075_v32 }
 0x77d   : > { %v3344_v24 = vcombine.low %v3336_v14, %v3343_v35 }
 0x77e   : > { %7021 = vrot.lane.b32.xlu0 %v7020_v37, %s7388_s0  ;;  %7016 = vrot.lane.b32.xlu1 %v7015_v38, %s7389_s21 }
 0x782   : > { %7026 = vrot.lane.b32.xlu1 %v7025_v33, %s7390_s16 }
 0x7f0   : > { %v7022_v12 = vpop.permute.xlu0 %7021  ;;  %v7017_v39 = vpop.permute.xlu1 %7016 }
 0x7f1   : > { %v7019_v40 = vunpack.i.h.bf16 %v7017_v39  ;;  %v7018_v8 = vunpack.i.l.bf16 %v7017_v39  ;;  %v7024_v42 = vunpack.i.h.bf16 %v7022_v12  ;;  %v7023_v9 = vunpack.i.l.bf16 %v7022_v12  ;;  %v6445_v12 = vld [vmem:[%s8918_s22] ss:$0 sm:$0xff] }
 0x7f3   : > { %v2088_v54 = vsel %vm1518_vm3, %v2072_v22, %v7018_v8  ;;  %v3118_v43 = vsel %vm1518_vm3, %v3102_v49, %v7019_v40  ;;  %v3345_v49 = vcombine.low %v3264_v27, %v6450_v28 }
 0x7f4   : > { %v7027_v47 = vpop.permute.xlu1 %7026  ;;  %v2090_v16 = vsel %vm2089_vm5, %v2088_v54, %v7023_v9  ;;  %v3119_v51 = vsel %vm2089_vm5, %v3118_v43, %v7024_v42  ;;  %v6446_v42 = vld [vmem:[%s8920_s27] ss:$0 sm:$0xff] }
 0x7f5   : > { %v7029_v48 = vunpack.i.h.bf16 %v7027_v47  ;;  %v7028_v50 = vunpack.i.l.bf16 %v7027_v47  ;;  %v3352_v44 = vrot.slane %v3345_v49, %v7804_v58 }
 0x7f7   : > { %v2092_v52 = vsel %vm2091_vm6, %v2090_v16, %v7028_v50  ;;  %v3120_v56 = vsel %vm2091_vm6, %v3119_v51, %v7029_v48 }
 0x7f8   : > { %v3121_v19 = vpack.c.bf16 %v3120_v56, %v2092_v52 }
 0x7fa   : > { %6720 = vmatmul.mubr.msk.bf16.vlgmr.msra.gmra.mxu1 %vm1014_vm2, %v3121_v19 }
 0x7fb   : > { %6735 = vmatprep.mubr.msk.bf16.mxu1 %vm1014_vm2, %v3344_v24 }
 0x8ba   : > { %v3171_v20 = vpop.f32.mrf.mxu1 }
 0x8bb   : > { %v3178_v22 = vadd.f32 %v7135_v21, %v3171_v20 }
 0x8bc   : > { %v6721_v57 = vpop.f32.mrf.mxu1 }
 0x8bd   : > { %v3180_v59 = vsel %vm1014_vm2, %v3178_v22, 0.0 }
 0x8be   : > { %3181 = vadd.xlane.f32.xlu1 %v3180_v59  ;;  %v3174_v15 = vpop.f32.mrf.mxu1 }
 0x8bf   : > { %v3179_v41 = vadd.f32 %v7136_v60, %v3174_v15 }
 0x8c0   : > { %v6722_v55 = vpop.f32.mrf.mxu1 }
 0x8c1   : > { %v3183_v61 = vsel %vm1014_vm2, %v3179_v41, 0.0 }
 0x8c2   : > { %3184 = vadd.xlane.f32.xlu0 %v3183_v61 }
 0x947   : > { %v3182_v63 = vpop.xlane.xlu1 %3181 }
 0x948   : > { %v3187_v0 = vmul.f32 0.03125, %v3182_v63 }
 0x94a   : > { %v3189_v45 = vsub.f32 %v3178_v22, %v3187_v0 }
 0x94b   : > { %v3185_v53 = vpop.xlane.xlu0 %3184 }
 0x94c   : > { %v3188_v2 = vmul.f32 0.03125, %v3185_v53  ;;  %v3191_v7 = vmul.f32 %v3189_v45, %v3189_v45 }
 0x94e   : > { %v3190_v3 = vsub.f32 %v3179_v41, %v3188_v2  ;;  %v3193_v4 = vsel %vm1014_vm2, %v3191_v7, 0.0 }
 0x94f   : > { %3194 = vadd.xlane.f32.xlu0 %v3193_v4 }
 0x950   : > { %v3192_v5 = vmul.f32 %v3190_v3, %v3190_v3 }
 0x952   : > { %v3196_v17 = vsel %vm1014_vm2, %v3192_v5, 0.0 }
 0x953   : > { %3197 = vadd.xlane.f32.xlu1 %v3196_v17 }
 0x964   : > { %3353 = vrot.lane.b32.xlu1 %v7050_v62, %s7383_s18 }
 0x965   : > { %3355 = vrot.lane.b32.xlu0 %v7049_v46, %s7383_s18 }
 0x9d8   : > { %v3195_v25 = vpop.xlane.xlu0 %3194 }
 0x9d9   : > { %v3199_v26 = vmul.f32 0.03125, %v3195_v25 }
 0x9db   : > { %v3201_v29 = vadd.f32 1e-06, %v3199_v26 }
 0x9dc   : > { %v3198_v6 = vpop.xlane.xlu1 %3197  ;;  %v3356_v30 = vpop.permute.xlu0 %3355 }
 0x9dd   : > { %7091 = vrsqrt.f32 %v3201_v29  ;;  %v3200_v31 = vmul.f32 0.03125, %v3198_v6  ;;  %6731 = vmatprep.subr.bf16.mxu1 %v3356_v30 }
 0x9de   : > { %6732 = vmatpush3.bf16.msra.mxu1 %v3356_v30 }
 0x9df   : > { %v3202_v37 = vadd.f32 1e-06, %v3200_v31 }
 0x9e0   : > { %v3354_v38 = vpop.permute.xlu1 %3353 }
 0x9e1   : > { %7093 = vrsqrt.f32 %v3202_v37  ;;  %6733 = vmatprep.subr.bf16.mxu1 %v3354_v38 }
 0x9e2   : > { %6734 = vmatpush3.bf16.msra.mxu1 %v3354_v38 }
 0x9e3   : > { %6745 = vmatprep.subr.bf16.mxu1 %v7379_v34 }
 0x9e5   : > { %6736 = vmatmul.mubr.msk.bf16.vlgmr.msra.gmra.mxu1 %vm1014_vm2, %v3352_v44 }
 0x9e6   : > { %6747 = vmatprep.mubr.msk.bf16.mxu1 %vm7380_vm1, %v7379_v34 }
 0x9ea   : > { %v7092_v32 = vpop.eup %7091 }
 0x9eb   : > { %v3205_v33 = vmul.f32 %v7092_v32, %v3189_v45 }
 0x9ed   : > { %v3213_v8 = vmul.f32 %v6445_v12, %v3205_v33 }
 0x9ee   : > { %v7094_v39 = vpop.eup %7093 }
 0x9ef   : > { %v3206_v40 = vmul.f32 %v7094_v39, %v3190_v3  ;;  %v8196_v54 = vadd.f32 %v6446_v42, %v3213_v8 }
 0x9f1   : > { %v3214_v9 = vmul.f32 %v6445_v12, %v3206_v40 }
 0x9f3   : > { %v8198_v43 = vadd.f32 %v6446_v42, %v3214_v9 }
 0x9f5   : > { %v3237_v47 = vpack.c.bf16 %v8198_v43, %v8196_v54 }
 0x9f7   : > { %6728 = vmatmul.mubr.msk.bf16.vlgmr.msra.gmra.mxu0 %vm1014_vm2, %v3237_v47 }
 0x9f8   : > { %6741 = vmatprep.mubr.msk.bf16.mxu0 %vm7380_vm1, %v7379_v34 }
 0xaa5   : > { %v8205_v48 = vpop.f32.mrf.mxu1 }
 0xaa7   : > { %v3399_v50 = vpop.f32.mrf.mxu1 }
 0xaa8   : > { %3563 = vrot.lane.b32.xlu1 %v3399_v50, %s7382_s14 }
 0xaa9   : > { %v6738_v16 = vpop.f32.mrf.mxu1 }
 0xaab   : > { %v8208_v51 = vpop.f32.mrf.mxu1 }
 0xaac   : > { %3569 = vrot.lane.b32.xlu1 %v3399_v50, %s7384_s29  ;;  %3565 = vrot.lane.b32.xlu0 %v8208_v51, %s7382_s14 }
 0xab0   : > { %3575 = vrot.lane.b32.xlu1 %v3399_v50, %s7381_s23  ;;  %3571 = vrot.lane.b32.xlu0 %v8208_v51, %s7384_s29 }
 0xab4   : > { %3577 = vrot.lane.b32.xlu0 %v8208_v51, %s7381_s23 }
 0xab7   : > { %v3321_v52 = vpop.f32.mrf.mxu0 }
 0xab8   : > { %v8218_v56 = vmul.f32 0.35355338, %v3321_v52 }
 0xab9   : > { %v6729_v19 = vpop.f32.mrf.mxu0 }
 0xaba   : > { %3416 = vrot.lane.b32.xlu1 %v8218_v56, %s7382_s14  ;;  %3419 = vrot.lane.b32.xlu0 %v8218_v56, %s7384_s29 }
 0xabb   : > { %v3324_v20 = vpop.f32.mrf.mxu0 }
 0xabc   : > { %v8264_v6 = vmul.f32 0.35355338, %v3324_v20 }
 0xabd   : > { %v6730_v21 = vpop.f32.mrf.mxu0 }
 0xabe   : > { %3422 = vrot.lane.b32.xlu1 %v8218_v56, %s7381_s23  ;;  %3785 = vrot.lane.b32.xlu0 %v3399_v50, %s7383_s18 }
 0xac2   : > { %3787 = vrot.lane.b32.xlu1 %v8208_v51, %s7383_s18 }
 0xb1a   : > { %v3564_v22 = vpop.permute.xlu1 %3563 }
 0xb1b   : > { %3789 = vrot.lane.b32.xlu0 %v3564_v22, %s7383_s18 }
 0xb1e   : > { %v3570_v57 = vpop.permute.xlu1 %3569  ;;  %v8230_v59 = vpop.permute.xlu0 %3565 }
 0xb1f   : > { %3793 = vrot.lane.b32.xlu0 %v3570_v57, %s7383_s18  ;;  %3791 = vrot.lane.b32.xlu1 %v8230_v59, %s7383_s18  ;;  %v3581_v15 = vcombine.low %v3399_v50, %v3570_v57  ;;  %v3582_v60 = vcombine.high %v3399_v50, %v3570_v57 }
 0xb21   : > { %v3589_v62 = vrot.slane %v3581_v15, %v7804_v58  ;;  %v3596_v63 = vrot.slane %v3582_v60, %v7804_v58 }
 0xb22   : > { %v3576_v41 = vpop.permute.xlu1 %3575  ;;  %v8235_v55 = vpop.permute.xlu0 %3571 }
 0xb23   : > { %v3597_v61 = vcombine.low %v3564_v22, %v3576_v41  ;;  %v3598_v46 = vcombine.high %v3564_v22, %v3576_v41  ;;  %3797 = vrot.lane.b32.xlu0 %v3576_v41, %s7383_s18  ;;  %3795 = vrot.lane.b32.xlu1 %v8235_v55, %s7383_s18  ;;  %v3649_v53 = vcombine.low %v8208_v51, %v8235_v55 }
 0xb25   : > { %v3605_v0 = vrot.slane %v3597_v61, %v7804_v58  ;;  %v3612_v45 = vrot.slane %v3598_v46, %v7804_v58  ;;  %v3656_v11 = vrot.slane %v3649_v53, %v7804_v58 }
 0xb26   : > { %v8246_v2 = vpop.permute.xlu0 %3577 }
 0xb27   : > { %v3613_v7 = vcombine.low %v3589_v62, %v3605_v0  ;;  %v3614_v3 = vcombine.high %v3589_v62, %v3605_v0  ;;  %v3629_v4 = vcombine.low %v3596_v63, %v3612_v45  ;;  %v3630_v5 = vcombine.high %v3596_v63, %v3612_v45  ;;  %4741 = vrot.lane.b32.xlu0 %v8205_v48, %s7382_s14 }
 0xb28   : > { %v3657_v17 = vcombine.low %v8230_v59, %v8246_v2  ;;  %3799 = vrot.lane.b32.xlu1 %v8246_v2, %s7383_s18 }
 0xb29   : > { %v3621_v18 = vrot.slane %v3613_v7, %v7806_v1  ;;  %v3628_v23 = vrot.slane %v3614_v3, %v7806_v1  ;;  %v3637_v36 = vrot.slane %v3629_v4, %v7806_v1  ;;  %v3644_v10 = vrot.slane %v3630_v5, %v7806_v1 }
 0xb2a   : > { %v3664_v13 = vrot.slane %v3657_v17, %v7804_v58 }
 0xb2b   : > { %v3683_v14 = vcombine.low %v3621_v18, %v3628_v23  ;;  %v6458_v35 = vcombine.high %v3621_v18, %v3628_v23  ;;  %v3699_v24 = vcombine.low %v3637_v36, %v3644_v10  ;;  %v6459_v25 = vcombine.high %v3637_v36, %v3644_v10  ;;  %4745 = vrot.lane.b32.xlu0 %v8205_v48, %s7381_s23 }
 0xb2c   : > { %v3665_v26 = vcombine.low %v3656_v11, %v3664_v13  ;;  %v3666_v27 = vcombine.high %v3656_v11, %v3664_v13  ;;  %4743 = vrot.lane.b32.xlu1 %v8205_v48, %s7384_s29  ;;  %v3417_v28 = vpop.permute.xlu1 %3416  ;;  %v3420_v29 = vpop.permute.xlu0 %3419 }
 0xb2d   : > { %v3690_v30 = vrot.slane %v3683_v14, %v7804_v58  ;;  %v3698_v31 = vrot.slane %v6458_v35, %v7804_v58  ;;  %v3706_v38 = vrot.slane %v3699_v24, %v7804_v58  ;;  %v3714_v44 = vrot.slane %v6459_v25, %v7804_v58 }
 0xb2e   : > { %v3673_v49 = vrot.slane %v3665_v26, %v7806_v1  ;;  %v3680_v37 = vrot.slane %v3666_v27, %v7806_v1  ;;  %v3425_v32 = vcombine.low %v8218_v56, %v3420_v29  ;;  %v3426_v33 = vcombine.high %v8218_v56, %v3420_v29 }
 0xb2f   : > { %v3715_v12 = vcombine.low %v3690_v30, %v3698_v31  ;;  %v3731_v42 = vcombine.low %v3706_v38, %v3714_v44  ;;  %v3716_v15 = vcombine.high %v3690_v30, %v3698_v31  ;;  %v3732_v0 = vcombine.high %v3706_v38, %v3714_v44 }
 0xb30   : > { %v3751_v39 = vcombine.low %v3673_v49, %v3680_v37  ;;  %v6460_v40 = vcombine.high %v3673_v49, %v3680_v37  ;;  %4595 = vrot.lane.b32.xlu1 %v8264_v6, %s7382_s14  ;;  %v3423_v8 = vpop.permute.xlu1 %3422  ;;  %v3433_v56 = vrot.slane %v3425_v32, %v7804_v58  ;;  %v3440_v20 = vrot.slane %v3426_v33, %v7804_v58 }
 0xb31   : > { %v3441_v9 = vcombine.low %v3417_v28, %v3423_v8  ;;  %v3442_v47 = vcombine.high %v3417_v28, %v3423_v8  ;;  %v3723_v50 = vrot.slane %v3715_v12, %v7806_v1  ;;  %v3739_v16 = vrot.slane %v3731_v42, %v7806_v1 }
 0xb32   : > { %v3758_v52 = vrot.slane %v3751_v39, %v7804_v58  ;;  %v3766_v19 = vrot.slane %v6460_v40, %v7804_v58  ;;  %v3730_v24 = vrot.slane %v3716_v15, %v7806_v1  ;;  %v3746_v25 = vrot.slane %v3732_v0, %v7806_v1  ;;  %v3786_v15 = vpop.permute.xlu0 %3785 }
 0xb33   : > { %v3449_v21 = vrot.slane %v3441_v9, %v7804_v58  ;;  %v3456_v22 = vrot.slane %v3442_v47, %v7804_v58  ;;  %v3747_v62 = vcombine.low %v3723_v50, %v3739_v16  ;;  %v3748_v17 = vcombine.high %v3723_v50, %v3739_v16 }
 0xb34   : > { %v3767_v57 = vcombine.low %v3758_v52, %v3766_v19  ;;  %v3768_v45 = vcombine.high %v3758_v52, %v3766_v19  ;;  %v3749_v38 = vcombine.low %v3730_v24, %v3746_v25  ;;  %v3750_v44 = vcombine.high %v3730_v24, %v3746_v25 }
 0xb35   : > { %v3457_v60 = vcombine.low %v3433_v56, %v3449_v21  ;;  %v3458_v41 = vcombine.high %v3433_v56, %v3449_v21  ;;  %v3473_v61 = vcombine.low %v3440_v20, %v3456_v22  ;;  %v3474_v46 = vcombine.high %v3440_v20, %v3456_v22 }
 0xb36   : > { %v3775_v63 = vrot.slane %v3767_v57, %v7806_v1  ;;  %v3782_v23 = vrot.slane %v3768_v45, %v7806_v1 }
 0xb37   : > { %v3465_v53 = vrot.slane %v3457_v60, %v7806_v1  ;;  %v3472_v7 = vrot.slane %v3458_v41, %v7806_v1  ;;  %v3481_v3 = vrot.slane %v3473_v61, %v7806_v1  ;;  %v3488_v4 = vrot.slane %v3474_v46, %v7806_v1  ;;  %v3788_v60 = vpop.permute.xlu1 %3787 }
 0xb38   : > { %v4017_v5 = vpack.c.bf16 %v3775_v63, %v3747_v62  ;;  %v3783_v18 = vcombine.high %v3775_v63, %v7379_v34  ;;  %v3784_v37 = vcombine.high %v3782_v23, %v7379_v34  ;;  %v4019_v42 = vpack.c.bf16 %v3782_v23, %v3749_v38 }
 0xb39   : > { %v3493_v36 = vcombine.low %v3465_v53, %v3472_v7  ;;  %v6456_v10 = vcombine.high %v3465_v53, %v3472_v7  ;;  %v3509_v11 = vcombine.low %v3481_v3, %v3488_v4  ;;  %v6457_v13 = vcombine.high %v3481_v3, %v3488_v4 }
 0xb3a   : > { %v4025_v14 = vsel %vm1518_vm3, %v4017_v5, 0  ;;  %v4018_v35 = vpack.c.bf16 %v3783_v18, %v3748_v17  ;;  %v4020_v9 = vpack.c.bf16 %v3784_v37, %v3750_v44  ;;  %v4117_v19 = vsel %vm1518_vm3, %v4019_v42, 0 }
 0xb3b   : > { %v3500_v26 = vrot.slane %v3493_v36, %v7804_v58  ;;  %v3508_v27 = vrot.slane %v6456_v10, %v7804_v58  ;;  %v3516_v28 = vrot.slane %v3509_v11, %v7804_v58  ;;  %v3524_v29 = vrot.slane %v6457_v13, %v7804_v58  ;;  %6740 = vmatpush3.bf16.xpose.msra.mxu0 %v4025_v14 }
 0xb3c   : > { %v4071_v30 = vsel %vm1518_vm3, %v4018_v35, 0  ;;  %6751 = vmatprep.subr.bf16.mxu0 %v7379_v34  ;;  %v4163_v56 = vsel %vm1518_vm3, %v4020_v9, 0 }
 0xb3d   : > { %v3525_v31 = vcombine.low %v3500_v26, %v3508_v27  ;;  %v3541_v49 = vcombine.low %v3516_v28, %v3524_v29  ;;  %6746 = vmatpush3.bf16.xpose.msra.mxu1 %v4071_v30  ;;  %v3526_v32 = vcombine.high %v3500_v26, %v3508_v27  ;;  %v3542_v33 = vcombine.high %v3516_v28, %v3524_v29 }
 0xb3e   : > { %6757 = vmatprep.subr.bf16.mxu1 %v7379_v34 }
 0xb3f   : > { %v3533_v12 = vrot.slane %v3525_v31, %v7806_v1  ;;  %v3549_v39 = vrot.slane %v3541_v49, %v7806_v1  ;;  %v3540_v16 = vrot.slane %v3526_v32, %v7806_v1  ;;  %v3556_v52 = vrot.slane %v3542_v33, %v7806_v1 }
 0xb41   : > { %v3557_v40 = vcombine.low %v3533_v12, %v3549_v39  ;;  %v3558_v8 = vcombine.high %v3533_v12, %v3549_v39  ;;  %v3559_v20 = vcombine.low %v3540_v16, %v3556_v52  ;;  %v3560_v21 = vcombine.high %v3540_v16, %v3556_v52 }
 0xb43   : > { %v4013_v47 = vpack.c.bf16 %v3557_v40, %v3557_v40  ;;  %v4014_v50 = vpack.c.bf16 %v3558_v8, %v3558_v8  ;;  %v4015_v22 = vpack.c.bf16 %v3559_v20, %v3559_v20  ;;  %v4016_v57 = vpack.c.bf16 %v3560_v21, %v3560_v21 }
 0xb45   : > { %6742 = vmatmul.mubr.msk.bf16.vlgmr.msra.gmra.mxu0 %vm1518_vm3, %v4013_v47  ;;  %6748 = vmatmul.mubr.msk.bf16.vlgmr.msra.gmra.mxu1 %vm1518_vm3, %v4014_v50 }
 0xb46   : > { %6752 = vmatpush3.bf16.xpose.msra.mxu0 %v4117_v19  ;;  %6758 = vmatpush3.bf16.xpose.msra.mxu1 %v4163_v56 }
 0xb47   : > { %6753 = vmatprep.mubr.msk.bf16.mxu0 %vm7380_vm1, %v7379_v34  ;;  %6759 = vmatprep.mubr.msk.bf16.mxu1 %vm7380_vm1, %v7379_v34 }
 0xb48   : > { %6763 = vmatprep.subr.bf16.mxu0 %v7379_v34  ;;  %6769 = vmatprep.subr.bf16.mxu1 %v7379_v34 }
 0xb4d   : > { %6754 = vmatmul.mubr.msk.bf16.vlgmr.msra.gmra.mxu0 %vm1518_vm3, %v4015_v22  ;;  %6760 = vmatmul.mubr.msk.bf16.vlgmr.msra.gmra.mxu1 %vm1518_vm3, %v4016_v57 }
 0xb4e   : > { %6765 = vmatprep.mubr.msk.bf16.mxu0 %vm7380_vm1, %v7379_v34  ;;  %6771 = vmatprep.mubr.msk.bf16.mxu1 %vm7380_vm1, %v7379_v34 }
 0xb8d   : > { %v3790_v41 = vpop.permute.xlu0 %3789 }
 0xb91   : > { %v3792_v61 = vpop.permute.xlu1 %3791  ;;  %v3794_v46 = vpop.permute.xlu0 %3793 }
 0xb92   : > { %v3809_v62 = vcombine.low %v3786_v15, %v3794_v46  ;;  %v3810_v63 = vcombine.high %v3786_v15, %v3794_v46 }
 0xb94   : > { %v3817_v3 = vrot.slane %v3809_v62, %v7804_v58  ;;  %v3824_v4 = vrot.slane %v3810_v63, %v7804_v58 }
 0xb95   : > { %v3796_v0 = vpop.permute.xlu1 %3795  ;;  %v3798_v45 = vpop.permute.xlu0 %3797 }
 0xb96   : > { %v3825_v53 = vcombine.low %v3790_v41, %v3798_v45  ;;  %v3826_v7 = vcombine.high %v3790_v41, %v3798_v45  ;;  %v3877_v18 = vcombine.low %v3788_v60, %v3796_v0 }
 0xb98   : > { %v3833_v5 = vrot.slane %v3825_v53, %v7804_v58  ;;  %v3840_v17 = vrot.slane %v3826_v7, %v7804_v58  ;;  %v3884_v27 = vrot.slane %v3877_v18, %v7804_v58 }
 0xb9a   : > { %v3841_v23 = vcombine.low %v3817_v3, %v3833_v5  ;;  %v3842_v36 = vcombine.high %v3817_v3, %v3833_v5  ;;  %v3857_v10 = vcombine.low %v3824_v4, %v3840_v17  ;;  %v3858_v11 = vcombine.high %v3824_v4, %v3840_v17  ;;  %v3800_v13 = vpop.permute.xlu1 %3799 }
 0xb9b   : > { %v3885_v14 = vcombine.low %v3792_v61, %v3800_v13 }
 0xb9c   : > { %v3849_v35 = vrot.slane %v3841_v23, %v7806_v1  ;;  %v3856_v24 = vrot.slane %v3842_v36, %v7806_v1  ;;  %v3865_v25 = vrot.slane %v3857_v10, %v7806_v1  ;;  %v3872_v26 = vrot.slane %v3858_v11, %v7806_v1 }
 0xb9d   : > { %v3892_v28 = vrot.slane %v3885_v14, %v7804_v58 }
 0xb9e   : > { %v3911_v29 = vcombine.low %v3849_v35, %v3856_v24  ;;  %v6461_v30 = vcombine.high %v3849_v35, %v3856_v24  ;;  %v3927_v31 = vcombine.low %v3865_v25, %v3872_v26  ;;  %v6462_v49 = vcombine.high %v3865_v25, %v3872_v26 }
 0xb9f   : > { %v3893_v37 = vcombine.low %v3884_v27, %v3892_v28  ;;  %v3894_v38 = vcombine.high %v3884_v27, %v3892_v28 }
 0xba0   : > { %v3918_v44 = vrot.slane %v3911_v29, %v7804_v58  ;;  %v3926_v32 = vrot.slane %v6461_v30, %v7804_v58  ;;  %v3934_v33 = vrot.slane %v3927_v31, %v7804_v58  ;;  %v3942_v12 = vrot.slane %v6462_v49, %v7804_v58 }
 0xba1   : > { %v3901_v39 = vrot.slane %v3893_v37, %v7806_v1  ;;  %v3908_v40 = vrot.slane %v3894_v38, %v7806_v1 }
 0xba2   : > { %v3943_v8 = vcombine.low %v3918_v44, %v3926_v32  ;;  %v3959_v42 = vcombine.low %v3934_v33, %v3942_v12  ;;  %v3944_v20 = vcombine.high %v3918_v44, %v3926_v32  ;;  %v3960_v21 = vcombine.high %v3934_v33, %v3942_v12  ;;  %v4742_v33 = vpop.permute.xlu0 %4741 }
 0xba3   : > { %v3979_v9 = vcombine.low %v3901_v39, %v3908_v40  ;;  %v6463_v47 = vcombine.high %v3901_v39, %v3908_v40  ;;  %v4748_v32 = vrot.slane %v8205_v48, 4  ;;  %v4747_v12 = vrot.slane %v8208_v51, 4  ;;  %v4744_v40 = vpop.permute.xlu1 %4743 }
 0xba4   : > { %v3951_v52 = vrot.slane %v3943_v8, %v7806_v1  ;;  %v3967_v19 = vrot.slane %v3959_v42, %v7806_v1  ;;  %v3958_v60 = vrot.slane %v3944_v20, %v7806_v1  ;;  %v3974_v41 = vrot.slane %v3960_v21, %v7806_v1 }
 0xba5   : > { %v3986_v50 = vrot.slane %v3979_v9, %v7804_v58  ;;  %v3994_v16 = vrot.slane %v6463_v47, %v7804_v58  ;;  %v4751_v39 = vrot.slane %v4742_v33, 4  ;;  %v4749_v8 = vsel %vm1750_vm4, %v4747_v12, %v4748_v32 }
 0xba6   : > { %v3975_v57 = vcombine.low %v3951_v52, %v3967_v19  ;;  %v3976_v62 = vcombine.high %v3951_v52, %v3967_v19  ;;  %v3977_v0 = vcombine.low %v3958_v60, %v3974_v41  ;;  %v3978_v45 = vcombine.high %v3958_v60, %v3974_v41 }
 0xba7   : > { %v3995_v56 = vcombine.low %v3986_v50, %v3994_v16  ;;  %v3996_v22 = vcombine.high %v3986_v50, %v3994_v16  ;;  %v4750_v42 = vrot.slane %v8230_v59, 4  ;;  %v4754_v9 = vrot.slane %v4744_v40, 4  ;;  %v4746_v50 = vpop.permute.xlu0 %4745 }
 0xba8   : > { %v4753_v51 = vrot.slane %v8235_v55, 4  ;;  %v8389_v16 = vrot.slane %v4746_v50, 4  ;;  %v4756_v52 = vrot.slane %v8246_v2, 4 }
 0xba9   : > { %v4003_v15 = vrot.slane %v3995_v56, %v7806_v1  ;;  %v4010_v61 = vrot.slane %v3996_v22, %v7806_v1  ;;  %v4752_v48 = vsel %vm1750_vm4, %v4750_v42, %v4751_v39  ;;  %v4835_v56 = vcombine.low %v4748_v32, %v4754_v9 }
 0xbaa   : > { %v4755_v47 = vsel %vm1750_vm4, %v4753_v51, %v4754_v9  ;;  %v8394_v59 = vsel %vm1750_vm4, %v4756_v52, %v8389_v16  ;;  %v4843_v19 = vcombine.low %v4751_v39, %v8389_v16 }
 0xbab   : > { %v4246_v46 = vpack.c.bf16 %v4003_v15, %v3975_v57  ;;  %v4011_v63 = vcombine.high %v4003_v15, %v7379_v34  ;;  %v8348_v3 = vpack.c.bf16 %v4010_v61, %v3977_v0  ;;  %v4012_v4 = vcombine.high %v4010_v61, %v7379_v34 }
 0xbac   : > { %v4783_v20 = vcombine.low %v4752_v48, %v8394_v59  ;;  %v4767_v21 = vcombine.low %v4749_v8, %v4755_v47  ;;  %v4784_v55 = vcombine.high %v4752_v48, %v8394_v59  ;;  %v4768_v22 = vcombine.high %v4749_v8, %v4755_v47 }
 0xbad   : > { %v4255_v53 = vsel %vm4253_vm7, %v4246_v46, 0  ;;  %v4247_v7 = vpack.c.bf16 %v4011_v63, %v3976_v62  ;;  %v8353_v17 = vpack.c.bf16 %v4012_v4, %v3978_v45  ;;  %v4850_v57 = vrot.slane %v4843_v19, %v7804_v58  ;;  %v4596_v45 = vpop.permute.xlu1 %4595 }
 0xbae   : > { %6764 = vmatpush3.bf16.msra.mxu0 %v4255_v53  ;;  %v4842_v15 = vrot.slane %v4835_v56, %v7804_v58  ;;  %v4791_v60 = vrot.slane %v4783_v20, %v7804_v58  ;;  %v4775_v2 = vrot.slane %v4767_v21, %v7804_v58  ;;  %v4798_v41 = vrot.slane %v4784_v55, %v7804_v58 }
 0xbaf   : > { %v4301_v5 = vsel %vm4253_vm7, %v4247_v7, 0  ;;  %6775 = vmatprep.subr.bf16.mxu0 %v7379_v34  ;;  %v4782_v61 = vrot.slane %v4768_v22, %v7804_v58 }
 0xbb0   : > { %6770 = vmatpush3.bf16.msra.mxu1 %v4301_v5  ;;  %v4851_v46 = vcombine.low %v4842_v15, %v4850_v57  ;;  %v4852_v62 = vcombine.high %v4842_v15, %v4850_v57  ;;  %v4799_v63 = vcombine.low %v4775_v2, %v4791_v60  ;;  %v4800_v0 = vcombine.high %v4775_v2, %v4791_v60 }
 0xbb1   : > { %6781 = vmatprep.subr.bf16.mxu1 %v7379_v34  ;;  %v4815_v53 = vcombine.low %v4782_v61, %v4798_v41  ;;  %v4816_v7 = vcombine.high %v4782_v61, %v4798_v41 }
 0xbb2   : > { %v4859_v4 = vrot.slane %v4851_v46, %v7806_v1  ;;  %v4866_v5 = vrot.slane %v4852_v62, %v7806_v1 }
 0xc05   : > { %v8356_v18 = vpop.f32.mrf.mxu0  ;;  %v8358_v23 = vpop.f32.mrf.mxu1 }
 0xc06   : > { %v4209_v36 = vsel %vm4205_vm8, %v8358_v23, -inf  ;;  %v4206_v10 = vsel %vm4205_vm8, %v8356_v18, -inf }
 0xc07   : > { %4210 = vmax.xlane.f32.xlu1 %v4209_v36  ;;  %v6749_v11 = vpop.f32.mrf.mxu1  ;;  %4207 = vmax.xlane.f32.xlu0 %v4206_v10  ;;  %v6743_v13 = vpop.f32.mrf.mxu0  ;;  %v4807_v36 = vrot.slane %v4799_v63, %v7806_v1  ;;  %v4814_v10 = vrot.slane %v4800_v0, %v7806_v1  ;;  %v4393_v0 = vsel %vm4253_vm7, %v8353_v17, 0 }
 0xc08   : > { %v4823_v11 = vrot.slane %v4815_v53, %v7806_v1  ;;  %v4830_v13 = vrot.slane %v4816_v7, %v7806_v1 }
 0xc09   : > { %v4064_v14 = vpop.f32.mrf.mxu0  ;;  %v4110_v35 = vpop.f32.mrf.mxu1 }
 0xc0b   : > { %v6744_v24 = vpop.f32.mrf.mxu0  ;;  %v6750_v25 = vpop.f32.mrf.mxu1 }
 0xc0d   : > { %v8364_v26 = vpop.f32.mrf.mxu0  ;;  %v8366_v27 = vpop.f32.mrf.mxu1 }
 0xc0e   : > { %v4215_v28 = vsel %vm4205_vm8, %v8366_v27, -inf  ;;  %v4212_v29 = vsel %vm4205_vm8, %v8364_v26, -inf }
 0xc0f   : > { %4216 = vmax.xlane.f32.xlu1 %v4215_v28  ;;  %v6761_v30 = vpop.f32.mrf.mxu1  ;;  %4213 = vmax.xlane.f32.xlu0 %v4212_v29  ;;  %v6755_v31 = vpop.f32.mrf.mxu0  ;;  %v4869_v28 = vcombine.low %v4807_v36, %v4814_v10 }
 0xc10   : > { %v4937_v31 = vcombine.low %v4859_v4, %v4866_v5 }
 0xc11   : > { %v4156_v49 = vpop.f32.mrf.mxu0  ;;  %v4202_v37 = vpop.f32.mrf.mxu1 }
 0xc12   : > { %v6476_v49 = vcombine.high %v4807_v36, %v4814_v10  ;;  %v4885_v37 = vcombine.low %v4823_v11, %v4830_v13  ;;  %v8417_v33 = vrot.slane %v4937_v31, %v7804_v58 }
 0xc13   : > { %v6756_v38 = vpop.f32.mrf.mxu0  ;;  %v6762_v44 = vpop.f32.mrf.mxu1 }
 0xc14   : > { %v6477_v38 = vcombine.high %v4823_v11, %v4830_v13  ;;  %v6478_v44 = vcombine.high %v4859_v4, %v4866_v5 }
 0xc16   : > { %v8424_v40 = vrot.slane %v6477_v38, %v7804_v58 }
 0xc20   : > { %4601 = vrot.lane.b32.xlu1 %v8264_v6, %s7381_s23 }
 0xc24   : > { %4973 = vrot.lane.b32.xlu1 %v4748_v32, %s7383_s18  ;;  %v8414_v32 = vrot.slane %v4869_v28, %v7804_v58 }
 0xc25   : > { %4598 = vrot.lane.b32.xlu0 %v8264_v6, %s7384_s29 }
 0xc28   : > { %4977 = vrot.lane.b32.xlu1 %v4751_v39, %s7383_s18  ;;  %v8421_v39 = vrot.slane %v4885_v37, %v7804_v58 }
 0xc29   : > { %4971 = vrot.lane.b32.xlu0 %v4749_v8, %s7383_s18  ;;  %v8427_v8 = vrot.slane %v6478_v44, %v7804_v58 }
 0xc2a   : > { %v4917_v19 = vcombine.low %v8421_v39, %v8424_v40  ;;  %v4918_v13 = vcombine.high %v8421_v39, %v8424_v40 }
 0xc2b   : > { %v4953_v56 = vcombine.low %v8417_v33, %v8427_v8  ;;  %v4954_v36 = vcombine.high %v8417_v33, %v8427_v8 }
 0xc2c   : > { %4981 = vrot.lane.b32.xlu1 %v4754_v9, %s7383_s18  ;;  %v4925_v61 = vrot.slane %v4917_v19, %v7806_v1 }
 0xc2d   : > { %4975 = vrot.lane.b32.xlu0 %v4752_v48, %s7383_s18  ;;  %v4961_v46 = vrot.slane %v4953_v56, %v7806_v1 }
 0xc31   : > { %4979 = vrot.lane.b32.xlu0 %v4755_v47, %s7383_s18 }
 0xc90   : > { %v4211_v14 = vpop.xlane.xlu1 %4210  ;;  %v4208_v35 = vpop.xlane.xlu0 %4207 }
 0xc91   : > { %v4219_v24 = vsub.f32 %v8358_v23, %v4211_v14  ;;  %v4218_v25 = vsub.f32 %v8356_v18, %v4208_v35  ;;  %v4884_v18 = vrot.slane %v6476_v49, %v7804_v58 }
 0xc93   : > { %v4224_v29 = vmul.f32 1.442695, %v4219_v24  ;;  %v4222_v30 = vmul.f32 1.442695, %v4218_v25  ;;  %v4901_v52 = vcombine.low %v8414_v32, %v4884_v18  ;;  %v4969_v25 = vcombine.high %v4961_v46, %v7379_v34 }
 0xc95   : > { %7095 = vpow2.f32 %v4224_v29  ;;  %v4909_v60 = vrot.slane %v4901_v52, %v7806_v1 }
 0xc96   : > { %7097 = vpow2.f32 %v4222_v30  ;;  %v4347_v30 = vsel %vm4253_vm7, %v8348_v3, 0 }
 0xc97   : > { %v4934_v24 = vcombine.high %v4909_v60, %v4925_v61  ;;  %v4933_v31 = vcombine.low %v4909_v60, %v4925_v61 }
 0xc98   : > { %v4217_v12 = vpop.xlane.xlu1 %4216  ;;  %v4214_v23 = vpop.xlane.xlu0 %4213 }
 0xc99   : > { %v4221_v42 = vsub.f32 %v8366_v27, %v4217_v12  ;;  %v4220_v9 = vsub.f32 %v8364_v26, %v4214_v23  ;;  %v5204_v33 = vpack.c.bf16 %v4969_v25, %v4934_v24  ;;  %v4932_v12 = vrot.slane %v4918_v13, %v7806_v1 }
 0xc9a   : > { %v4968_v23 = vrot.slane %v4954_v36, %v7806_v1  ;;  %v5203_v40 = vpack.c.bf16 %v4961_v46, %v4933_v31 }
 0xc9b   : > { %v4228_v48 = vmul.f32 1.442695, %v4221_v42  ;;  %v4226_v51 = vmul.f32 1.442695, %v4220_v9 }
 0xc9c   : > { %v4602_v47 = vpop.permute.xlu1 %4601  ;;  %v4599_v50 = vpop.permute.xlu0 %4598  ;;  %v4970_v52 = vcombine.high %v4968_v23, %v7379_v34  ;;  %v5211_v19 = vsel %vm1518_vm3, %v5203_v40, 0 }
 0xc9d   : > { %7099 = vpow2.f32 %v4228_v48  ;;  %v4620_v20 = vcombine.low %v4596_v45, %v4602_v47  ;;  %v4621_v21 = vcombine.high %v4596_v45, %v4602_v47  ;;  %v4604_v55 = vcombine.low %v8264_v6, %v4599_v50 }
 0xc9e   : > { %7101 = vpow2.f32 %v4226_v51  ;;  %v4605_v26 = vcombine.high %v8264_v6, %v4599_v50  ;;  %v4902_v45 = vcombine.high %v8414_v32, %v4884_v18  ;;  %v5257_v47 = vsel %vm1518_vm3, %v5204_v33, 0 }
 0xc9f   : > { %v4628_v27 = vrot.slane %v4620_v20, %v7804_v58  ;;  %v4635_v22 = vrot.slane %v4621_v21, %v7804_v58  ;;  %v4612_v57 = vrot.slane %v4604_v55, %v7804_v58 }
 0xca0   : > { %v4619_v15 = vrot.slane %v4605_v26, %v7804_v58  ;;  %v4916_v3 = vrot.slane %v4902_v45, %v7806_v1 }
 0xca1   : > { %v4636_v2 = vcombine.low %v4612_v57, %v4628_v27  ;;  %v4637_v41 = vcombine.high %v4612_v57, %v4628_v27 }
 0xca2   : > { %v8445_v62 = vpop.eup %7095  ;;  %v4652_v63 = vcombine.low %v4619_v15, %v4635_v22  ;;  %v4653_v6 = vcombine.high %v4619_v15, %v4635_v22  ;;  %v4936_v50 = vcombine.high %v4916_v3, %v4932_v12  ;;  %v4935_v56 = vcombine.low %v4916_v3, %v4932_v12 }
 0xca3   : > { %v8450_v53 = vpop.eup %7097  ;;  %v4644_v7 = vrot.slane %v4636_v2, %v7806_v1  ;;  %v4651_v4 = vrot.slane %v4637_v41, %v7806_v1  ;;  %v4243_v5 = vpack.c.bf16 %v8445_v62, %v8445_v62 }
 0xca4   : > { %v4660_v10 = vrot.slane %v4652_v63, %v7806_v1  ;;  %v4667_v11 = vrot.slane %v4653_v6, %v7806_v1  ;;  %v4242_v17 = vpack.c.bf16 %v8450_v53, %v8450_v53  ;;  %v5206_v27 = vpack.c.bf16 %v4970_v52, %v4936_v50 }
 0xca5   : > { %v4672_v14 = vcombine.low %v4644_v7, %v4651_v4  ;;  %v6474_v35 = vcombine.high %v4644_v7, %v4651_v4  ;;  %6772 = vmatmul.mubr.msk.bf16.vlgmr.msra.gmra.mxu1 %vm4205_vm8, %v4243_v5  ;;  %v5205_v22 = vpack.c.bf16 %v4968_v23, %v4935_v56 }
 0xca6   : > { %v4688_v28 = vcombine.low %v4660_v10, %v4667_v11  ;;  %v6475_v29 = vcombine.high %v4660_v10, %v4667_v11  ;;  %6766 = vmatmul.mubr.msk.bf16.vlgmr.msra.gmra.mxu0 %vm4205_vm8, %v4242_v17  ;;  %6782 = vmatpush3.bf16.msra.mxu1 %v4393_v0  ;;  %v5349_v41 = vsel %vm1518_vm3, %v5206_v27, 0 }
 0xca7   : > { %v4679_v49 = vrot.slane %v4672_v14, %v7804_v58  ;;  %v4687_v37 = vrot.slane %v6474_v35, %v7804_v58  ;;  %6776 = vmatpush3.bf16.msra.mxu0 %v4347_v30  ;;  %6777 = vmatprep.mubr.msk.bf16.mxu0 %vm7380_vm1, %v7379_v34  ;;  %v5303_v61 = vsel %vm1518_vm3, %v5205_v22, 0 }
 0xca8   : > { %v4695_v38 = vrot.slane %v4688_v28, %v7804_v58  ;;  %v4703_v44 = vrot.slane %v6475_v29, %v7804_v58  ;;  %6783 = vmatprep.mubr.msk.bf16.mxu1 %vm7380_vm1, %v7379_v34  ;;  %6787 = vmatprep.subr.bf16.mxu0 %v7379_v34 }
 0xca9   : > { %v4704_v32 = vcombine.low %v4679_v49, %v4687_v37  ;;  %6793 = vmatprep.subr.bf16.mxu1 %v7379_v34  ;;  %v4705_v20 = vcombine.high %v4679_v49, %v4687_v37 }
 0xcaa   : > { %v8482_v18 = vpop.eup %7099  ;;  %v4720_v39 = vcombine.low %v4695_v38, %v4703_v44  ;;  %v4721_v21 = vcombine.high %v4695_v38, %v4703_v44 }
 0xcab   : > { %v8484_v8 = vpop.eup %7101  ;;  %v4245_v42 = vpack.c.bf16 %v8482_v18, %v8482_v18  ;;  %v4712_v9 = vrot.slane %v4704_v32, %v7806_v1  ;;  %v4719_v15 = vrot.slane %v4705_v20, %v7806_v1  ;;  %v4230_v20 = vsel %vm4205_vm8, %v8450_v53, 0.0 }
 0xcac   : > { %v4244_v48 = vpack.c.bf16 %v8484_v8, %v8484_v8  ;;  %v4728_v51 = vrot.slane %v4720_v39, %v7806_v1  ;;  %v4735_v60 = vrot.slane %v4721_v21, %v7806_v1  ;;  %v4236_v56 = vsel %vm4205_vm8, %v8484_v8, 0.0  ;;  %v4974_v21 = vpop.permute.xlu1 %4973 }
 0xcad   : > { %6784 = vmatmul.mubr.msk.bf16.vlgmr.msra.gmra.mxu1 %vm4205_vm8, %v4245_v42 }
 0xcae   : > { %6778 = vmatmul.mubr.msk.bf16.vlgmr.msra.gmra.mxu0 %vm4205_vm8, %v4244_v48  ;;  %6794 = vmatpush3.bf16.xpose.msra.mxu1 %v5257_v47  ;;  %v4737_v55 = vcombine.high %v4712_v9, %v4728_v51  ;;  %v4736_v26 = vcombine.low %v4712_v9, %v4728_v51  ;;  %v4739_v46 = vcombine.high %v4719_v15, %v4735_v60 }
 0xcaf   : > { %6788 = vmatpush3.bf16.xpose.msra.mxu0 %v5211_v19  ;;  %6789 = vmatprep.mubr.msk.bf16.mxu0 %vm7380_vm1, %v7379_v34  ;;  %v4738_v63 = vcombine.low %v4719_v15, %v4735_v60 }
 0xcb0   : > { %6795 = vmatprep.mubr.msk.bf16.mxu1 %vm7380_vm1, %v7379_v34  ;;  %6799 = vmatprep.subr.bf16.mxu0 %v7379_v34  ;;  %v5200_v57 = vpack.c.bf16 %v4737_v55, %v4737_v55  ;;  %v5199_v2 = vpack.c.bf16 %v4736_v26, %v4736_v26  ;;  %v5202_v6 = vpack.c.bf16 %v4739_v46, %v4739_v46  ;;  %v4972_v55 = vpop.permute.xlu0 %4971  ;;  %v4978_v26 = vpop.permute.xlu1 %4977 }
 0xcb1   : > { %6805 = vmatprep.subr.bf16.mxu1 %v7379_v34  ;;  %v5201_v0 = vpack.c.bf16 %v4738_v63, %v4738_v63 }
 0xcb4   : > { %v4976_v27 = vpop.permute.xlu0 %4975  ;;  %v4982_v22 = vpop.permute.xlu1 %4981 }
 0xcb5   : > { %6796 = vmatmul.mubr.msk.bf16.vlgmr.msra.gmra.mxu1 %vm1518_vm3, %v5200_v57  ;;  %v5063_v53 = vcombine.low %v4974_v21, %v4982_v22 }
 0xcb6   : > { %6790 = vmatmul.mubr.msk.bf16.vlgmr.msra.gmra.mxu0 %vm1518_vm3, %v5199_v2  ;;  %6806 = vmatpush3.bf16.xpose.msra.mxu1 %v5349_v41 }
 0xcb7   : > { %6800 = vmatpush3.bf16.xpose.msra.mxu0 %v5303_v61  ;;  %6801 = vmatprep.mubr.msk.bf16.mxu0 %vm7380_vm1, %v7379_v34 }
 0xcb8   : > { %6807 = vmatprep.mubr.msk.bf16.mxu1 %vm7380_vm1, %v7379_v34  ;;  %6811 = vmatprep.subr.bf16.mxu0 %v7379_v34  ;;  %v4980_v57 = vpop.permute.xlu0 %4979 }
 0xcb9   : > { %6817 = vmatprep.subr.bf16.mxu1 %v7379_v34  ;;  %v4995_v61 = vcombine.low %v4972_v55, %v4980_v57  ;;  %v4996_v46 = vcombine.high %v4972_v55, %v4980_v57 }
 0xcbd   : > { %6808 = vmatmul.mubr.msk.bf16.vlgmr.msra.gmra.mxu1 %vm1518_vm3, %v5202_v6 }
 0xcbe   : > { %6802 = vmatmul.mubr.msk.bf16.vlgmr.msra.gmra.mxu0 %vm1518_vm3, %v5201_v0  ;;  %6819 = vmatprep.mubr.msk.bf16.mxu1 %vm7380_vm1, %v7379_v34 }
 0xcbf   : > { %6813 = vmatprep.mubr.msk.bf16.mxu0 %vm7380_vm1, %v7379_v34 }
 0xd65   : > { %v8521_v45 = vpop.f32.mrf.mxu1 }
 0xd66   : > { %v8523_v7 = vpop.f32.mrf.mxu0 }
 0xd67   : > { %v6773_v4 = vpop.f32.mrf.mxu1 }
 0xd68   : > { %v6767_v5 = vpop.f32.mrf.mxu0 }
 0xd69   : > { %v4340_v36 = vpop.f32.mrf.mxu1  ;;  %v5070_v5 = vrot.slane %v5063_v53, %v7804_v58 }
 0xd6a   : > { %v4294_v10 = vpop.f32.mrf.mxu0 }
 0xd6b   : > { %v6774_v11 = vpop.f32.mrf.mxu1  ;;  %v5003_v10 = vrot.slane %v4995_v61, %v7804_v58 }
 0xd6c   : > { %v6768_v17 = vpop.f32.mrf.mxu0  ;;  %v5010_v11 = vrot.slane %v4996_v46, %v7804_v58 }
 0xd6d   : > { %v8525_v13 = vpop.f32.mrf.mxu1 }
 0xd6e   : > { %v8527_v14 = vpop.f32.mrf.mxu0 }
 0xd6f   : > { %v6785_v35 = vpop.f32.mrf.mxu1 }
 0xd70   : > { %v6779_v24 = vpop.f32.mrf.mxu0 }
 0xd71   : > { %v4432_v25 = vpop.f32.mrf.mxu1 }
 0xd72   : > { %v4386_v28 = vpop.f32.mrf.mxu0 }
 0xd73   : > { %v6786_v29 = vpop.f32.mrf.mxu1 }
 0xd74   : > { %v6780_v30 = vpop.f32.mrf.mxu0 }
 0xd75   : > { %v5293_v31 = vpop.f32.mrf.mxu1 }
 0xd76   : > { %v5247_v49 = vpop.f32.mrf.mxu0  ;;  %v5394_v37 = vsel %vm4205_vm8, %v5293_v31, -inf }
 0xd77   : > { %5395 = vmax.xlane.f32.xlu1 %v5394_v37  ;;  %v6797_v38 = vpop.f32.mrf.mxu1  ;;  %v5391_v44 = vsel %vm4205_vm8, %v5247_v49, -inf }
 0xd78   : > { %5392 = vmax.xlane.f32.xlu0 %v5391_v44  ;;  %v6791_v3 = vpop.f32.mrf.mxu0 }
 0xd79   : > { %v5296_v32 = vpop.f32.mrf.mxu1 }
 0xd7a   : > { %v5250_v33 = vpop.f32.mrf.mxu0 }
 0xd7b   : > { %v6798_v12 = vpop.f32.mrf.mxu1 }
 0xd7c   : > { %v6792_v23 = vpop.f32.mrf.mxu0 }
 0xd7d   : > { %v8531_v39 = vpop.f32.mrf.mxu1 }
 0xd7e   : > { %v8533_v40 = vpop.f32.mrf.mxu0  ;;  %v5400_v52 = vsel %vm4205_vm8, %v8531_v39, -inf }
 0xd7f   : > { %v6809_v42 = vpop.f32.mrf.mxu1  ;;  %v5397_v19 = vsel %vm4205_vm8, %v8533_v40, -inf }
 0xd80   : > { %v6803_v9 = vpop.f32.mrf.mxu0 }
 0xd81   : > { %v5388_v48 = vpop.f32.mrf.mxu1 }
 0xd82   : > { %v5342_v51 = vpop.f32.mrf.mxu0 }
 0xd83   : > { %v6810_v47 = vpop.f32.mrf.mxu1 }
 0xd84   : > { %v6804_v50 = vpop.f32.mrf.mxu0 }
 0xd88   : > { %4985 = vrot.lane.b32.xlu1 %v8389_v16, %s7383_s18  ;;  %v4233_v16 = vsel %vm4205_vm8, %v8445_v62, 0.0 }
 0xd8e   : > { %4983 = vrot.lane.b32.xlu0 %v8394_v59, %s7383_s18  ;;  %v4239_v59 = vsel %vm4205_vm8, %v8482_v18, 0.0  ;;  %s8926_s18 = sld [smem:[#allocation43_spill]] }
 0xd94   : > { %s8927_s29 = scalar_lea.vmem %s8926_s18, %s7679_s15 }
 0xdac   : > { %5401 = vmax.xlane.f32.xlu1 %v5400_v52 }
 0xdad   : > { %5398 = vmax.xlane.f32.xlu0 %v5397_v19 }
 0xdb0   : > { %4237 = vadd.xlane.f32.xlu1 %v4236_v56 }
 0xdb1   : > { %4231 = vadd.xlane.f32.xlu0 %v4230_v20 }
 0xdb5   : > { %4234 = vadd.xlane.f32.xlu0 %v4233_v16 }
 0xdb9   : > { %4240 = vadd.xlane.f32.xlu0 %v4239_v59 }
 0xe00   : > { %v5396_v8 = vpop.xlane.xlu1 %5395 }
 0xe01   : > { %v5404_v15 = vsub.f32 %v5293_v31, %v5396_v8  ;;  %v5393_v60 = vpop.xlane.xlu0 %5392 }
 0xe02   : > { %v5403_v2 = vsub.f32 %v5247_v49, %v5393_v60 }
 0xe03   : > { %v5409_v41 = vmul.f32 1.442695, %v5404_v15 }
 0xe04   : > { %v5407_v62 = vmul.f32 1.442695, %v5403_v2  ;;  %v4986_v63 = vpop.permute.xlu1 %4985 }
 0xe05   : > { %7103 = vpow2.f32 %v5409_v41  ;;  %v5071_v6 = vcombine.low %v4978_v26, %v4986_v63  ;;  %v4984_v18 = vpop.permute.xlu0 %4983 }
 0xe06   : > { %7105 = vpow2.f32 %v5407_v62  ;;  %v5011_v0 = vcombine.low %v4976_v27, %v4984_v18  ;;  %v5012_v4 = vcombine.high %v4976_v27, %v4984_v18 }
 0xe07   : > { %v5078_v36 = vrot.slane %v5071_v6, %v7804_v58 }
 0xe08   : > { %v5019_v17 = vrot.slane %v5011_v0, %v7804_v58  ;;  %v5026_v35 = vrot.slane %v5012_v4, %v7804_v58 }
 0xe09   : > { %v5079_v24 = vcombine.low %v5070_v5, %v5078_v36  ;;  %v5080_v25 = vcombine.high %v5070_v5, %v5078_v36 }
 0xe0a   : > { %v5027_v28 = vcombine.low %v5003_v10, %v5019_v17  ;;  %v5028_v29 = vcombine.high %v5003_v10, %v5019_v17  ;;  %v5043_v30 = vcombine.low %v5010_v11, %v5026_v35  ;;  %v5044_v31 = vcombine.high %v5010_v11, %v5026_v35 }
 0xe0b   : > { %v5087_v49 = vrot.slane %v5079_v24, %v7806_v1  ;;  %v5094_v37 = vrot.slane %v5080_v25, %v7806_v1 }
 0xe0c   : > { %v5035_v38 = vrot.slane %v5027_v28, %v7806_v1  ;;  %v5042_v44 = vrot.slane %v5028_v29, %v7806_v1  ;;  %v5051_v3 = vrot.slane %v5043_v30, %v7806_v1  ;;  %v5058_v32 = vrot.slane %v5044_v31, %v7806_v1 }
 0xe0d   : > { %v5165_v33 = vcombine.low %v5087_v49, %v5094_v37  ;;  %v6481_v12 = vcombine.high %v5087_v49, %v5094_v37 }
 0xe0e   : > { %v5097_v23 = vcombine.low %v5035_v38, %v5042_v44  ;;  %v6479_v42 = vcombine.high %v5035_v38, %v5042_v44  ;;  %v5113_v9 = vcombine.low %v5051_v3, %v5058_v32  ;;  %v6480_v48 = vcombine.high %v5051_v3, %v5058_v32 }
 0xe0f   : > { %v5172_v51 = vrot.slane %v5165_v33, %v7804_v58  ;;  %v5180_v47 = vrot.slane %v6481_v12, %v7804_v58 }
 0xe10   : > { %v5104_v50 = vrot.slane %v5097_v23, %v7804_v58  ;;  %v5112_v52 = vrot.slane %v6479_v42, %v7804_v58  ;;  %v5120_v19 = vrot.slane %v5113_v9, %v7804_v58  ;;  %v5128_v56 = vrot.slane %v6480_v48, %v7804_v58 }
 0xe11   : > { %v5181_v20 = vcombine.low %v5172_v51, %v5180_v47  ;;  %v5182_v16 = vcombine.high %v5172_v51, %v5180_v47 }
 0xe12   : > { %v7104_v59 = vpop.eup %7103  ;;  %v5129_v21 = vcombine.low %v5104_v50, %v5112_v52  ;;  %v5145_v55 = vcombine.low %v5120_v19, %v5128_v56  ;;  %v5130_v26 = vcombine.high %v5104_v50, %v5112_v52  ;;  %v5146_v27 = vcombine.high %v5120_v19, %v5128_v56 }
 0xe13   : > { %v7106_v22 = vpop.eup %7105  ;;  %v5418_v57 = vsel %vm4205_vm8, %v7104_v59, 0.0  ;;  %v5189_v8 = vrot.slane %v5181_v20, %v7806_v1  ;;  %v5196_v15 = vrot.slane %v5182_v16, %v7806_v1  ;;  %v5428_v24 = vpack.c.bf16 %v7104_v59, %v7104_v59 }
 0xe14   : > { %v5415_v60 = vsel %vm4205_vm8, %v7106_v22, 0.0  ;;  %5419 = vadd.xlane.f32.xlu0 %v5418_v57  ;;  %v5137_v2 = vrot.slane %v5129_v21, %v7806_v1  ;;  %v5153_v53 = vrot.slane %v5145_v55, %v7806_v1  ;;  %v5144_v61 = vrot.slane %v5130_v26, %v7806_v1 }
 0xe15   : > { %5416 = vadd.xlane.f32.xlu1 %v5415_v60  ;;  %v5197_v41 = vcombine.high %v5189_v8, %v7379_v34  ;;  %v5160_v46 = vrot.slane %v5146_v27, %v7806_v1  ;;  %v5198_v6 = vcombine.high %v5196_v15, %v7379_v34  ;;  %v5427_v35 = vpack.c.bf16 %v7106_v22, %v7106_v22 }
 0xe16   : > { %v5161_v62 = vcombine.low %v5137_v2, %v5153_v53  ;;  %v5162_v63 = vcombine.high %v5137_v2, %v5153_v53 }
 0xe17   : > { %v5163_v18 = vcombine.low %v5144_v61, %v5160_v46  ;;  %v5164_v0 = vcombine.high %v5144_v61, %v5160_v46 }
 0xe18   : > { %v5431_v4 = vpack.c.bf16 %v5189_v8, %v5161_v62  ;;  %v5432_v5 = vpack.c.bf16 %v5197_v41, %v5162_v63 }
 0xe19   : > { %v5433_v11 = vpack.c.bf16 %v5196_v15, %v5163_v18  ;;  %v5434_v17 = vpack.c.bf16 %v5198_v6, %v5164_v0 }
 0xe1a   : > { %v5439_v36 = vsel %vm4253_vm7, %v5431_v4, 0  ;;  %v5485_v10 = vsel %vm4253_vm7, %v5432_v5, 0 }
 0xe1b   : > { %6812 = vmatpush3.bf16.msra.mxu0 %v5439_v36  ;;  %6818 = vmatpush3.bf16.msra.mxu1 %v5485_v10  ;;  %v5531_v25 = vsel %vm4253_vm7, %v5433_v11, 0  ;;  %v5577_v28 = vsel %vm4253_vm7, %v5434_v17, 0 }
 0xe1c   : > { %6823 = vmatprep.subr.bf16.mxu0 %v7379_v34  ;;  %6829 = vmatprep.subr.bf16.mxu1 %v7379_v34 }
 0xe1e   : > { %6814 = vmatmul.mubr.msk.bf16.vlgmr.msra.gmra.mxu0 %vm4205_vm8, %v5427_v35  ;;  %6820 = vmatmul.mubr.msk.bf16.vlgmr.msra.gmra.mxu1 %vm4205_vm8, %v5428_v24 }
 0xe1f   : > { %6824 = vmatpush3.bf16.msra.mxu0 %v5531_v25  ;;  %6830 = vmatpush3.bf16.msra.mxu1 %v5577_v28 }
 0xe20   : > { %6825 = vmatprep.mubr.msk.bf16.mxu0 %vm7380_vm1, %v7379_v34  ;;  %6831 = vmatprep.mubr.msk.bf16.mxu1 %vm7380_vm1, %v7379_v34 }
 0xe21   : > { %6835 = vmatprep.subr.bf16.mxu0 %v7379_v34  ;;  %6843 = vmatprep.subr.bf16.mxu1 %v7379_v34 }
 0xe35   : > { %v5402_v29 = vpop.xlane.xlu1 %5401 }
 0xe36   : > { %v5406_v30 = vsub.f32 %v8531_v39, %v5402_v29  ;;  %v5399_v31 = vpop.xlane.xlu0 %5398 }
 0xe37   : > { %v5405_v49 = vsub.f32 %v8533_v40, %v5399_v31 }
 0xe38   : > { %v5413_v37 = vmul.f32 1.442695, %v5406_v30 }
 0xe39   : > { %v5411_v38 = vmul.f32 1.442695, %v5405_v49  ;;  %v4238_v44 = vpop.xlane.xlu1 %4237 }
 0xe3a   : > { %7107 = vpow2.f32 %v5413_v37  ;;  %v4232_v3 = vpop.xlane.xlu0 %4231 }
 0xe3b   : > { %7109 = vpow2.f32 %v5411_v38 }
 0xe3c   : > { %7111 = vrcp.f32 %v4238_v44 }
 0xe3d   : > { %7113 = vrcp.f32 %v4232_v3 }
 0xe3e   : > { %v4235_v32 = vpop.xlane.xlu0 %4234 }
 0xe3f   : > { %7115 = vrcp.f32 %v4235_v32 }
 0xe42   : > { %v4241_v33 = vpop.xlane.xlu0 %4240 }
 0xe43   : > { %7117 = vrcp.f32 %v4241_v33 }
 0xe47   : > { %v7108_v12 = vpop.eup %7107 }
 0xe48   : > { %v7110_v23 = vpop.eup %7109  ;;  %v5424_v42 = vsel %vm4205_vm8, %v7108_v12, 0.0  ;;  %v5430_v39 = vpack.c.bf16 %v7108_v12, %v7108_v12 }
 0xe49   : > { %v7112_v9 = vpop.eup %7111  ;;  %5425 = vadd.xlane.f32.xlu0 %v5424_v42  ;;  %v5421_v40 = vsel %vm4205_vm8, %v7110_v23, 0.0  ;;  %v5429_v48 = vpack.c.bf16 %v7110_v23, %v7110_v23 }
 0xe4a   : > { %v7114_v51 = vpop.eup %7113  ;;  %5422 = vadd.xlane.f32.xlu1 %v5421_v40  ;;  %6832 = vmatmul.mubr.msk.bf16.vlgmr.msra.gmra.mxu1 %vm4205_vm8, %v5430_v39  ;;  %v4441_v47 = vmul.f32 %v7112_v9, %v8527_v14 }
 0xe4b   : > { %6826 = vmatmul.mubr.msk.bf16.vlgmr.msra.gmra.mxu0 %vm4205_vm8, %v5429_v48  ;;  %6847 = vmatprep.mubr.msk.bf16.mxu1 %vm7380_vm1, %v7379_v34  ;;  %v4439_v50 = vmul.f32 %v7114_v51, %v8523_v7 }
 0xe4c   : > { %6839 = vmatprep.mubr.msk.bf16.mxu0 %vm7380_vm1, %v7379_v34  ;;  %v7116_v52 = vpop.eup %7115 }
 0xe4d   : > { %v4443_v56 = vcombine.low %v4439_v50, %v4441_v47  ;;  %v4444_v20 = vcombine.high %v4439_v50, %v4441_v47  ;;  %v4440_v16 = vmul.f32 %v7116_v52, %v8521_v45 }
 0xe4f   : > { %v4451_v26 = vrot.slane %v4443_v56, %v7804_v58  ;;  %v4458_v27 = vrot.slane %v4444_v20, %v7804_v58 }
 0xe50   : > { %v7118_v19 = vpop.eup %7117 }
 0xe51   : > { %v4442_v59 = vmul.f32 %v7118_v19, %v8525_v13 }
 0xe53   : > { %v4459_v21 = vcombine.low %v4440_v16, %v4442_v59  ;;  %v4460_v55 = vcombine.high %v4440_v16, %v4442_v59 }
 0xe55   : > { %v4467_v22 = vrot.slane %v4459_v21, %v7804_v58  ;;  %v4474_v14 = vrot.slane %v4460_v55, %v7804_v58 }
 0xe57   : > { %v4475_v57 = vcombine.low %v4451_v26, %v4467_v22  ;;  %v4476_v7 = vcombine.high %v4451_v26, %v4467_v22  ;;  %v4491_v8 = vcombine.low %v4458_v27, %v4474_v14  ;;  %v4492_v15 = vcombine.high %v4458_v27, %v4474_v14 }
 0xe59   : > { %v4483_v60 = vrot.slane %v4475_v57, %v7806_v1  ;;  %v4490_v45 = vrot.slane %v4476_v7, %v7806_v1  ;;  %v4499_v13 = vrot.slane %v4491_v8, %v7806_v1  ;;  %v4506_v2 = vrot.slane %v4492_v15, %v7806_v1 }
 0xe5b   : > { %v4511_v53 = vcombine.low %v4483_v60, %v4490_v45  ;;  %v6472_v41 = vcombine.high %v4483_v60, %v4490_v45  ;;  %v4527_v61 = vcombine.low %v4499_v13, %v4506_v2  ;;  %v6473_v46 = vcombine.high %v4499_v13, %v4506_v2 }
 0xe5d   : > { %v8616_v62 = vrot.slane %v4511_v53, %v7804_v58  ;;  %v8619_v63 = vrot.slane %v6472_v41, %v7804_v58  ;;  %v8622_v6 = vrot.slane %v4527_v61, %v7804_v58  ;;  %v8625_v18 = vrot.slane %v6473_v46, %v7804_v58 }
 0xe5f   : > { %v4543_v0 = vcombine.low %v8616_v62, %v8619_v63  ;;  %v4559_v4 = vcombine.low %v8622_v6, %v8625_v18  ;;  %v4544_v13 = vcombine.high %v8616_v62, %v8619_v63  ;;  %v4560_v2 = vcombine.high %v8622_v6, %v8625_v18 }
 0xe61   : > { %v8632_v5 = vrot.slane %v4543_v0, %v7806_v1  ;;  %v8635_v36 = vrot.slane %v4559_v4, %v7806_v1  ;;  %v7051_v0 = vld [vmem:[%s7716_s13 + $0x8] sm:$0xff]   ;;  %v4574_v62 = vrot.slane %v4560_v2, %v7806_v1 }
 0xe62   : > { %6836 = vmatpush3.bf16.msra.mxu0 %v7051_v0 }
 0xe63   : > { %v4575_v10 = vcombine.low %v8632_v5, %v8635_v36  ;;  %6837 = vmatprep.subr.bf16.mxu0 %v7379_v34 }
 0xe9d   : > { %v5420_v31 = vpop.xlane.xlu0 %5419 }
 0xe9e   : > { %v5417_v49 = vpop.xlane.xlu1 %5416  ;;  %7119 = vrcp.f32 %v5420_v31 }
 0xe9f   : > { %7121 = vrcp.f32 %v5417_v49 }
 0xeab   : > { %v7120_v44 = vpop.eup %7119 }
 0xeac   : > { %v7122_v3 = vpop.eup %7121 }
 0xed2   : > { %v5426_v37 = vpop.xlane.xlu0 %5425 }
 0xed3   : > { %v5423_v38 = vpop.xlane.xlu1 %5422  ;;  %7123 = vrcp.f32 %v5426_v37 }
 0xed4   : > { %7125 = vrcp.f32 %v5423_v38  ;;  %v4576_v38 = vcombine.high %v8632_v5, %v8635_v36 }
 0xede   : > { %v5475_v11 = vpop.f32.mrf.mxu0  ;;  %v5521_v17 = vpop.f32.mrf.mxu1 }
 0xedf   : > { %v5624_v23 = vmul.f32 %v7120_v44, %v5521_v17  ;;  %v5623_v9 = vmul.f32 %v7122_v3, %v5475_v11 }
 0xee0   : > { %v6815_v35 = vpop.f32.mrf.mxu0  ;;  %v6821_v24 = vpop.f32.mrf.mxu1 }
 0xee1   : > { %v7124_v32 = vpop.eup %7123  ;;  %v4558_v24 = vrot.slane %v4544_v13, %v7806_v1 }
 0xee2   : > { %v5478_v25 = vpop.f32.mrf.mxu0  ;;  %v5524_v28 = vpop.f32.mrf.mxu1 }
 0xee3   : > { %v7126_v12 = vpop.eup %7125  ;;  %v4577_v49 = vcombine.low %v4558_v24, %v4574_v62 }
 0xee4   : > { %v6816_v29 = vpop.f32.mrf.mxu0  ;;  %v6822_v30 = vpop.f32.mrf.mxu1 }
 0xf0a   : > { %v5613_v33 = vpop.f32.mrf.mxu1 }
 0xf0b   : > { %v5567_v42 = vpop.f32.mrf.mxu0  ;;  %v5626_v39 = vmul.f32 %v7124_v32, %v5613_v33 }
 0xf0c   : > { %v5625_v40 = vmul.f32 %v7126_v12, %v5567_v42  ;;  %v6833_v48 = vpop.f32.mrf.mxu1 }
 0xf0d   : > { %v5643_v51 = vcombine.low %v5624_v23, %v5626_v39  ;;  %v5644_v47 = vcombine.high %v5624_v23, %v5626_v39  ;;  %v6827_v50 = vpop.f32.mrf.mxu0  ;;  %v4578_v23 = vcombine.high %v4558_v24, %v4574_v62 }
 0xf0e   : > { %v5627_v52 = vcombine.low %v5623_v9, %v5625_v40  ;;  %v5628_v19 = vcombine.high %v5623_v9, %v5625_v40  ;;  %v5616_v56 = vpop.f32.mrf.mxu1 }
 0xf0f   : > { %v5651_v20 = vrot.slane %v5643_v51, %v7804_v58  ;;  %v5658_v16 = vrot.slane %v5644_v47, %v7804_v58  ;;  %v5570_v59 = vpop.f32.mrf.mxu0 }
 0xf10   : > { %v5635_v21 = vrot.slane %v5627_v52, %v7804_v58  ;;  %v5642_v55 = vrot.slane %v5628_v19, %v7804_v58  ;;  %v6834_v26 = vpop.f32.mrf.mxu1 }
 0xf11   : > { %v6828_v27 = vpop.f32.mrf.mxu0 }
 0xf12   : > { %v5659_v22 = vcombine.low %v5635_v21, %v5651_v20  ;;  %v5660_v14 = vcombine.high %v5635_v21, %v5651_v20  ;;  %v5675_v57 = vcombine.low %v5642_v55, %v5658_v16  ;;  %v5676_v7 = vcombine.high %v5642_v55, %v5658_v16 }
 0xf14   : > { %v5667_v8 = vrot.slane %v5659_v22, %v7806_v1  ;;  %v5674_v15 = vrot.slane %v5660_v14, %v7806_v1  ;;  %v5683_v60 = vrot.slane %v5675_v57, %v7806_v1  ;;  %v5690_v45 = vrot.slane %v5676_v7, %v7806_v1 }
 0xf16   : > { %v5695_v53 = vcombine.low %v5667_v8, %v5674_v15  ;;  %v6490_v41 = vcombine.high %v5667_v8, %v5674_v15  ;;  %v5711_v61 = vcombine.low %v5683_v60, %v5690_v45  ;;  %v6491_v46 = vcombine.high %v5683_v60, %v5690_v45 }
 0xf18   : > { %v5702_v4 = vrot.slane %v5695_v53, %v7804_v58  ;;  %v5710_v11 = vrot.slane %v6490_v41, %v7804_v58  ;;  %v5718_v17 = vrot.slane %v5711_v61, %v7804_v58  ;;  %v5726_v35 = vrot.slane %v6491_v46, %v7804_v58  ;;  %v7052_v58 = vld [vmem:[%s7716_s13] sm:$0xff]   ;;  %s8921_s13 = sld [smem:[#allocation31_spill]]  ;;  %v7055_v46 = vld [vmem:[%s7738_s8 + $0x18] sm:$0xff]  }
 0xf19   : > { %6838 = vmatpush3.bf16.msra.mxu0 %v7052_v58 }
 0xf1a   : > { %v5728_v63 = vcombine.high %v5702_v4, %v5710_v11  ;;  %v5744_v6 = vcombine.high %v5718_v17, %v5726_v35  ;;  %v5727_v18 = vcombine.low %v5702_v4, %v5710_v11  ;;  %v5743_v25 = vcombine.low %v5718_v17, %v5726_v35  ;;  %6851 = vmatprep.subr.bf16.mxu0 %v7379_v34 }
 0xf1c   : > { %v5742_v28 = vrot.slane %v5728_v63, %v7806_v1  ;;  %v5758_v29 = vrot.slane %v5744_v6, %v7806_v1  ;;  %v5735_v30 = vrot.slane %v5727_v18, %v7806_v1  ;;  %v5751_v31 = vrot.slane %v5743_v25, %v7806_v1  ;;  %v6495_v6 = vld [vmem:[%s8925_s11] ss:$0 sm:$0xff] }
 0xf1e   : > { %v5761_v37 = vcombine.low %v5742_v28, %v5758_v29  ;;  %v5760_v44 = vcombine.high %v5735_v30, %v5751_v31  ;;  %v5759_v3 = vcombine.low %v5735_v30, %v5751_v31  ;;  %v5762_v12 = vcombine.high %v5742_v28, %v5758_v29  ;;  %s8922_s5 = scalar_lea.vmem [#allocation9], %s8921_s13  ;;  %v6496_v29 = vld [vmem:[%s8927_s29] ss:$0 sm:$0xff] }
 0xf1f   : > { %v7053_v41 = vld [vmem:[%s8922_s5 + $0x8] sm:$0xff]   ;;  %s8923_s4 = smov %s8922_s5 }
 0xf20   : > { %v7035_v32 = vpack.i.bf16 %v5761_v37, %v4577_v49  ;;  %v7030_v33 = vpack.i.bf16 %v5760_v44, %v4576_v38  ;;  %v7040_v1 = vpack.i.bf16 %v5762_v12, %v4578_v23  ;;  %6844 = vmatpush3.bf16.msra.mxu1 %v7053_v41  ;;  %v7054_v61 = vld [vmem:[%s8923_s4] sm:$0xff]   ;;  %v7056_v37 = vld [vmem:[%s7738_s8 + $0x10] sm:$0xff]   ;;  %v7057_v38 = vld [vmem:[%s7738_s8 + $0x8] sm:$0xff]  }
 0xf21   : > { %6845 = vmatprep.subr.bf16.mxu1 %v7379_v34  ;;  %v7058_v44 = vld [vmem:[%s7738_s8] sm:$0xff]  }
 0xf22   : > { %7036 = vrot.lane.b32.xlu0 %v7035_v32, %s7388_s0  ;;  %7031 = vrot.lane.b32.xlu1 %v7030_v33, %s7389_s21 }
 0xf24   : > { %6846 = vmatpush3.bf16.msra.mxu1 %v7054_v61 }
 0xf26   : > { %7041 = vrot.lane.b32.xlu1 %v7040_v1, %s7390_s16 }
 0xf94   : > { %v7037_v42 = vpop.permute.xlu0 %7036  ;;  %v7032_v39 = vpop.permute.xlu1 %7031 }
 0xf95   : > { %v7034_v9 = vunpack.i.h.bf16 %v7032_v39  ;;  %v7033_v40 = vunpack.i.l.bf16 %v7032_v39  ;;  %v7039_v48 = vunpack.i.h.bf16 %v7037_v42  ;;  %v7038_v51 = vunpack.i.l.bf16 %v7037_v42 }
 0xf97   : > { %v4591_v47 = vsel %vm1518_vm3, %v4575_v10, %v7033_v40  ;;  %v5775_v50 = vsel %vm1518_vm3, %v5759_v3, %v7034_v9  ;;  %v6497_v3 = vld [vmem:[%s915_s19] ss:$0 sm:$0xff] }
 0xf98   : > { %v7042_v52 = vpop.permute.xlu1 %7041  ;;  %v4592_v20 = vsel %vm2089_vm5, %v4591_v47, %v7038_v51  ;;  %v5776_v16 = vsel %vm2089_vm5, %v5775_v50, %v7039_v48 }
 0xf99   : > { %v7044_v19 = vunpack.i.h.bf16 %v7042_v52  ;;  %v7043_v56 = vunpack.i.l.bf16 %v7042_v52 }
 0xf9b   : > { %v4593_v59 = vsel %vm2091_vm6, %v4592_v20, %v7043_v56  ;;  %v5777_v21 = vsel %vm2091_vm6, %v5776_v16, %v7044_v19 }
 0xf9c   : > { %v5778_v55 = vpack.c.bf16 %v5777_v21, %v4593_v59 }
 0xf9e   : > { %6840 = vmatmul.mubr.msk.bf16.vlgmr.msra.gmra.mxu0 %vm1014_vm2, %v5778_v55 }
 0xf9f   : > { %6859 = vmatprep.mubr.msk.bf16.mxu0 %vm7380_vm1, %v7379_v34  ;;  %6852 = vmatpush3.bf16.msra.mxu0 %v7055_v46 }
 0xfa0   : > { %6853 = vmatprep.subr.bf16.mxu0 %v7379_v34 }
 0xfa3   : > { %6854 = vmatpush3.bf16.msra.mxu0 %v7056_v37 }
 0xfa4   : > { %6855 = vmatprep.subr.bf16.mxu0 %v7379_v34 }
 0xfa7   : > { %6856 = vmatpush3.bf16.msra.mxu0 %v7057_v38 }
 0xfa8   : > { %6857 = vmatprep.subr.bf16.mxu0 %v7379_v34  ;;  %v6501_v34 = vld [vmem:[%s923_s3] ss:$0 sm:$0xff] }
 0xfab   : > { %6858 = vmatpush3.bf16.msra.mxu0 %v7058_v44 }
0x105e   : > { %v5828_v5 = vpop.f32.mrf.mxu0 }
0x105f   : > { %v5835_v36 = vadd.f32 %v5828_v5, %v8196_v54 }
0x1060   : > { %v6841_v10 = vpop.f32.mrf.mxu0 }
0x1061   : > { %v5837_v26 = vsel %vm1014_vm2, %v5835_v36, 0.0 }
0x1062   : > { %5838 = vadd.xlane.f32.xlu1 %v5837_v26  ;;  %v5831_v27 = vpop.f32.mrf.mxu0 }
0x1063   : > { %v5836_v22 = vadd.f32 %v5831_v27, %v8198_v43 }
0x1064   : > { %v6842_v14 = vpop.f32.mrf.mxu0 }
0x1065   : > { %v5840_v57 = vsel %vm1014_vm2, %v5836_v22, 0.0 }
0x1066   : > { %5841 = vadd.xlane.f32.xlu0 %v5840_v57 }
0x10eb   : > { %v5839_v7 = vpop.xlane.xlu1 %5838 }
0x10ec   : > { %v5843_v8 = vmul.f32 0.03125, %v5839_v7 }
0x10ee   : > { %v5845_v15 = vsub.f32 %v5835_v36, %v5843_v8 }
0x10ef   : > { %v5842_v60 = vpop.xlane.xlu0 %5841 }
0x10f0   : > { %v5844_v45 = vmul.f32 0.03125, %v5842_v60  ;;  %v5847_v54 = vmul.f32 %v5845_v15, %v5845_v15 }
0x10f2   : > { %v5846_v13 = vsub.f32 %v5836_v22, %v5844_v45  ;;  %v5849_v2 = vsel %vm1014_vm2, %v5847_v54, 0.0 }
0x10f3   : > { %5850 = vadd.xlane.f32.xlu0 %v5849_v2  ;;  %v6507_v2 = vld [vmem:[%s926_s24] ss:$0 sm:$0xff] }
0x10f4   : > { %v5848_v53 = vmul.f32 %v5846_v13, %v5846_v13 }
0x10f6   : > { %v5852_v43 = vsel %vm1014_vm2, %v5848_v53, 0.0 }
0x10f7   : > { %5853 = vadd.xlane.f32.xlu1 %v5852_v43  ;;  %v6508_v43 = vld [vmem:[%s929_s30] ss:$0 sm:$0xff] }
0x117c   : > { %v5851_v0 = vpop.xlane.xlu0 %5850 }
0x117d   : > { %v5855_v4 = vmul.f32 0.03125, %v5851_v0 }
0x117f   : > { %v5857_v11 = vadd.f32 1e-06, %v5855_v4 }
0x1180   : > { %v5854_v17 = vpop.xlane.xlu1 %5853 }
0x1181   : > { %7127 = vrsqrt.f32 %v5857_v11  ;;  %v5856_v35 = vmul.f32 0.03125, %v5854_v17 }
0x1183   : > { %v5858_v24 = vadd.f32 1e-06, %v5856_v35 }
0x1185   : > { %7129 = vrsqrt.f32 %v5858_v24 }
0x118e   : > { %v7128_v62 = vpop.eup %7127 }
0x118f   : > { %v5861_v63 = vmul.f32 %v7128_v62, %v5845_v15 }
0x1191   : > { %v5869_v28 = vmul.f32 %v6495_v6, %v5861_v63 }
0x1192   : > { %v7130_v18 = vpop.eup %7129 }
0x1193   : > { %v5862_v25 = vmul.f32 %v7130_v18, %v5846_v13  ;;  %v5877_v31 = vadd.f32 %v6496_v29, %v5869_v28 }
0x1195   : > { %v5870_v30 = vmul.f32 %v6495_v6, %v5862_v25 }
0x1197   : > { %v5878_v58 = vadd.f32 %v6496_v29, %v5870_v30 }
0x1199   : > { %v5895_v49 = vpack.c.bf16 %v5878_v58, %v5877_v31 }
0x119b   : > { %6848 = vmatmul.mubr.msk.bf16.vlgmr.msra.gmra.mxu1 %vm1014_vm2, %v5895_v49 }
0x125b   : > { %v5951_v32 = vpop.f32.mrf.mxu1 }
0x125c   : > { %v5952_v12 = vadd.f32 %v6497_v3, %v5951_v32 }
0x125d   : > { %v6849_v33 = vpop.f32.mrf.mxu1 }
0x125e   : > { %v5958_v39 = vmax.f32 %v5952_v12, 0.0 }
0x125f   : > { %v5954_v23 = vpop.f32.mrf.mxu1 }
0x1260   : > { %v5955_v1 = vadd.f32 %v6497_v3, %v5954_v23 }
0x1261   : > { %v6850_v42 = vpop.f32.mrf.mxu1 }
0x1262   : > { %v5959_v9 = vmax.f32 %v5955_v1, 0.0 }
0x1264   : > { %v5960_v40 = vpack.c.bf16 %v5959_v9, %v5958_v39 }
0x1266   : > { %6860 = vmatmul.mubr.msk.bf16.vlgmr.msra.gmra.mxu0 %vm5991_vm9, %v5960_v40 }
0x1326   : > { %v6029_v48 = vpop.f32.mrf.mxu0 }
0x1327   : > { %v6030_v51 = vadd.f32 %v6501_v34, %v6029_v48 }
0x1328   : > { %v6861_v47 = vpop.f32.mrf.mxu0 }
0x1329   : > { %v6036_v50 = vadd.f32 %v6030_v51, %v5877_v31 }
0x132a   : > { %v6032_v52 = vpop.f32.mrf.mxu0 }
0x132b   : > { %v6033_v19 = vadd.f32 %v6501_v34, %v6032_v52  ;;  %v6038_v56 = vsel %vm1014_vm2, %v6036_v50, 0.0 }
0x132c   : > { %6039 = vadd.xlane.f32.xlu0 %v6038_v56  ;;  %v6862_v20 = vpop.f32.mrf.mxu0 }
0x132d   : > { %v6037_v16 = vadd.f32 %v6033_v19, %v5878_v58 }
0x132f   : > { %v6041_v59 = vsel %vm1014_vm2, %v6037_v16, 0.0 }
0x1330   : > { %6042 = vadd.xlane.f32.xlu1 %v6041_v59 }
0x13b5   : > { %v6040_v21 = vpop.xlane.xlu0 %6039 }
0x13b6   : > { %v6044_v55 = vmul.f32 0.03125, %v6040_v21 }
0x13b8   : > { %v6046_v5 = vsub.f32 %v6036_v50, %v6044_v55 }
0x13b9   : > { %v6043_v36 = vpop.xlane.xlu1 %6042 }
0x13ba   : > { %v6045_v10 = vmul.f32 0.03125, %v6043_v36  ;;  %v6048_v26 = vmul.f32 %v6046_v5, %v6046_v5 }
0x13bc   : > { %v6047_v27 = vsub.f32 %v6037_v16, %v6045_v10  ;;  %v6050_v22 = vsel %vm1014_vm2, %v6048_v26, 0.0 }
0x13bd   : > { %6051 = vadd.xlane.f32.xlu0 %v6050_v22 }
0x13be   : > { %v6049_v14 = vmul.f32 %v6047_v27, %v6047_v27 }
0x13c0   : > { %v6053_v57 = vsel %vm1014_vm2, %v6049_v14, 0.0 }
0x13c1   : > { %6054 = vadd.xlane.f32.xlu1 %v6053_v57 }
0x1446   : > { %v6052_v7 = vpop.xlane.xlu0 %6051 }
0x1447   : > { %v6056_v8 = vmul.f32 0.03125, %v6052_v7 }
0x1449   : > { %v6058_v15 = vadd.f32 1e-06, %v6056_v8 }
0x144a   : > { %v6055_v60 = vpop.xlane.xlu1 %6054 }
0x144b   : > { %7131 = vrsqrt.f32 %v6058_v15  ;;  %v6057_v45 = vmul.f32 0.03125, %v6055_v60 }
0x144d   : > { %v6059_v54 = vadd.f32 1e-06, %v6057_v45 }
0x144f   : > { %7133 = vrsqrt.f32 %v6059_v54 }
0x1458   : > { %v7132_v13 = vpop.eup %7131 }
0x1459   : > { %v6062_v53 = vmul.f32 %v7132_v13, %v6046_v5 }
0x145b   : > { %v6070_v41 = vmul.f32 %v6507_v2, %v6062_v53 }
0x145c   : > { %v7134_v61 = vpop.eup %7133 }
0x145d   : > { %v6078_v46 = vadd.f32 %v6508_v43, %v6070_v41  ;;  %v6063_v0 = vmul.f32 %v7134_v61, %v6047_v27 }
0x145f   : > { %6080 = vst.msk [vmem:[#allocation2] sm:$0xff] %vm1014_vm2, %v6078_v46  ;;  %v6071_v4 = vmul.f32 %v6507_v2, %v6063_v0  ;;  %6085 = sbr.rel (%p6509_p12) target bundleno = 5221 (0x1465), region = 120 }
0x1461   : > { %v6079_v11 = vadd.f32 %v6508_v43, %v6071_v4 }
0x1463   : > { %6081 = vst.msk [vmem:[#allocation2 + $0x8] sm:$0xff] %vm1014_vm2, %v6079_v11 }
0x1464   : > { %6086 = vst.msk [vmem:[%s7748_s26] sm:$0xff] %vm1014_vm2, %v6078_v46  ;;  %6087 = vst.msk [vmem:[%s7748_s26 + $0x8] sm:$0xff] %vm1014_vm2, %v6079_v11 }
0x1465 PF: > { %s8932_s30 = sld [smem:[#allocation21_spill]]  ;;  %s6102_s6 = sshll.u32 %s7748_s26, 4  ;;  %s8749_s6 = int_to_ptr.vmem [resolvable:$true] %s6102_s6 }
0x1466   : > { %s8933_s15 = sld [smem:[#allocation17_spill]]  ;;  %s7243_s11 = scalar_lea.vmem %s8749_s6, 256 }
0x1467   : > { %s8934_s24 = sld [smem:[#allocation25_spill]]  ;;  %p7244_p9 = scmp.ne.s32.totalorder %s8749_s6, %s7243_s11 }
0x1468   : > { %s8935_s4 = sld [smem:[#allocation50_spill]]  ;;  %s7391_s23 = smov [#allocation11]  }
0x1469   : > { %s7247_s14 = sshll.u32 %s7391_s23, 4  ;;  %s7248_s14 = int_to_ptr.vmem [resolvable:$false] %s7247_s14 }
0x146a   : > { %s7249_s18 = scalar_lea.vmem %s7248_s14, 512  ;;  %p7250_p3 = scmp.lt.s32.totalorder %s8749_s6, %s7248_s14 }
0x146b   : > { %s6522_s27 = sshll.u32 %s8932_s30, 8  ;;  %p7251_p0 = scmp.lt.s32.totalorder %s7249_s18, %s7243_s11 }
0x146c   : > { %s8936_s2 = sand.u32 1, %s8933_s15  }
0x146d   : > { %s8753_s20 = scalar_lea.sflag [#allocation5], %s8936_s2  ;;  %p8937_p2 = scmp.ne.s32.totalorder %s8934_s24, 0 }
0x146e   : > { %s8746_s25 = scalar_lea.hbm %s8935_s4, %s6522_s27  ;;  %p7252_p6 = por %p7251_p0, %p7250_p3 }
0x146f   : > { %p7245_p7 = pnand %p7244_p9, %p8937_p2 }
0x1471   : > { %p7246_p4 = pneg %p7245_p7 }
0x1473   : > { %p7253_p5 = pnand %p7252_p6, %p7246_p4 }
0x1475   : > { %7256 = shalt.err (!%p7253_p5)
}
0x1476   : > { %s7257_s26 = scalar_lea.hbm %s8746_s25, 256  ;;  %s7261_s0 = scalar_lea.hbm %s8935_s4, 512 }
0x1477   : > { %p7258_p8 = scmp.ne.s32.totalorder %s8746_s25, %s7257_s26  ;;  %p7262_p10 = scmp.lt.s32.totalorder %s8746_s25, %s8935_s4 }
0x1478   : > { %p7263_p13 = scmp.lt.s32.totalorder %s7261_s0, %s7257_s26 }
0x1479   : > { %p7259_p11 = pnand %p7258_p8, %p8937_p2 }
0x147a   : > { %p7264_p12 = por %p7263_p13, %p7262_p10 }
0x147b   : > { %p7260_p1 = pneg %p7259_p11 }
0x147d   : > { %p7265_p9 = pnand %p7264_p12, %p7260_p1 }
0x147f   : > { %7268 = shalt.err (!%p7265_p9)
}
0x1480   : > { %s7392_s1 = smov 128  }
0x1481   : > { %6877 = dma.vmem_to_hbm [thread:$0]  (%p8937_p2), %s8749_s6, 256, %s8746_s25, %s8753_s20, %s7392_s1, %s7392_s1, %s7389_s21  }
0x1482 PF: > { %s8938_s12 = sld [smem:[#allocation24_spill]] }
0x1483   : > { %s8939_s3 = sld [smem:[#allocation16_spill]] }
0x1484   : > { %s8940_s19 = sld [smem:[#allocation26_spill]] }
0x1488   : > { %p6904_p7 = scmp.ge.s32.totalorder %s8938_s12, 2 }
0x1489   : > { %s6117_s22 = sand.u32 1, %s8939_s3  }
0x148a   : > { %p8941_p4 = scmp.ne.s32.totalorder %s8940_s19, 0  ;;  %s6118_s9 = scalar_lea.sflag [#allocation5], %s6117_s22 }
0x148c   : > { %p6894_p3 = pnand %p6904_p7, %p8941_p4 }
0x148e   : > { %p6895_p0 = pneg %p6894_p3 }
0x1490   : > { %7326 = dma.done.wait (%p6895_p0), %s6118_s9, 256  }
0x1491   : > { %7328 = vsyncadd (%p6895_p0), %s6118_s9, 4294967040  ;;  %s37_s3 = sadd.s32 1, %s8938_s12   ;;  %s8942_s0 = sld [smem:[#allocation17_spill]] }
0x1492   : > { %p34_p6 = scmp.ge.s32.totalorder %s37_s3, 6   ;;  %s8943_s30 = sld [smem:[#allocation18_spill]] }
0x1493   : > { %s8944_s20 = sld [smem:[#allocation30_spill]] }
0x1494   : > { %s8945_s21 = sld [smem:[#allocation19_spill]] }
0x1495   : > { %s8946_s1 = sld [smem:[#allocation20_spill]] }
0x1496   : > { %s8947_s22 = sld [smem:[#allocation29_spill]]  ;;  %36 = sbr.rel (!%p34_p6) target bundleno = 31 (0x1f), region = 207 }
0x1497   : > { %s8948_s2 = sld [smem:[#allocation22_spill]] }
0x1498   : > { %s8949_s23 = sld [smem:[#allocation23_spill]] }
0x1499   : > { %s8950_s24 = sld [smem:[#allocation27_spill]] }
0x149a   : > { %s8951_s25 = sld [smem:[#allocation28_spill]] }
0x149b   :  { %6123 = vsyncpa [#allocation4], 1 }
0x149c   :  { %6125 = vsyncpa [#allocation4 + $0x1], 1 }
0x149d   :  { %6126 = vsyncpa [#allocation7], 1 }
0x149e   :  { %6127 = vsyncpa [#allocation10], 1 }
0x149f   :  { %6129 = vsyncpa [#allocation10 + $0x1], 1 }
0x14a0   :  { %6130 = vsyncpa [#allocation5], 1 }
0x14a1   :  { %6132 = vsyncpa [#allocation5 + $0x1], 1 }

</bundles_post_ra>
